<compile_context>
chip_gen: v5e
topology: v5e:2x2
jax: 0.10.0
libtpu: 0.0.40
codegen_flags: <defaults>
</compile_context>

<pallas_src>
import functools

import jax
import jax.numpy as jnp
from jax import lax
from jax.experimental import pallas as pl
from jax.experimental.pallas import tpu as pltpu


def _round_up(x, m):
    return (x + m - 1) // m * m


def _conv_bn_silu_kernel(x_ref, xh_ref, w_ref, s_ref, b_ref, o_ref, xs_ref,
                         *, tp, halo, wp2, k):
    """One (batch, c_out-tile, row-band) grid step.

    x_ref : (tp, C_in)        bf16  band of flattened padded positions
    xh_ref: (halo, C_in)      bf16  next k padded rows (tap halo)
    w_ref : (k*k, C_in, Tco)  bf16  conv weights (BN scale NOT folded)
    s_ref : (1, Tco)          f32   BN scale  (gamma / sqrt(var + eps))
    b_ref : (1, Tco)          f32   BN bias   (beta - mean * scale)
    o_ref : (tp, Tco)         bf16  output band
    xs_ref: (tp + halo, C_in) bf16  scratch: band + halo assembled
    """
    # Assemble band + halo once (sublane-aligned static stores); every tap is a
    # static slice of this slab -- no im2col in HBM, no f32 round trip.
    xs_ref[0:tp, :] = x_ref[...]
    xs_ref[tp:tp + halo, :] = xh_ref[...]
    xs_full = xs_ref[...]                                  # stays bf16

    tco = o_ref.shape[-1]
    acc = jnp.zeros((tp, tco), jnp.float32)
    # TODO(synk): for C_in < MXU depth, fold the k*k taps into one
    # (tp, k*k*C_in) LHS (deeper contraction, fewer MXU pushes); that needs a
    # lane-axis concatenate whose Mosaic lowering is not guaranteed for
    # unaligned small C_in, so the per-tap form is kept for robustness.
    for di in range(k):
        for dj in range(k):
            d = di * wp2 + dj                              # static flat tap offset
            xs = xs_full[d:d + tp, :]                      # bf16 slice -> MXU
            acc = acc + jnp.dot(xs, w_ref[di * k + dj],
                                preferred_element_type=jnp.float32)

    y = acc * s_ref[...] + b_ref[...]                      # BN in f32
    sig = pl.reciprocal(1.0 + jnp.exp(-y), approx=True)    # sigmoid on the EUP
    o_ref[...] = (y * sig).astype(o_ref.dtype)             # bf16 store


def conv_bn_silu(x_nchw, weight, gamma, beta, running_mean, running_var,
                 *, stride=1, eps=1e-5, tp_target=512):
    """Forward of Conv(c1, c2, k, s=1) (autopad, no bias) + BN (inference) + SiLU.

    x_nchw: (N, C_in, H, W) float32
    weight: (C_out, C_in, k, k) float32 (PyTorch layout, groups=1)
    """
    assert stride == 1, "this kernel implements the s=1 path"
    n, c_in, h, w_sp = x_nchw.shape
    c_out, c_in_w, kh, kw = weight.shape
    assert c_in_w == c_in and kh == kw
    k = kh
    assert k % 2 == 1, "autopad 'same' path assumes odd kernel size"
    pad = k // 2

    # Padded row stride rounded to a sublane multiple (row-tap offsets aligned).
    wp2 = _round_up(w_sp + 2 * pad, 8)

    # Row-band tiling: rb rows per band, multiple of k so the k-row halo block
    # lands on a block boundary; ~tp_target flattened positions per band.
    rows_target = max(1, tp_target // wp2)
    rb = k * max(1, rows_target // k)
    nb = -(-h // rb)                         # number of row bands
    tp = rb * wp2                            # positions per band (mult of 8)
    halo = k * wp2                           # halo positions (next k rows)
    r_out = nb * rb                          # band-covered rows
    r_in = r_out + k                         # padded input rows needed
    pout = r_out * wp2

    # ---- activation: NCHW -> NHWC bf16, pad to (r_in, wp2), flatten ---------
    x_nhwc = jnp.transpose(x_nchw, (0, 2, 3, 1)).astype(jnp.bfloat16)
    extra_bottom = r_in - (h + 2 * pad)
    extra_right = wp2 - (w_sp + 2 * pad)
    xp = jnp.pad(x_nhwc, ((0, 0), (pad, pad + extra_bottom),
                          (pad, pad + extra_right), (0, 0)))
    x_flat = xp.reshape(n, r_in * wp2, c_in)

    # ---- weights / BN params (scale kept in f32, NOT folded into bf16 w) ----
    c_out_p = _round_up(c_out, 128)
    if c_out_p <= 512:
        tco = c_out_p
    else:
        tco = 256 if c_out_p % 256 == 0 else 128
    n_co = c_out_p // tco

    w_taps = jnp.transpose(weight, (2, 3, 1, 0)).reshape(k * k, c_in, c_out)
    w_taps = jnp.pad(w_taps, ((0, 0), (0, 0), (0, c_out_p - c_out))).astype(jnp.bfloat16)
    scale = gamma / jnp.sqrt(running_var + eps)
    bias = beta - running_mean * scale
    scale_p = jnp.pad(scale, (0, c_out_p - c_out)).reshape(1, c_out_p).astype(jnp.float32)
    bias_p = jnp.pad(bias, (0, c_out_p - c_out)).reshape(1, c_out_p).astype(jnp.float32)

    # ---- VMEM budget from the actual chip (v7x: 64 MiB, v5e/v6e: 128 MiB) ---
    try:
        vmem_cap = getattr(pltpu.get_tpu_info(), "vmem_capacity_bytes",
                           128 * 1024 * 1024)
    except Exception:
        vmem_cap = 128 * 1024 * 1024
    vmem_limit = min(96 * 1024 * 1024, int(vmem_cap) * 3 // 4)

    hq = rb // k                              # halo block-index stride
    grid = (n, n_co, nb)

    cost = pl.CostEstimate(
        flops=2 * n * pout * (k * k * c_in) * c_out_p,
        transcendentals=n * pout * c_out_p,
        bytes_accessed=(n * r_in * wp2 * c_in * 2
                        + k * k * c_in * c_out_p * 2 + 2 * c_out_p * 4
                        + n * pout * c_out_p * 2),
    )

    out = pl.pallas_call(
        functools.partial(_conv_bn_silu_kernel, tp=tp, halo=halo, wp2=wp2, k=k),
        out_shape=jax.ShapeDtypeStruct((n, pout, c_out_p), jnp.bfloat16),
        grid=grid,
        in_specs=[
            # current band of flattened padded positions
            pl.BlockSpec((None, tp, c_in), lambda b, co, r: (b, r, 0)),
            # next k rows (halo) -- second view of the same array
            pl.BlockSpec((None, halo, c_in), lambda b, co, r: (b, (r + 1) * hq, 0)),
            # weights / BN scale / BN bias (constant over batch & rows)
            pl.BlockSpec((k * k, c_in, tco), lambda b, co, r: (0, 0, co)),
            pl.BlockSpec((1, tco), lambda b, co, r: (0, co)),
            pl.BlockSpec((1, tco), lambda b, co, r: (0, co)),
        ],
        out_specs=pl.BlockSpec((None, tp, tco), lambda b, co, r: (b, r, co)),
        scratch_shapes=[pltpu.VMEM((tp + halo, c_in), jnp.bfloat16)],
        compiler_params=pltpu.CompilerParams(
            dimension_semantics=("parallel", "parallel", "parallel"),
            vmem_limit_bytes=vmem_limit),
        cost_estimate=cost,
    )(x_flat, x_flat, w_taps, scale_p, bias_p)

    # Crop garbage pad positions / padded channels, back to NCHW f32.
    # TODO(synk): returning NHWC (and fusing the crop into the consumer) would
    # remove this extra full pass over the output in HBM.
    out = out[:, :h * wp2, :c_out].reshape(n, h, wp2, c_out)[:, :, :w_sp, :]
    return jnp.transpose(out, (0, 3, 1, 2)).astype(jnp.float32)


def _reference(x_nchw, weight, gamma, beta, running_mean, running_var, eps=1e-5):
    pad = weight.shape[-1] // 2
    y = lax.conv_general_dilated(
        x_nchw, weight, window_strides=(1, 1),
        padding=[(pad, pad), (pad, pad)],
        dimension_numbers=("NCHW", "OIHW", "NCHW"))
    scale = (gamma / jnp.sqrt(running_var + eps)).reshape(1, -1, 1, 1)
    bias = (beta - running_mean * gamma / jnp.sqrt(running_var + eps)).reshape(1, -1, 1, 1)
    y = y * scale + bias
    return y * jax.nn.sigmoid(y)


if __name__ == "__main__":
    key = jax.random.PRNGKey(0)
    k_x, k_w, k_g, k_b, k_m, k_v = jax.random.split(key, 6)

    N, C1, C2, H, W, K = 2, 4, 8, 16, 16, 3

    x = jax.random.normal(k_x, (N, C1, H, W), jnp.float32)
    weight = jax.random.normal(k_w, (C2, C1, K, K), jnp.float32) * 0.1
    gamma = 1.0 + 0.1 * jax.random.normal(k_g, (C2,), jnp.float32)
    beta = 0.1 * jax.random.normal(k_b, (C2,), jnp.float32)
    running_mean = 0.05 * jax.random.normal(k_m, (C2,), jnp.float32)
    running_var = jnp.abs(1.0 + 0.1 * jax.random.normal(k_v, (C2,), jnp.float32))

    fn = jax.jit(conv_bn_silu)
    out = fn(x, weight, gamma, beta, running_mean, running_var)
    out = jax.block_until_ready(out)

    ref = _reference(x, weight, gamma, beta, running_mean, running_var)
    assert out.shape == (N, C2, H, W)
    # bf16 activations/weights/output + approx-reciprocal sigmoid -> looser tol
    assert jnp.allclose(out, ref, rtol=2e-2, atol=2e-2), "mismatch vs JAX reference"

    # TODO(synk): BatchNorm is implemented in inference mode (running stats);
    # PyTorch training-mode batch statistics are not reproduced here.
    print("KERNEL_OK")
</pallas_src>

<mosaic_0001>
module attributes {stable_mosaic.version = 11 : i64} {
  func.func @_conv_bn_silu_kernel(%arg0: i32, %arg1: i32, %arg2: i32, %arg3: memref<1x504x4xbf16, #tpu.memory_space<vmem>>, %arg4: memref<1x72x4xbf16, #tpu.memory_space<vmem>>, %arg5: memref<9x4x128xbf16, #tpu.memory_space<vmem>>, %arg6: memref<1x128xf32, #tpu.memory_space<vmem>>, %arg7: memref<1x128xf32, #tpu.memory_space<vmem>>, %arg8: memref<1x504x128xbf16, #tpu.memory_space<vmem>>, %arg9: memref<576x4xbf16, #tpu.memory_space<vmem>>) attributes {dimension_semantics = [#tpu.dimension_semantics<parallel>, #tpu.dimension_semantics<parallel>, #tpu.dimension_semantics<parallel>], iteration_bounds = array<i64: 2, 1, 1>, scalar_prefetch = 0 : i64, scratch_operands = 1 : i64, tpu.core_type = #tpu.core_type<tc>, window_params = [{transform_indices = @transform_0, window_bounds = array<i64: 1, 504, 4>}, {transform_indices = @transform_1, window_bounds = array<i64: 1, 72, 4>}, {transform_indices = @transform_2, window_bounds = array<i64: 9, 4, 128>}, {transform_indices = @transform_3, window_bounds = array<i64: 1, 128>}, {transform_indices = @transform_4, window_bounds = array<i64: 1, 128>}, {transform_indices = @transform_5, window_bounds = array<i64: 1, 504, 128>}]} {
    %c0 = arith.constant 0 : index
    %c0_0 = arith.constant 0 : index
    %c0_1 = arith.constant 0 : index
    %0 = vector.load %arg3[%c0, %c0_0, %c0_1] : memref<1x504x4xbf16, #tpu.memory_space<vmem>>, vector<1x504x4xbf16>
    %1 = vector.shape_cast %0 : vector<1x504x4xbf16> to vector<504x4xbf16>
    %c0_2 = arith.constant 0 : index
    %c0_3 = arith.constant 0 : index
    %2 = vector.load %arg9[%c0_2, %c0_3] : memref<576x4xbf16, #tpu.memory_space<vmem>>, vector<504x4xbf16>
    tpu.vector_store %arg9[%c0_2, %c0_3], %1 {strides = array<i32>} : memref<576x4xbf16, #tpu.memory_space<vmem>>, vector<504x4xbf16>,
    %c0_4 = arith.constant 0 : index
    %c0_5 = arith.constant 0 : index
    %c0_6 = arith.constant 0 : index
    %3 = vector.load %arg4[%c0_4, %c0_5, %c0_6] : memref<1x72x4xbf16, #tpu.memory_space<vmem>>, vector<1x72x4xbf16>
    %4 = vector.shape_cast %3 : vector<1x72x4xbf16> to vector<72x4xbf16>
    %c504 = arith.constant 504 : index
    %c0_7 = arith.constant 0 : index
    %5 = vector.load %arg9[%c504, %c0_7] : memref<576x4xbf16, #tpu.memory_space<vmem>>, vector<72x4xbf16>
    tpu.vector_store %arg9[%c504, %c0_7], %4 {strides = array<i32>} : memref<576x4xbf16, #tpu.memory_space<vmem>>, vector<72x4xbf16>,
    %c0_8 = arith.constant 0 : index
    %c0_9 = arith.constant 0 : index
    %6 = vector.load %arg9[%c0_8, %c0_9] : memref<576x4xbf16, #tpu.memory_space<vmem>>, vector<576x4xbf16>
    %cst = arith.constant 0.000000e+00 : f32
    %7 = vector.broadcast %cst : f32 to vector<504x128xf32>
    %8 = vector.extract_strided_slice %6 {offsets = [0, 0], sizes = [504, 4], strides = [1, 1]} : vector<576x4xbf16> to vector<504x4xbf16>
    %c0_10 = arith.constant 0 : index
    %c0_11 = arith.constant 0 : index
    %c0_12 = arith.constant 0 : index
    %9 = vector.load %arg5[%c0_10, %c0_11, %c0_12] : memref<9x4x128xbf16, #tpu.memory_space<vmem>>, vector<1x4x128xbf16>
    %10 = vector.shape_cast %9 : vector<1x4x128xbf16> to vector<4x128xbf16>
    %cst_13 = arith.constant dense<0.000000e+00> : vector<504x128xf32>
    %11 = tpu.matmul %8, %10, %cst_13 {dimension_numbers = #tpu.dot_dimension_numbers<[1], [0], [0], [1], [0, 0, 1, 1], [], []>} : vector<504x4xbf16>, vector<4x128xbf16>, vector<504x128xf32> -> vector<504x128xf32>
    %12 = arith.addf %7, %11 : vector<504x128xf32>
    %13 = vector.extract_strided_slice %6 {offsets = [1, 0], sizes = [504, 4], strides = [1, 1]} : vector<576x4xbf16> to vector<504x4xbf16>
    %c1 = arith.constant 1 : index
    %c0_14 = arith.constant 0 : index
    %c0_15 = arith.constant 0 : index
    %14 = vector.load %arg5[%c1, %c0_14, %c0_15] : memref<9x4x128xbf16, #tpu.memory_space<vmem>>, vector<1x4x128xbf16>
    %15 = vector.shape_cast %14 : vector<1x4x128xbf16> to vector<4x128xbf16>
    %cst_16 = arith.constant dense<0.000000e+00> : vector<504x128xf32>
    %16 = tpu.matmul %13, %15, %cst_16 {dimension_numbers = #tpu.dot_dimension_numbers<[1], [0], [0], [1], [0, 0, 1, 1], [], []>} : vector<504x4xbf16>, vector<4x128xbf16>, vector<504x128xf32> -> vector<504x128xf32>
    %17 = arith.addf %12, %16 : vector<504x128xf32>
    %18 = vector.extract_strided_slice %6 {offsets = [2, 0], sizes = [504, 4], strides = [1, 1]} : vector<576x4xbf16> to vector<504x4xbf16>
    %c2 = arith.constant 2 : index
    %c0_17 = arith.constant 0 : index
    %c0_18 = arith.constant 0 : index
    %19 = vector.load %arg5[%c2, %c0_17, %c0_18] : memref<9x4x128xbf16, #tpu.memory_space<vmem>>, vector<1x4x128xbf16>
    %20 = vector.shape_cast %19 : vector<1x4x128xbf16> to vector<4x128xbf16>
    %cst_19 = arith.constant dense<0.000000e+00> : vector<504x128xf32>
    %21 = tpu.matmul %18, %20, %cst_19 {dimension_numbers = #tpu.dot_dimension_numbers<[1], [0], [0], [1], [0, 0, 1, 1], [], []>} : vector<504x4xbf16>, vector<4x128xbf16>, vector<504x128xf32> -> vector<504x128xf32>
    %22 = arith.addf %17, %21 : vector<504x128xf32>
    %23 = vector.extract_strided_slice %6 {offsets = [24, 0], sizes = [504, 4], strides = [1, 1]} : vector<576x4xbf16> to vector<504x4xbf16>
    %c3 = arith.constant 3 : index
    %c0_20 = arith.constant 0 : index
    %c0_21 = arith.constant 0 : index
    %24 = vector.load %arg5[%c3, %c0_20, %c0_21] : memref<9x4x128xbf16, #tpu.memory_space<vmem>>, vector<1x4x128xbf16>
    %25 = vector.shape_cast %24 : vector<1x4x128xbf16> to vector<4x128xbf16>
    %cst_22 = arith.constant dense<0.000000e+00> : vector<504x128xf32>
    %26 = tpu.matmul %23, %25, %cst_22 {dimension_numbers = #tpu.dot_dimension_numbers<[1], [0], [0], [1], [0, 0, 1, 1], [], []>} : vector<504x4xbf16>, vector<4x128xbf16>, vector<504x128xf32> -> vector<504x128xf32>
    %27 = arith.addf %22, %26 : vector<504x128xf32>
    %28 = vector.extract_strided_slice %6 {offsets = [25, 0], sizes = [504, 4], strides = [1, 1]} : vector<576x4xbf16> to vector<504x4xbf16>
    %c4 = arith.constant 4 : index
    %c0_23 = arith.constant 0 : index
    %c0_24 = arith.constant 0 : index
    %29 = vector.load %arg5[%c4, %c0_23, %c0_24] : memref<9x4x128xbf16, #tpu.memory_space<vmem>>, vector<1x4x128xbf16>
    %30 = vector.shape_cast %29 : vector<1x4x128xbf16> to vector<4x128xbf16>
    %cst_25 = arith.constant dense<0.000000e+00> : vector<504x128xf32>
    %31 = tpu.matmul %28, %30, %cst_25 {dimension_numbers = #tpu.dot_dimension_numbers<[1], [0], [0], [1], [0, 0, 1, 1], [], []>} : vector<504x4xbf16>, vector<4x128xbf16>, vector<504x128xf32> -> vector<504x128xf32>
    %32 = arith.addf %27, %31 : vector<504x128xf32>
    %33 = vector.extract_strided_slice %6 {offsets = [26, 0], sizes = [504, 4], strides = [1, 1]} : vector<576x4xbf16> to vector<504x4xbf16>
    %c5 = arith.constant 5 : index
    %c0_26 = arith.constant 0 : index
    %c0_27 = arith.constant 0 : index
    %34 = vector.load %arg5[%c5, %c0_26, %c0_27] : memref<9x4x128xbf16, #tpu.memory_space<vmem>>, vector<1x4x128xbf16>
    %35 = vector.shape_cast %34 : vector<1x4x128xbf16> to vector<4x128xbf16>
    %cst_28 = arith.constant dense<0.000000e+00> : vector<504x128xf32>
    %36 = tpu.matmul %33, %35, %cst_28 {dimension_numbers = #tpu.dot_dimension_numbers<[1], [0], [0], [1], [0, 0, 1, 1], [], []>} : vector<504x4xbf16>, vector<4x128xbf16>, vector<504x128xf32> -> vector<504x128xf32>
    %37 = arith.addf %32, %36 : vector<504x128xf32>
    %38 = vector.extract_strided_slice %6 {offsets = [48, 0], sizes = [504, 4], strides = [1, 1]} : vector<576x4xbf16> to vector<504x4xbf16>
    %c6 = arith.constant 6 : index
    %c0_29 = arith.constant 0 : index
    %c0_30 = arith.constant 0 : index
    %39 = vector.load %arg5[%c6, %c0_29, %c0_30] : memref<9x4x128xbf16, #tpu.memory_space<vmem>>, vector<1x4x128xbf16>
    %40 = vector.shape_cast %39 : vector<1x4x128xbf16> to vector<4x128xbf16>
    %cst_31 = arith.constant dense<0.000000e+00> : vector<504x128xf32>
    %41 = tpu.matmul %38, %40, %cst_31 {dimension_numbers = #tpu.dot_dimension_numbers<[1], [0], [0], [1], [0, 0, 1, 1], [], []>} : vector<504x4xbf16>, vector<4x128xbf16>, vector<504x128xf32> -> vector<504x128xf32>
    %42 = arith.addf %37, %41 : vector<504x128xf32>
    %43 = vector.extract_strided_slice %6 {offsets = [49, 0], sizes = [504, 4], strides = [1, 1]} : vector<576x4xbf16> to vector<504x4xbf16>
    %c7 = arith.constant 7 : index
    %c0_32 = arith.constant 0 : index
    %c0_33 = arith.constant 0 : index
    %44 = vector.load %arg5[%c7, %c0_32, %c0_33] : memref<9x4x128xbf16, #tpu.memory_space<vmem>>, vector<1x4x128xbf16>
    %45 = vector.shape_cast %44 : vector<1x4x128xbf16> to vector<4x128xbf16>
    %cst_34 = arith.constant dense<0.000000e+00> : vector<504x128xf32>
    %46 = tpu.matmul %43, %45, %cst_34 {dimension_numbers = #tpu.dot_dimension_numbers<[1], [0], [0], [1], [0, 0, 1, 1], [], []>} : vector<504x4xbf16>, vector<4x128xbf16>, vector<504x128xf32> -> vector<504x128xf32>
    %47 = arith.addf %42, %46 : vector<504x128xf32>
    %48 = vector.extract_strided_slice %6 {offsets = [50, 0], sizes = [504, 4], strides = [1, 1]} : vector<576x4xbf16> to vector<504x4xbf16>
    %c8 = arith.constant 8 : index
    %c0_35 = arith.constant 0 : index
    %c0_36 = arith.constant 0 : index
    %49 = vector.load %arg5[%c8, %c0_35, %c0_36] : memref<9x4x128xbf16, #tpu.memory_space<vmem>>, vector<1x4x128xbf16>
    %50 = vector.shape_cast %49 : vector<1x4x128xbf16> to vector<4x128xbf16>
    %cst_37 = arith.constant dense<0.000000e+00> : vector<504x128xf32>
    %51 = tpu.matmul %48, %50, %cst_37 {dimension_numbers = #tpu.dot_dimension_numbers<[1], [0], [0], [1], [0, 0, 1, 1], [], []>} : vector<504x4xbf16>, vector<4x128xbf16>, vector<504x128xf32> -> vector<504x128xf32>
    %52 = arith.addf %47, %51 : vector<504x128xf32>
    %c0_38 = arith.constant 0 : index
    %c0_39 = arith.constant 0 : index
    %53 = vector.load %arg6[%c0_38, %c0_39] : memref<1x128xf32, #tpu.memory_space<vmem>>, vector<1x128xf32>
    %54 = vector.broadcast %53 : vector<1x128xf32> to vector<504x128xf32>
    %55 = arith.mulf %52, %54 : vector<504x128xf32>
    %c0_40 = arith.constant 0 : index
    %c0_41 = arith.constant 0 : index
    %56 = vector.load %arg7[%c0_40, %c0_41] : memref<1x128xf32, #tpu.memory_space<vmem>>, vector<1x128xf32>
    %57 = vector.broadcast %56 : vector<1x128xf32> to vector<504x128xf32>
    %58 = arith.addf %55, %57 : vector<504x128xf32>
    %cst_42 = arith.constant 0.000000e+00 : f32
    %59 = vector.broadcast %cst_42 : f32 to vector<504x128xf32>
    %60 = arith.subf %59, %58 : vector<504x128xf32>
    %61 = math.exp %60 : vector<504x128xf32>
    %cst_43 = arith.constant 1.000000e+00 : f32
    %62 = vector.broadcast %cst_43 : f32 to vector<504x128xf32>
    %63 = arith.addf %62, %61 : vector<504x128xf32>
    %64 = tpu.reciprocal %63 {approx = true} : vector<504x128xf32> -> vector<504x128xf32>
    %65 = arith.mulf %58, %64 : vector<504x128xf32>
    %66 = arith.truncf %65 : vector<504x128xf32> to vector<504x128xbf16>
    %c0_44 = arith.constant 0 : index
    %c0_45 = arith.constant 0 : index
    %c0_46 = arith.constant 0 : index
    %67 = vector.load %arg8[%c0_44, %c0_45, %c0_46] : memref<1x504x128xbf16, #tpu.memory_space<vmem>>, vector<1x504x128xbf16>
    %68 = vector.shape_cast %67 : vector<1x504x128xbf16> to vector<504x128xbf16>
    %69 = vector.shape_cast %66 : vector<504x128xbf16> to vector<1x504x128xbf16>
    tpu.vector_store %arg8[%c0_44, %c0_45, %c0_46], %69 {strides = array<i32>} : memref<1x504x128xbf16, #tpu.memory_space<vmem>>, vector<1x504x128xbf16>,
    return
  }
  func.func @transform_0(%arg0: i32, %arg1: i32, %arg2: i32) -> (i32, i32, i32) {
    %c0_i32 = arith.constant 0 : i32
    %c0_i32_0 = arith.constant 0 : i32
    return %arg0, %arg2, %c0_i32 : i32, i32, i32
  }
  func.func @transform_1(%arg0: i32, %arg1: i32, %arg2: i32) -> (i32, i32, i32) {
    %c1_i32 = arith.constant 1 : i32
    %0 = arith.addi %arg2, %c1_i32 : i32
    %c7_i32 = arith.constant 7 : i32
    %1 = arith.muli %0, %c7_i32 : i32
    %c0_i32 = arith.constant 0 : i32
    %c0_i32_0 = arith.constant 0 : i32
    return %arg0, %1, %c0_i32 : i32, i32, i32
  }
  func.func @transform_2(%arg0: i32, %arg1: i32, %arg2: i32) -> (i32, i32, i32) {
    %c0_i32 = arith.constant 0 : i32
    %c0_i32_0 = arith.constant 0 : i32
    %c0_i32_1 = arith.constant 0 : i32
    return %c0_i32, %c0_i32_0, %arg1 : i32, i32, i32
  }
  func.func @transform_3(%arg0: i32, %arg1: i32, %arg2: i32) -> (i32, i32) {
    %c0_i32 = arith.constant 0 : i32
    %c0_i32_0 = arith.constant 0 : i32
    return %c0_i32, %arg1 : i32, i32
  }
  func.func @transform_4(%arg0: i32, %arg1: i32, %arg2: i32) -> (i32, i32) {
    %c0_i32 = arith.constant 0 : i32
    %c0_i32_0 = arith.constant 0 : i32
    return %c0_i32, %arg1 : i32, i32
  }
  func.func @transform_5(%arg0: i32, %arg1: i32, %arg2: i32) -> (i32, i32, i32) {
    %c0_i32 = arith.constant 0 : i32
    return %arg0, %arg2, %arg1 : i32, i32, i32
  }
}

</mosaic_0001>

<bundles_post_ra>
// kernel: conv_bn_silu.1
= control target key start
LH: loop header
LB: loop body
LE: loop exit
PB: predicated region body
PF: predicated region fallthrough
CT: control target
= control target key end

     0   :  { %s6132_s18 = smov 0   ;;  %s6134_s19 = smov 0   ;;  %s7915_s0 = inlined_call_operand.vmem [shape: bf16[2,576,4], index: 0, kind: input, shape index: {}, may-alias: {0,1}]   ;;  %s7916_s1 = inlined_call_operand.vmem [shape: bf16[2,576,4], index: 1, kind: input, shape index: {}, may-alias: {0,1}]   ;;  %s7917_s2 = inlined_call_operand.vmem [shape: bf16[9,4,128], index: 2, kind: input, shape index: {}]   ;;  %s7918_s3 = inlined_call_operand.vmem [shape: f32[1,128], index: 3, kind: input, shape index: {}]   ;;  %s7919_s4 = inlined_call_operand.vmem [shape: f32[1,128], index: 4, kind: input, shape index: {}]   ;;  %s7920_s5 = inlined_call_operand.vmem [shape: bf16[2,504,128], index: 5, kind: output, shape index: {}]  }
   0x1   :  { %s6136_s20 = smov 0  }
   0x2 LB: > { %s34_s21 = sadd.s32 1, %s6096_s19  ;;  %p4836_p0 = scmp.ge.s32.totalorder %s6100_s20, 1  ;;  %s6100_s20 = sphi %s6136_s20, %s15_s20   ;;  %s6096_s19 = sphi %s6134_s19, %s8169_s19   ;;  %s6092_s18 = sphi %s6132_s18, %s8168_s18  }
   0x3   : > { %p36_p1 = scmp.ge.s32.totalorder %s34_s21, 2  ;;  %p275_p2 = scmp.lt.s32.totalorder %s6100_s20, 3 }
   0x5   : > { %s8171_s21 = smov (%p36_p1, %s34_s21), 0  ;;  %p276_p3 = pnand %p4836_p0, %p275_p2 }
   0x7   : > { %279 = sbr.rel (%p276_p3) target bundleno = 1344 (0x540), region = 40 }
   0xc   : > { %v4840_v0 = vld [vmem:[%s7917_s2 + $0x2] sm:$0x3]  ;;  %vm1126_vm0 = vcmask 1041408   ;;  %p344_p4 = scmp.lt.s32.totalorder %s6092_s18, 1  ;;  %v4909_v2 = vld [vmem:[%s7917_s2 + $0x4] sm:$0x3] }
   0xd   : > { %v1128_v1 = vsel %vm1126_vm0, %v4840_v0, 0  ;;  %v1698_v3 = vsel %vm1126_vm0, %v4909_v2, 0  ;;  %vm458_vm1 = vcmask 27648   ;;  %v4942_v4 = vld [vmem:[%s7917_s2 + $0x6] sm:$0x3]  ;;  %vm1029_vm3 = vcmask 31744  }
   0xe   : > { %5708 = vmatpush.bf16.msra.mxu1 %v1128_v1  ;;  %5709 = vmatpush.bf16.msra.mxu2 %v1128_v1  ;;  %s8173_s18 = smov (!%p344_p4, %s6092_s18), 1  ;;  %v610_v5 = vld [vmem:[%s7917_s2] sm:$0x3]  ;;  %v4975_v6 = vld [vmem:[%s7917_s2 + $0x8] sm:$0x3]  ;;  %v2066_v7 = vsel %vm1126_vm0, %v4942_v4, 0 }
   0xf   : > { %5710 = vmatpush.bf16.msra.mxu3 %v1128_v1  ;;  %1137 = vmatpush.bf16.msra.mxu0 %v1128_v1  ;;  %s5713_s26 = smul.u32 288, %s8173_s18  ;;  %v1365_v8 = vsel %vm1126_vm0, %v610_v5, 0  ;;  %v2625_v9 = vsel %vm1126_vm0, %v4975_v6, 0  ;;  %vm773_vm2 = vsmask.f32 7424  ;;  %vm1537_vm4 = vcmask 1046528  }
  0x10   : > { %s5715_s6 = smul.u32 252, %s8173_s18 }
  0x11   : > { %s6175_s10 = scalar_lea.vmem %s7915_s0, %s5713_s26  ;;  %s5143_s11 = sadd.s32 252, %s5713_s26 }
  0x12   : > { %1707 = vmatpush.bf16.msrb.mxu2 %v1698_v3  ;;  %v411_v10 = vld [vmem:[%s6175_s10 + $0x40] sm:$0xf]  ;;  %v412_v11 = vld [vmem:[%s6175_s10 + $0x44] sm:$0xf]  ;;  %v413_v12 = vld [vmem:[%s6175_s10 + $0x48] sm:$0xf]  ;;  %1374 = vmatpush.bf16.msrb.mxu1 %v1365_v8  ;;  %s6446_s14 = scalar_lea.vmem %s7916_s1, %s5143_s11  ;;  %s7349_s8 = scalar_lea.vmem %s7920_s5, %s5715_s6 }
  0x13   : > { %2075 = vmatpush.bf16.msrb.mxu3 %v2066_v7  ;;  %v414_v13 = vld [vmem:[%s6175_s10 + $0x4c] sm:$0xf]  ;;  %475 = vst.msk [vmem:[#allocation2 + $0x40] sm:$0xf] %vm458_vm1, %v411_v10  ;;  %2634 = vmatpush.bf16.msrb.mxu0 %v2625_v9  ;;  %v427_v14 = vld [vmem:[%s6175_s10 + $0x80] sm:$0xf] }
  0x14   : > { %476 = vst.msk [vmem:[#allocation2 + $0x44] sm:$0xf] %vm458_vm1, %v412_v11  ;;  %v428_v15 = vld [vmem:[%s6175_s10 + $0x84] sm:$0xf]  ;;  %v429_v16 = vld [vmem:[%s6175_s10 + $0x88] sm:$0xf] }
  0x15   : > { %477 = vst.msk [vmem:[#allocation2 + $0x48] sm:$0xf] %vm458_vm1, %v413_v12  ;;  %v430_v17 = vld [vmem:[%s6175_s10 + $0x8c] sm:$0xf]  ;;  %v443_v18 = vld [vmem:[%s6175_s10 + $0xc0] sm:$0xf] }
  0x16   : > { %478 = vst.msk [vmem:[#allocation2 + $0x4c] sm:$0xf] %vm458_vm1, %v414_v13  ;;  %v444_v19 = vld [vmem:[%s6175_s10 + $0xc4] sm:$0xf]  ;;  %v445_v20 = vld [vmem:[%s6175_s10 + $0xc8] sm:$0xf] }
  0x17   : > { %491 = vst.msk [vmem:[#allocation2 + $0x80] sm:$0xf] %vm458_vm1, %v427_v14  ;;  %v446_v21 = vld [vmem:[%s6175_s10 + $0xcc] sm:$0xf]  ;;  %v395_v22 = vld [vmem:[%s6175_s10] sm:$0xf] }
  0x18   : > { %492 = vst.msk [vmem:[#allocation2 + $0x84] sm:$0xf] %vm458_vm1, %v428_v15  ;;  %v396_v24 = vld [vmem:[%s6175_s10 + $0x4] sm:$0xf]  ;;  %v397_v27 = vld [vmem:[%s6175_s10 + $0x8] sm:$0xf] }
  0x19   : > { %493 = vst.msk [vmem:[#allocation2 + $0x88] sm:$0xf] %vm458_vm1, %v429_v16  ;;  %v398_v29 = vld [vmem:[%s6175_s10 + $0xc] sm:$0xf]  ;;  %v415_v32 = vld [vmem:[%s6175_s10 + $0x50] sm:$0xf] }
  0x1a   : > { %494 = vst.msk [vmem:[#allocation2 + $0x8c] sm:$0xf] %vm458_vm1, %v430_v17  ;;  %v416_v34 = vld [vmem:[%s6175_s10 + $0x54] sm:$0xf]  ;;  %v431_v39 = vld [vmem:[%s6175_s10 + $0x90] sm:$0xf] }
  0x1b   : > { %v6201_v23 = vld [vmem:[#allocation2 + $0x40] sm:$0xff]   ;;  %507 = vst.msk [vmem:[#allocation2 + $0xc0] sm:$0xf] %vm458_vm1, %v443_v18  ;;  %v432_v41 = vld [vmem:[%s6175_s10 + $0x94] sm:$0xf] }
  0x1c   : > { %v838_v25 = vshll.u32 %v6201_v23, 16  ;;  %v842_v26 = vshrl.u32 %v6201_v23, 16  ;;  %508 = vst.msk [vmem:[#allocation2 + $0xc4] sm:$0xf] %vm458_vm1, %v444_v19  ;;  %v447_v45 = vld [vmem:[%s6175_s10 + $0xd0] sm:$0xf] }
  0x1d   : > { %v6209_v28 = vld [vmem:[#allocation2 + $0x48] sm:$0xff]   ;;  %509 = vst.msk [vmem:[#allocation2 + $0xc8] sm:$0xf] %vm458_vm1, %v445_v20  ;;  %v448_v47 = vld [vmem:[%s6175_s10 + $0xd4] sm:$0xf] }
  0x1e   : > { %v6213_v30 = vrot.slane %v838_v25, 1  ;;  %v846_v31 = vshll.u32 %v6209_v28, 16  ;;  %510 = vst.msk [vmem:[#allocation2 + $0xcc] sm:$0xf] %vm458_vm1, %v446_v21  ;;  %v399_v53 = vld [vmem:[%s6175_s10 + $0x10] sm:$0xf] }
  0x1f   : > { %v5451_v33 = vld [vmem:[#allocation2 + $0x80] sm:$0xff]   ;;  %459 = vst.msk [vmem:[#allocation2] sm:$0xf] %vm458_vm1, %v395_v22  ;;  %v400_v57 = vld [vmem:[%s6175_s10 + $0x14] sm:$0xf]  ;;  %v850_v62 = vshrl.u32 %v6209_v28, 16 }
  0x20   : > { %v844_v35 = vor.u32 %v842_v26, %v6213_v30  ;;  %v848_v36 = vrot.slane %v846_v31, 1  ;;  %v902_v37 = vshll.u32 %v5451_v33, 16  ;;  %v906_v38 = vshrl.u32 %v5451_v33, 16  ;;  %460 = vst.msk [vmem:[#allocation2 + $0x4] sm:$0xf] %vm458_vm1, %v396_v24 }
  0x21   : > { %v6223_v40 = vld [vmem:[#allocation2 + $0x88] sm:$0xff]   ;;  %461 = vst.msk [vmem:[#allocation2 + $0x8] sm:$0xf] %vm458_vm1, %v397_v27  ;;  %v417_v59 = vld [vmem:[%s6175_s10 + $0x58] sm:$0xf] }
  0x22   : > { %v6228_v42 = vsel %vm773_vm2, %v844_v35, %v848_v36  ;;  %v6230_v43 = vrot.slane %v902_v37, 1  ;;  %v910_v44 = vshll.u32 %v6223_v40, 16  ;;  %462 = vst.msk [vmem:[#allocation2 + $0xc] sm:$0xf] %vm458_vm1, %v398_v29  ;;  %v418_v63 = vld [vmem:[%s6175_s10 + $0x5c] sm:$0xf]  ;;  %v852_v11 = vor.u32 %v850_v62, %v848_v36 }
  0x23   : > { %7960 = vst [vmem:[#allocation3_spill] sm:$0xff] %v6228_v42  ;;  %4853 = vmatmul.msk.bf16.vlgmr.msra.gmra.mxu1 %vm1029_vm3, %v6228_v42  ;;  %v5459_v46 = vld [vmem:[#allocation2 + $0xc0] sm:$0xff]   ;;  %v914_v5 = vshrl.u32 %v6223_v40, 16  ;;  %v433_v6 = vld [vmem:[%s6175_s10 + $0x98] sm:$0xf] }
  0x24   : > { %479 = vst.msk [vmem:[#allocation2 + $0x50] sm:$0xf] %vm458_vm1, %v415_v32  ;;  %v908_v48 = vor.u32 %v906_v38, %v6230_v43  ;;  %v912_v49 = vrot.slane %v910_v44, 1  ;;  %v966_v50 = vshll.u32 %v5459_v46, 16  ;;  %v970_v51 = vshrl.u32 %v5459_v46, 16 }
  0x25   : > { %480 = vst.msk [vmem:[#allocation2 + $0x54] sm:$0xf] %vm458_vm1, %v416_v34  ;;  %v6241_v52 = vld [vmem:[#allocation2 + $0xc8] sm:$0xff]   ;;  %v434_v9 = vld [vmem:[%s6175_s10 + $0x9c] sm:$0xf] }
  0x26   : > { %495 = vst.msk [vmem:[#allocation2 + $0x90] sm:$0xf] %vm458_vm1, %v431_v39  ;;  %v6246_v54 = vsel %vm773_vm2, %v908_v48, %v912_v49  ;;  %v6248_v55 = vrot.slane %v966_v50, 1  ;;  %v974_v56 = vshll.u32 %v6241_v52, 16  ;;  %v449_v13 = vld [vmem:[%s6175_s10 + $0xd8] sm:$0xf]  ;;  %v916_v26 = vor.u32 %v914_v5, %v912_v49 }
  0x27   : > { %7961 = vst [vmem:[#allocation4_spill] sm:$0xff] %v6246_v54  ;;  %4861 = vmatmul.msk.bf16.vlgmr.msra.gmra.mxu2 %vm1029_vm3, %v6246_v54  ;;  %v6255_v58 = vld [vmem:[#allocation2] sm:$0xff]  ;;  %v450_v16 = vld [vmem:[%s6175_s10 + $0xdc] sm:$0xf]  ;;  %v401_v19 = vld [vmem:[%s6175_s10 + $0x18] sm:$0xf] }
  0x28   : > { %496 = vst.msk [vmem:[#allocation2 + $0x94] sm:$0xf] %vm458_vm1, %v432_v41  ;;  %v972_v60 = vor.u32 %v970_v51, %v6248_v55  ;;  %v976_v61 = vrot.slane %v974_v56, 1  ;;  %v775_v1 = vshrl.u32 %v6255_v58, 16  ;;  %v777_v2 = vshll.u32 %v6255_v58, 16 }
  0x29   : > { %511 = vst.msk [vmem:[#allocation2 + $0xd0] sm:$0xf] %vm458_vm1, %v447_v45  ;;  %v6263_v0 = vld [vmem:[#allocation2 + $0x8] sm:$0xff]   ;;  %v978_v22 = vshrl.u32 %v6241_v52, 16  ;;  %v402_v24 = vld [vmem:[%s6175_s10 + $0x1c] sm:$0xf] }
  0x2a   : > { %512 = vst.msk [vmem:[#allocation2 + $0xd4] sm:$0xf] %vm458_vm1, %v448_v47  ;;  %v6269_v3 = vsel %vm773_vm2, %v972_v60, %v976_v61  ;;  %v782_v4 = vshll.u32 %v6263_v0, 16  ;;  %v779_v7 = vrot.slane %v777_v2, 1  ;;  %v419_v31 = vld [vmem:[%s6175_s10 + $0x60] sm:$0xf] }
  0x2b   : > { %463 = vst.msk [vmem:[#allocation2 + $0x10] sm:$0xf] %vm458_vm1, %v399_v53  ;;  %4869 = vmatmul.msk.bf16.vlgmr.msra.gmra.mxu3 %vm1029_vm3, %v6269_v3  ;;  %v420_v32 = vld [vmem:[%s6175_s10 + $0x64] sm:$0xf]  ;;  %v435_v34 = vld [vmem:[%s6175_s10 + $0xa0] sm:$0xf]  ;;  %v980_v37 = vor.u32 %v978_v22, %v976_v61 }
  0x2c   : > { %7962 = vst [vmem:[#allocation5_spill] sm:$0xff] %v6269_v3  ;;  %v6277_v8 = vld [vmem:[#allocation2 + $0x50] sm:$0xff]   ;;  %v784_v10 = vrot.slane %v782_v4, 1  ;;  %v780_v14 = vor.u32 %v779_v7, %v775_v1  ;;  %v436_v35 = vld [vmem:[%s6175_s10 + $0xa4] sm:$0xf]  ;;  %v786_v39 = vshrl.u32 %v6263_v0, 16 }
  0x2d   : > { %464 = vst.msk [vmem:[#allocation2 + $0x14] sm:$0xf] %vm458_vm1, %v400_v57  ;;  %v854_v12 = vshll.u32 %v6277_v8, 16  ;;  %v451_v40 = vld [vmem:[%s6175_s10 + $0xe0] sm:$0xf]  ;;  %v858_v49 = vshrl.u32 %v6277_v8, 16 }
  0x2e   : > { %481 = vst.msk [vmem:[#allocation2 + $0x58] sm:$0xf] %vm458_vm1, %v417_v59  ;;  %v785_v20 = vsel %vm773_vm2, %v780_v14, %v784_v10  ;;  %v452_v45 = vld [vmem:[%s6175_s10 + $0xe4] sm:$0xf]  ;;  %v403_v46 = vld [vmem:[%s6175_s10 + $0x20] sm:$0xf]  ;;  %v788_v51 = vor.u32 %v786_v39, %v784_v10 }
  0x2f   : > { %482 = vst.msk [vmem:[#allocation2 + $0x5c] sm:$0xf] %vm458_vm1, %v418_v63  ;;  %v5453_v15 = vld [vmem:[#allocation2 + $0x90] sm:$0xff]   ;;  %v856_v17 = vrot.slane %v854_v12, 1  ;;  %4845 = vmatmul.msk.bf16.vlgmr.msra.gmra.mxu0 %vm1029_vm3, %v785_v20  ;;  %v404_v47 = vld [vmem:[%s6175_s10 + $0x24] sm:$0xf] }
  0x30   : > { %497 = vst.msk [vmem:[#allocation2 + $0x98] sm:$0xf] %vm458_vm1, %v433_v6  ;;  %v918_v18 = vshll.u32 %v5453_v15, 16  ;;  %v922_v59 = vshrl.u32 %v5453_v15, 16  ;;  %v421_v6 = vld [vmem:[%s6175_s10 + $0x68] sm:$0xf] }
  0x31   : > { %498 = vst.msk [vmem:[#allocation2 + $0x9c] sm:$0xf] %vm458_vm1, %v434_v9  ;;  %v6289_v21 = vld [vmem:[#allocation2 + $0xd0] sm:$0xff]   ;;  %v6296_v25 = vsel %vm773_vm2, %v852_v11, %v856_v17  ;;  %v860_v56 = vor.u32 %v858_v49, %v856_v17  ;;  %v422_v7 = vld [vmem:[%s6175_s10 + $0x6c] sm:$0xf] }
  0x32   : > { %513 = vst.msk [vmem:[#allocation2 + $0xd8] sm:$0xf] %vm458_vm1, %v449_v13  ;;  %v920_v27 = vrot.slane %v918_v18, 1  ;;  %v982_v29 = vshll.u32 %v6289_v21, 16  ;;  %v986_v5 = vshrl.u32 %v6289_v21, 16 }
  0x33   : > { %7963 = vst [vmem:[#allocation6_spill] sm:$0xff] %v6296_v25  ;;  %4854 = vmatmul.msk.bf16.gmra.mxu1 %vm1029_vm3, %v6296_v25  ;;  %v437_v10 = vld [vmem:[%s6175_s10 + $0xa8] sm:$0xf]  ;;  %v438_v11 = vld [vmem:[%s6175_s10 + $0xac] sm:$0xf] }
  0x34   : > { %514 = vst.msk [vmem:[#allocation2 + $0xdc] sm:$0xf] %vm458_vm1, %v450_v16  ;;  %v6303_v33 = vld [vmem:[#allocation2 + $0x10] sm:$0xff]   ;;  %v6312_v36 = vsel %vm773_vm2, %v916_v26, %v920_v27  ;;  %v984_v38 = vrot.slane %v982_v29, 1  ;;  %v924_v2 = vor.u32 %v922_v59, %v920_v27  ;;  %v453_v14 = vld [vmem:[%s6175_s10 + $0xe8] sm:$0xf] }
  0x35   : > { %465 = vst.msk [vmem:[#allocation2 + $0x18] sm:$0xf] %vm458_vm1, %v401_v19  ;;  %v790_v41 = vshll.u32 %v6303_v33, 16  ;;  %v794_v13 = vshrl.u32 %v6303_v33, 16  ;;  %v454_v19 = vld [vmem:[%s6175_s10 + $0xec] sm:$0xf] }
  0x36   : > { %466 = vst.msk [vmem:[#allocation2 + $0x1c] sm:$0xf] %vm458_vm1, %v402_v24  ;;  %v6318_v44 = vld [vmem:[#allocation2 + $0x58] sm:$0xff]   ;;  %v6329_v48 = vsel %vm773_vm2, %v980_v37, %v984_v38  ;;  %v988_v16 = vor.u32 %v986_v5, %v984_v38  ;;  %v405_v20 = vld [vmem:[%s6175_s10 + $0x28] sm:$0xf] }
  0x37   : > { %483 = vst.msk [vmem:[#allocation2 + $0x60] sm:$0xf] %vm458_vm1, %v419_v31  ;;  %4862 = vmatmul.msk.bf16.gmra.mxu2 %vm1029_vm3, %v6312_v36  ;;  %v862_v50 = vshll.u32 %v6318_v44, 16  ;;  %v792_v52 = vrot.slane %v790_v41, 1  ;;  %v406_v21 = vld [vmem:[%s6175_s10 + $0x2c] sm:$0xf] }
  0x38   : > { %7964 = vst [vmem:[#allocation7_spill] sm:$0xff] %v6312_v36  ;;  %v5454_v53 = vld [vmem:[#allocation2 + $0x98] sm:$0xff]   ;;  %v866_v24 = vshrl.u32 %v6318_v44, 16  ;;  %v423_v49 = vld [vmem:[%s6175_s10 + $0x70] sm:$0xf] }
  0x39   : > { %484 = vst.msk [vmem:[#allocation2 + $0x64] sm:$0xf] %vm458_vm1, %v420_v32  ;;  %v864_v57 = vrot.slane %v862_v50, 1  ;;  %v926_v60 = vshll.u32 %v5454_v53, 16  ;;  %v793_v62 = vsel %vm773_vm2, %v788_v51, %v792_v52  ;;  %v796_v27 = vor.u32 %v794_v13, %v792_v52  ;;  %v424_v50 = vld [vmem:[%s6175_s10 + $0x74] sm:$0xf] }
  0x3a   : > { %499 = vst.msk [vmem:[#allocation2 + $0xa0] sm:$0xf] %vm458_vm1, %v435_v34  ;;  %v439_v51 = vld [vmem:[%s6175_s10 + $0xb0] sm:$0xf]  ;;  %v408_v5 = vld [vmem:[%s6175_s10 + $0x34] sm:$0xf] }
  0x3b   : > { %500 = vst.msk [vmem:[#allocation2 + $0xa4] sm:$0xf] %vm458_vm1, %v436_v35  ;;  %4870 = vmatmul.msk.bf16.gmra.mxu3 %vm1029_vm3, %v6329_v48  ;;  %v6338_v61 = vld [vmem:[#allocation2 + $0xd8] sm:$0xff]   ;;  %v6344_v1 = vsel %vm773_vm2, %v860_v56, %v864_v57  ;;  %v928_v4 = vrot.slane %v926_v60, 1  ;;  %v868_v32 = vor.u32 %v866_v24, %v864_v57  ;;  %v930_v35 = vshrl.u32 %v5454_v53, 16 }
  0x3c   : > { %515 = vst.msk [vmem:[#allocation2 + $0xe0] sm:$0xf] %vm458_vm1, %v451_v40  ;;  %v990_v63 = vshll.u32 %v6338_v61, 16  ;;  %v440_v53 = vld [vmem:[%s6175_s10 + $0xb4] sm:$0xf] }
  0x3d   : > { %7965 = vst [vmem:[#allocation8_spill] sm:$0xff] %v6329_v48  ;;  %v6349_v9 = vld [vmem:[#allocation2 + $0x18] sm:$0xff]   ;;  %v6361_v15 = vsel %vm773_vm2, %v924_v2, %v928_v4  ;;  %v455_v59 = vld [vmem:[%s6175_s10 + $0xf0] sm:$0xf] }
  0x3e   : > { %516 = vst.msk [vmem:[#allocation2 + $0xe4] sm:$0xf] %vm458_vm1, %v452_v45  ;;  %v992_v12 = vrot.slane %v990_v63, 1  ;;  %v798_v17 = vshll.u32 %v6349_v9, 16  ;;  %v932_v45 = vor.u32 %v930_v35, %v928_v4  ;;  %v802_v57 = vshrl.u32 %v6349_v9, 16 }
  0x3f   : > { %467 = vst.msk [vmem:[#allocation2 + $0x20] sm:$0xf] %vm458_vm1, %v403_v46  ;;  %4846 = vmatmul.msk.bf16.gmra.mxu0 %vm1029_vm3, %v793_v62  ;;  %v456_v62 = vld [vmem:[%s6175_s10 + $0xf4] sm:$0xf]  ;;  %v407_v63 = vld [vmem:[%s6175_s10 + $0x30] sm:$0xf] }
  0x40   : > { %468 = vst.msk [vmem:[#allocation2 + $0x24] sm:$0xf] %vm458_vm1, %v404_v47  ;;  %v6364_v18 = vld [vmem:[#allocation2 + $0x60] sm:$0xff]   ;;  %v6376_v22 = vsel %vm773_vm2, %v988_v16, %v992_v12  ;;  %v800_v29 = vrot.slane %v798_v17, 1  ;;  %v994_v47 = vshrl.u32 %v6338_v61, 16 }
  0x41   : > { %7966 = vst [vmem:[#allocation9_spill] sm:$0xff] %v6344_v1  ;;  %v870_v26 = vshll.u32 %v6364_v18, 16  ;;  %v441_v35 = vld [vmem:[%s6175_s10 + $0xb8] sm:$0xf] }
  0x42   : > { %485 = vst.msk [vmem:[#allocation2 + $0x68] sm:$0xf] %vm458_vm1, %v421_v6  ;;  %v5455_v31 = vld [vmem:[#allocation2 + $0xa0] sm:$0xff]   ;;  %v801_v39 = vsel %vm773_vm2, %v796_v27, %v800_v29  ;;  %v996_v61 = vor.u32 %v994_v47, %v992_v12 }
  0x43   : > { %486 = vst.msk [vmem:[#allocation2 + $0x6c] sm:$0xf] %vm458_vm1, %v422_v7  ;;  %4855 = vmatmul.msk.bf16.gmra.mxu1 %vm1029_vm3, %v6344_v1  ;;  %v872_v34 = vrot.slane %v870_v26, 1  ;;  %v934_v37 = vshll.u32 %v5455_v31, 16  ;;  %v874_v7 = vshrl.u32 %v6364_v18, 16  ;;  %v938_v17 = vshrl.u32 %v5455_v31, 16 }
  0x44   : > { %501 = vst.msk [vmem:[#allocation2 + $0xa8] sm:$0xf] %vm458_vm1, %v437_v10  ;;  %v522_v47 = vld [vmem:[%s6446_s14] sm:$0xf] }
  0x45   : > { %7967 = vst [vmem:[#allocation10_spill] sm:$0xff] %v6361_v15  ;;  %v6383_v38 = vld [vmem:[#allocation2 + $0xe0] sm:$0xff]   ;;  %v6389_v41 = vsel %vm773_vm2, %v868_v32, %v872_v34  ;;  %v936_v46 = vrot.slane %v934_v37, 1  ;;  %v425_v32 = vld [vmem:[%s6175_s10 + $0x78] sm:$0xf] }
  0x46   : > { %502 = vst.msk [vmem:[#allocation2 + $0xac] sm:$0xf] %vm458_vm1, %v438_v11  ;;  %v998_v40 = vshll.u32 %v6383_v38, 16  ;;  %v804_v11 = vor.u32 %v802_v57, %v800_v29  ;;  %v1002_v24 = vshrl.u32 %v6383_v38, 16  ;;  %v442_v38 = vld [vmem:[%s6175_s10 + $0xbc] sm:$0xf] }
  0x47   : > { %517 = vst.msk [vmem:[#allocation2 + $0xe8] sm:$0xf] %vm458_vm1, %v453_v14  ;;  %4863 = vmatmul.msk.bf16.gmra.mxu2 %vm1029_vm3, %v6361_v15  ;;  %v6396_v52 = vld [vmem:[#allocation2 + $0x20] sm:$0xff]   ;;  %v6406_v60 = vsel %vm773_vm2, %v932_v45, %v936_v46  ;;  %v876_v14 = vor.u32 %v874_v7, %v872_v34  ;;  %v940_v27 = vor.u32 %v938_v17, %v936_v46  ;;  %v426_v34 = vld [vmem:[%s6175_s10 + $0x7c] sm:$0xf] }
  0x48   : > { %518 = vst.msk [vmem:[#allocation2 + $0xec] sm:$0xf] %vm458_vm1, %v454_v19  ;;  %v1000_v56 = vrot.slane %v998_v40, 1  ;;  %v806_v2 = vshll.u32 %v6396_v52, 16 }
  0x49   : > { %469 = vst.msk [vmem:[#allocation2 + $0x28] sm:$0xf] %vm458_vm1, %v405_v20 }
  0x4a   : > { %7968 = vst [vmem:[#allocation11_spill] sm:$0xff] %v6376_v22  ;;  %v6412_v4 = vld [vmem:[#allocation2 + $0x68] sm:$0xff]   ;;  %v6421_v6 = vsel %vm773_vm2, %v996_v61, %v1000_v56  ;;  %v808_v12 = vrot.slane %v806_v2, 1  ;;  %v1004_v45 = vor.u32 %v1002_v24, %v1000_v56  ;;  %v410_v61 = vld [vmem:[%s6175_s10 + $0x3c] sm:$0xf] }
  0x4b   : > { %470 = vst.msk [vmem:[#allocation2 + $0x2c] sm:$0xf] %vm458_vm1, %v406_v21  ;;  %4871 = vmatmul.msk.bf16.gmra.mxu3 %vm1029_vm3, %v6376_v22  ;;  %v878_v10 = vshll.u32 %v6412_v4, 16  ;;  %v882_v57 = vshrl.u32 %v6412_v4, 16 }
  0x4c   : > { %7969 = vst [vmem:[#allocation12_spill] sm:$0xff] %v6389_v41  ;;  %v6429_v20 = vsel %vm773_vm2, %v804_v11, %v808_v12 }
  0x4d   : > { %487 = vst.msk [vmem:[#allocation2 + $0x70] sm:$0xf] %vm458_vm1, %v423_v49  ;;  %v5456_v13 = vld [vmem:[#allocation2 + $0xa8] sm:$0xff]   ;;  %v880_v16 = vrot.slane %v878_v10, 1  ;;  %v810_v49 = vshrl.u32 %v6396_v52, 16 }
  0x4e   : > { %488 = vst.msk [vmem:[#allocation2 + $0x74] sm:$0xf] %vm458_vm1, %v424_v50  ;;  %v942_v19 = vshll.u32 %v5456_v13, 16 }
  0x4f   : > { %4847 = vmatmul.msk.bf16.gmra.mxu0 %vm1029_vm3, %v801_v39  ;;  %503 = vst.msk [vmem:[#allocation2 + $0xb0] sm:$0xf] %vm458_vm1, %v439_v51  ;;  %v5464_v21 = vld [vmem:[#allocation2 + $0xe8] sm:$0xff]   ;;  %v6437_v26 = vsel %vm773_vm2, %v876_v14, %v880_v16  ;;  %v457_v39 = vld [vmem:[%s6175_s10 + $0xf8] sm:$0xf]  ;;  %v884_v7 = vor.u32 %v882_v57, %v880_v16 }
  0x50   : > { %7970 = vst [vmem:[#allocation13_spill] sm:$0xff] %v6406_v60  ;;  %v944_v29 = vrot.slane %v942_v19, 1  ;;  %v1006_v31 = vshll.u32 %v5464_v21, 16 }
  0x51   : > { %504 = vst.msk [vmem:[#allocation2 + $0xb4] sm:$0xf] %vm458_vm1, %v440_v53  ;;  %v409_v53 = vld [vmem:[%s6175_s10 + $0x38] sm:$0xf] }
  0x52   : > { %519 = vst.msk [vmem:[#allocation2 + $0xf0] sm:$0xf] %vm458_vm1, %v455_v59  ;;  %v6448_v37 = vld [vmem:[#allocation2 + $0x28] sm:$0xff]   ;;  %v6457_v40 = vsel %vm773_vm2, %v940_v27, %v944_v29  ;;  %v1008_v46 = vrot.slane %v1006_v31, 1  ;;  %v1010_v27 = vshrl.u32 %v5464_v21, 16 }
  0x53   : > { %4856 = vmatmul.msk.bf16.gmra.mxu1 %vm1029_vm3, %v6389_v41  ;;  %520 = vst.msk [vmem:[#allocation2 + $0xf4] sm:$0xf] %vm458_vm1, %v456_v62  ;;  %v814_v50 = vshll.u32 %v6448_v37, 16  ;;  %v812_v62 = vor.u32 %v810_v49, %v808_v12 }
  0x54   : > { %471 = vst.msk [vmem:[#allocation2 + $0x30] sm:$0xf] %vm458_vm1, %v407_v63  ;;  %v6471_v56 = vsel %vm773_vm2, %v1004_v45, %v1008_v46 }
  0x55   : > { %7971 = vst [vmem:[#allocation14_spill] sm:$0xff] %v6421_v6  ;;  %v6463_v51 = vld [vmem:[#allocation2 + $0x70] sm:$0xff]   ;;  %v816_v63 = vrot.slane %v814_v50, 1 }
  0x56   : > { %472 = vst.msk [vmem:[#allocation2 + $0x34] sm:$0xf] %vm458_vm1, %v408_v5  ;;  %v886_v59 = vshll.u32 %v6463_v51, 16  ;;  %v946_v5 = vshrl.u32 %v5456_v13, 16 }
  0x57   : > { %4864 = vmatmul.msk.bf16.gmra.mxu2 %vm1029_vm3, %v6406_v60  ;;  %7972 = vst [vmem:[#allocation15_spill] sm:$0xff] %v6429_v20  ;;  %v6481_v14 = vsel %vm773_vm2, %v812_v62, %v816_v63 }
  0x58   : > { %7973 = vst [vmem:[#allocation16_spill] sm:$0xff] %v6437_v26  ;;  %v5457_v2 = vld [vmem:[#allocation2 + $0xb0] sm:$0xff]   ;;  %v888_v10 = vrot.slane %v886_v59, 1  ;;  %v948_v19 = vor.u32 %v946_v5, %v944_v29  ;;  %v818_v29 = vshrl.u32 %v6448_v37, 16 }
  0x59   : > { %489 = vst.msk [vmem:[#allocation2 + $0x78] sm:$0xf] %vm458_vm1, %v425_v32  ;;  %v950_v11 = vshll.u32 %v5457_v2, 16  ;;  %v1012_v32 = vor.u32 %v1010_v27, %v1008_v46  ;;  %v954_v50 = vshrl.u32 %v5457_v2, 16 }
  0x5a   : > { %490 = vst.msk [vmem:[#allocation2 + $0x7c] sm:$0xf] %vm458_vm1, %v426_v34  ;;  %v5465_v17 = vld [vmem:[#allocation2 + $0xf0] sm:$0xff]   ;;  %v6486_v12 = vsel %vm773_vm2, %v884_v7, %v888_v10 }
  0x5b   : > { %4872 = vmatmul.msk.bf16.gmra.mxu3 %vm1029_vm3, %v6421_v6  ;;  %505 = vst.msk [vmem:[#allocation2 + $0xb8] sm:$0xf] %vm458_vm1, %v441_v35  ;;  %v952_v24 = vrot.slane %v950_v11, 1  ;;  %v1014_v31 = vshll.u32 %v5465_v17, 16  ;;  %v1018_v11 = vshrl.u32 %v5465_v17, 16 }
  0x5c   : > { %7974 = vst [vmem:[#allocation17_spill] sm:$0xff] %v6457_v40 }
  0x5d   : > { %506 = vst.msk [vmem:[#allocation2 + $0xbc] sm:$0xf] %vm458_vm1, %v442_v38  ;;  %v6488_v13 = vld [vmem:[#allocation2 + $0x30] sm:$0xff]   ;;  %v6493_v16 = vsel %vm773_vm2, %v948_v19, %v952_v24  ;;  %v1016_v34 = vrot.slane %v1014_v31, 1  ;;  %v956_v5 = vor.u32 %v954_v50, %v952_v24  ;;  %v5041_v50 = vld [vmem:[%s7917_s2 + $0xc] sm:$0x3] }
  0x5e   : > { %521 = vst.msk [vmem:[#allocation2 + $0xf8] sm:$0xf] %vm458_vm1, %v457_v39  ;;  %v822_v35 = vshll.u32 %v6488_v13, 16  ;;  %v890_v39 = vshrl.u32 %v6463_v51, 16  ;;  %v826_v24 = vshrl.u32 %v6488_v13, 16 }
  0x5f   : > { %4848 = vmatmul.msk.bf16.gmra.mxu0 %vm1029_vm3, %v6429_v20  ;;  %531 = vst.msk [vmem:[#allocation2 + $0xfc] sm:$0xf] %vm458_vm1, %v522_v47  ;;  %v6502_v21 = vsel %vm773_vm2, %v1012_v32, %v1016_v34  ;;  %v820_v47 = vor.u32 %v818_v29, %v816_v63 }
  0x60   : > { %7975 = vst [vmem:[#allocation18_spill] sm:$0xff] %v6471_v56  ;;  %v824_v49 = vrot.slane %v822_v35, 1 }
  0x61   : > { %473 = vst.msk [vmem:[#allocation2 + $0x38] sm:$0xf] %vm458_vm1, %v409_v53  ;;  %v6497_v38 = vld [vmem:[#allocation2 + $0x78] sm:$0xff]   ;;  %v892_v53 = vor.u32 %v890_v39, %v888_v10  ;;  %v1020_v10 = vor.u32 %v1018_v11, %v1016_v34 }
  0x62   : > { %474 = vst.msk [vmem:[#allocation2 + $0x3c] sm:$0xf] %vm458_vm1, %v410_v61  ;;  %v894_v45 = vshll.u32 %v6497_v38, 16  ;;  %v6509_v61 = vsel %vm773_vm2, %v820_v47, %v824_v49  ;;  %v898_v29 = vshrl.u32 %v6497_v38, 16  ;;  %v828_v35 = vor.u32 %v826_v24, %v824_v49 }
  0x63   : > { %4857 = vmatmul.msk.bf16.gmra.mxu1 %vm1029_vm3, %v6437_v26  ;;  %7976 = vst [vmem:[#allocation19_spill] sm:$0xff] %v6481_v14 }
  0x64   : > { %7977 = vst [vmem:[#allocation20_spill] sm:$0xff] %v6486_v12  ;;  %v5458_v46 = vld [vmem:[#allocation2 + $0xb8] sm:$0xff]   ;;  %v896_v57 = vrot.slane %v894_v45, 1 }
  0x65   : > { %7978 = vst [vmem:[#allocation21_spill] sm:$0xff] %v6493_v16  ;;  %v958_v59 = vshll.u32 %v5458_v46, 16  ;;  %v962_v34 = vshrl.u32 %v5458_v46, 16  ;;  %v5074_v46 = vld [vmem:[%s7917_s2 + $0xe] sm:$0x3] }
  0x66   : > { %7979 = vst [vmem:[#allocation22_spill] sm:$0xff] %v6502_v21  ;;  %v5466_v62 = vld [vmem:[#allocation2 + $0xf8] sm:$0xff]   ;;  %v6514_v7 = vsel %vm773_vm2, %v892_v53, %v896_v57  ;;  %v900_v45 = vor.u32 %v898_v29, %v896_v57  ;;  %v3274_v53 = vsel %vm1126_vm0, %v5041_v50, 0  ;;  %v5008_v57 = vld [vmem:[%s7917_s2 + $0xa] sm:$0x3] }
  0x67   : > { %4865 = vmatmul.msk.bf16.gmra.mxu2 %vm1029_vm3, %v6457_v40  ;;  %7980 = vst [vmem:[#allocation23_spill] sm:$0xff] %v6509_v61  ;;  %v960_v63 = vrot.slane %v958_v59, 1  ;;  %v1022_v19 = vshll.u32 %v5466_v62, 16  ;;  %v3020_v11 = vsel %vm1126_vm0, %v5008_v57, 0 }
  0x68   : > { %7981 = vst [vmem:[#allocation24_spill] sm:$0xff] %v6514_v7  ;;  %3283 = vmatpush.bf16.msra.mxu2 %v3274_v53  ;;  %v6544_v49 = vsel %vm773_vm2, %v900_v45, %v6230_v43  ;;  %3029 = vmatpush.bf16.msra.mxu1 %v3020_v11  ;;  %v1026_v43 = vshrl.u32 %v5466_v62, 16  ;;  %v5647_v62 = vld [vmem:[#allocation2 + $0xc] sm:$0xff]   ;;  %v1538_v45 = vrot.slane %v6255_v58, 1 }
  0x69   : > { %v6516_v27 = vld [vmem:[#allocation2 + $0x38] sm:$0xff]   ;;  %v6521_v2 = vsel %vm773_vm2, %v956_v5, %v960_v63  ;;  %v1024_v31 = vrot.slane %v1022_v19, 1  ;;  %7985 = vst [vmem:[#allocation28_spill] sm:$0xff] %v6544_v49  ;;  %v964_v59 = vor.u32 %v962_v34, %v960_v63  ;;  %v3547_v5 = vsel %vm1126_vm0, %v5074_v46, 0 }
  0x6a   : > { %7982 = vst [vmem:[#allocation25_spill] sm:$0xff] %v6521_v2  ;;  %v830_v32 = vshll.u32 %v6516_v27, 16  ;;  %3556 = vmatpush.bf16.msra.mxu3 %v3547_v5  ;;  %v834_v19 = vshrl.u32 %v6516_v27, 16  ;;  %v5649_v34 = vld [vmem:[#allocation2 + $0x14] sm:$0xff]  }
  0x6b   : > { %4873 = vmatmul.msk.bf16.gmra.mxu3 %vm1029_vm3, %v6471_v56  ;;  %v6528_v17 = vsel %vm773_vm2, %v1020_v10, %v1024_v31  ;;  %v6558_v63 = vsel %vm773_vm2, %v964_v59, %v6248_v55  ;;  %v5107_v10 = vld [vmem:[%s7917_s2 + $0x10] sm:$0x3]  ;;  %v2310_v59 = vshll.u32 %v5649_v34, 16  ;;  %v5653_v56 = vld [vmem:[#allocation2 + $0x24] sm:$0xff]  }
  0x6c   : > { %7983 = vst [vmem:[#allocation26_spill] sm:$0xff] %v6528_v17  ;;  %v832_v39 = vrot.slane %v830_v32, 1  ;;  %v3801_v24 = vsel %vm1126_vm0, %v5107_v10, 0  ;;  %v6567_v32 = vor.u32 %v1026_v43, %v1024_v31  ;;  %v1539_v31 = vrot.slane %v6263_v0, 1 }
  0x6d   : > { %7986 = vst [vmem:[#allocation29_spill] sm:$0xff] %v6558_v63  ;;  %3810 = vmatpush.bf16.msra.mxu0 %v3801_v24  ;;  %v2312_v5 = vrot.slane %v2310_v59, 1  ;;  %v1541_v24 = vrot.slane %v6303_v33, 1 }
  0x6e   : > { %v6534_v47 = vsel %vm773_vm2, %v828_v35, %v832_v39  ;;  %7987 = vst [vmem:[#allocation30_spill] sm:$0xff] %v6567_v32  ;;  %v836_v29 = vor.u32 %v834_v19, %v832_v39  ;;  %v2306_v39 = vshll.u32 %v5647_v62, 16  ;;  %v1540_v50 = vsel %vm1537_vm4, %v1538_v45, %v1539_v31 }
  0x6f   : > { %4849 = vmatmul.msk.bf16.gmra.mxu0 %vm1029_vm3, %v6481_v14  ;;  %7984 = vst [vmem:[#allocation27_spill] sm:$0xff] %v6534_v47 }
  0x70   : > { %v6573_v55 = vsel %vm773_vm2, %v836_v29, %v6213_v30  ;;  %v2304_v30 = vshrl.u32 %v5647_v62, 16  ;;  %v2308_v53 = vrot.slane %v2306_v39, 1  ;;  %v5651_v29 = vld [vmem:[#allocation2 + $0x1c] sm:$0xff]  }
  0x71   : > { %7988 = vst [vmem:[#allocation31_spill] sm:$0xff] %v6573_v55 }
  0x72   : > { %v2309_v57 = vor.u32 %v2308_v53, %v2304_v30  ;;  %v2317_v30 = vshll.u32 %v5651_v29, 16 }
  0x73   : > { %4858 = vmatmul.msk.bf16.gmra.mxu1 %vm1029_vm3, %v6486_v12  ;;  %v5657_v12 = vld [vmem:[#allocation2 + $0x34] sm:$0xff]  }
  0x74   : > { %v2313_v19 = vsel %vm773_vm2, %v2309_v57, %v2312_v5 }
  0x77   : > { %4866 = vmatmul.msk.bf16.gmra.mxu2 %vm1029_vm3, %v6493_v16  ;;  %v5655_v16 = vld [vmem:[#allocation2 + $0x2c] sm:$0xff]  }
  0x7b   : > { %4874 = vmatmul.msk.bf16.gmra.mxu3 %vm1029_vm3, %v6502_v21 }
  0x7f   : > { %4850 = vmatmul.msk.bf16.gmra.mxu0 %vm1029_vm3, %v6509_v61 }
  0x83   : > { %4859 = vmatmul.msk.bf16.gmra.mxu1 %vm1029_vm3, %v6514_v7  ;;  %v1547_v7 = vrot.slane %v6448_v37, 1 }
  0x87   : > { %4867 = vmatmul.msk.bf16.gmra.mxu2 %vm1029_vm3, %v6521_v2 }
  0x8b   : > { %4875 = vmatmul.msk.bf16.gmra.mxu3 %vm1029_vm3, %v6528_v17 }
  0x8f   : > { %4851 = vmatmul.msk.bf16.gmra.mxu0 %vm1029_vm3, %v6534_v47  ;;  %v5659_v47 = vld [vmem:[#allocation2 + $0x3c] sm:$0xff]  }
  0x93   : > { %4860 = vmatmul.msk.bf16.gmra.mxu1 %vm1029_vm3, %v6544_v49 }
  0x97   : > { %4868 = vmatmul.msk.bf16.gmra.mxu2 %vm1029_vm3, %v6558_v63 }
  0x9b   : > { %4876 = vmatmul.msk.bf16.gmra.mxu3 %vm1029_vm3, %v6567_v32 }
  0x9f   : > { %4852 = vmatmul.msk.bf16.gmra.mxu0 %vm1029_vm3, %v6573_v55 }
  0xa0   : > { %v6577_v35 = vpop.f32.mrf.mxu1 }
  0xa3   : > { %4877 = vmatmul.msk.bf16.vlgmr.msrb.gmra.mxu1 %vm1029_vm3, %v6255_v58 }
  0xa7   : > { %4910 = vmatmul.msk.bf16.vlgmr.msrb.gmra.mxu2 %vm1029_vm3, %v1540_v50  ;;  %v2314_v50 = vshrl.u32 %v5649_v34, 16 }
  0xa8   : > { %v6585_v46 = vpop.f32.mrf.mxu1 }
  0xa9   : > { %v2316_v57 = vor.u32 %v2314_v50, %v2312_v5  ;;  %v2321_v50 = vshrl.u32 %v5651_v29, 16 }
  0xaa   : > { %v6587_v11 = vpop.f32.mrf.mxu2 }
  0xab   : > { %4943 = vmatmul.msk.bf16.vlgmr.msrb.gmra.mxu3 %vm1029_vm3, %v5647_v62  ;;  %v1542_v62 = vsel %vm1537_vm4, %v1539_v31, %v1541_v24 }
  0xac   : > { %v6590_v43 = vpop.f32.mrf.mxu0 }
  0xae   : > { %v6593_v58 = vpop.f32.mrf.mxu3 }
  0xaf   : > { %7989 = vst [vmem:[#allocation32_spill] sm:$0xff] %v6593_v58  ;;  %4976 = vmatmul.msk.bf16.vlgmr.msrb.gmra.mxu0 %vm1029_vm3, %v2313_v19  ;;  %v2319_v19 = vrot.slane %v2317_v30, 1  ;;  %v2324_v30 = vshll.u32 %v5653_v56, 16 }
  0xb0   : > { %v6596_v10 = vpop.f32.mrf.mxu1 }
  0xb1   : > { %v2323_v22 = vor.u32 %v2321_v50, %v2319_v19  ;;  %v2326_v48 = vrot.slane %v2324_v30, 1  ;;  %v2331_v50 = vshll.u32 %v5655_v16, 16 }
  0xb2   : > { %v6599_v45 = vpop.f32.mrf.mxu2 }
  0xb3   : > { %4878 = vmatmul.msk.bf16.gmra.mxu1 %vm1029_vm3, %v6263_v0  ;;  %v2320_v0 = vsel %vm773_vm2, %v2316_v57, %v2319_v19  ;;  %v2333_v15 = vrot.slane %v2331_v50, 1 }
  0xb4   : > { %v6604_v39 = vpop.f32.mrf.mxu0 }
  0xb6   : > { %v6606_v53 = vpop.f32.mrf.mxu3 }
  0xb7   : > { %7990 = vst [vmem:[#allocation33_spill] sm:$0xff] %v6606_v53  ;;  %4911 = vmatmul.msk.bf16.gmra.mxu2 %vm1029_vm3, %v1542_v62  ;;  %v1543_v62 = vrot.slane %v6349_v9, 1 }
  0xb8   : > { %v6609_v59 = vpop.f32.mrf.mxu1 }
  0xba   : > { %v6611_v32 = vpop.f32.mrf.mxu2 }
  0xbb   : > { %4944 = vmatmul.msk.bf16.gmra.mxu3 %vm1029_vm3, %v5649_v34  ;;  %v1544_v34 = vsel %vm1537_vm4, %v1541_v24, %v1543_v62 }
  0xbc   : > { %v6614_v17 = vpop.f32.mrf.mxu0 }
  0xbe   : > { %v6617_v31 = vpop.f32.mrf.mxu3 }
  0xbf   : > { %7991 = vst [vmem:[#allocation34_spill] sm:$0xff] %v6617_v31  ;;  %4977 = vmatmul.msk.bf16.gmra.mxu0 %vm1029_vm3, %v2320_v0 }
  0xc0   : > { %v6620_v21 = vpop.f32.mrf.mxu1 }
  0xc2   : > { %v6623_v6 = vpop.f32.mrf.mxu2 }
  0xc3   : > { %4879 = vmatmul.msk.bf16.gmra.mxu1 %vm1029_vm3, %v6303_v33  ;;  %v2327_v33 = vsel %vm773_vm2, %v2323_v22, %v2326_v48  ;;  %v2328_v22 = vshrl.u32 %v5653_v56, 16 }
  0xc4   : > { %v6628_v5 = vpop.f32.mrf.mxu0 }
  0xc5   : > { %v2330_v60 = vor.u32 %v2328_v22, %v2326_v48  ;;  %v2338_v22 = vshll.u32 %v5657_v12, 16 }
  0xc6   : > { %v6630_v57 = vpop.f32.mrf.mxu3 }
  0xc7   : > { %7992 = vst [vmem:[#allocation35_spill] sm:$0xff] %v6630_v57  ;;  %4912 = vmatmul.msk.bf16.gmra.mxu2 %vm1029_vm3, %v1544_v34  ;;  %v1545_v34 = vrot.slane %v6396_v52, 1  ;;  %v2340_v1 = vrot.slane %v2338_v22, 1  ;;  %v5661_v57 = vld [vmem:[#allocation2 + $0x44] sm:$0xff]  }
  0xc8   : > { %v6633_v0 = vpop.f32.mrf.mxu1 }
  0xc9   : > { %v6679_v48 = vsel %vm1537_vm4, %v1545_v34, %v1547_v7 }
  0xca   : > { %v6635_v3 = vpop.f32.mrf.mxu2  ;;  %8000 = vst [vmem:[#allocation43_spill] sm:$0xff] %v6679_v48 }
  0xcb   : > { %4945 = vmatmul.msk.bf16.gmra.mxu3 %vm1029_vm3, %v5651_v29  ;;  %v6652_v29 = vsel %vm1537_vm4, %v1543_v62, %v1545_v34  ;;  %v2334_v62 = vsel %vm773_vm2, %v2330_v60, %v2333_v15  ;;  %v2335_v60 = vshrl.u32 %v5655_v16, 16 }
  0xcc   : > { %v6638_v63 = vpop.f32.mrf.mxu0  ;;  %7995 = vst [vmem:[#allocation38_spill] sm:$0xff] %v6652_v29 }
  0xcd   : > { %v2337_v41 = vor.u32 %v2335_v60, %v2333_v15  ;;  %v2345_v60 = vshll.u32 %v5659_v47, 16 }
  0xce   : > { %v6641_v24 = vpop.f32.mrf.mxu3 }
  0xcf   : > { %7993 = vst [vmem:[#allocation36_spill] sm:$0xff] %v6641_v24  ;;  %4978 = vmatmul.msk.bf16.gmra.mxu0 %vm1029_vm3, %v2327_v33  ;;  %v2341_v34 = vsel %vm773_vm2, %v2337_v41, %v2340_v1  ;;  %v2342_v41 = vshrl.u32 %v5657_v12, 16 }
  0xd0   : > { %v6644_v2 = vpop.f32.mrf.mxu1 }
  0xd2   : > { %v6647_v40 = vpop.f32.mrf.mxu2 }
  0xd3   : > { %7994 = vst [vmem:[#allocation37_spill] sm:$0xff] %v6647_v40  ;;  %4880 = vmatmul.msk.bf16.gmra.mxu1 %vm1029_vm3, %v6349_v9  ;;  %v5667_v40 = vld [vmem:[#allocation2 + $0x5c] sm:$0xff]  }
  0xd4   : > { %v6654_v19 = vpop.f32.mrf.mxu0 }
  0xd6   : > { %v6656_v30 = vpop.f32.mrf.mxu3 }
  0xd7   : > { %7996 = vst [vmem:[#allocation39_spill] sm:$0xff] %v6656_v30  ;;  %4913 = vmatmul.msk.bf16.gmra.mxu2 %vm1029_vm3, %v6652_v29  ;;  %v2347_v30 = vrot.slane %v2345_v60, 1  ;;  %v5663_v29 = vld [vmem:[#allocation2 + $0x4c] sm:$0xff]  }
  0xd8   : > { %v6660_v33 = vpop.f32.mrf.mxu1 }
  0xda   : > { %v6662_v36 = vpop.f32.mrf.mxu2 }
  0xdb   : > { %7997 = vst [vmem:[#allocation40_spill] sm:$0xff] %v6662_v36  ;;  %4946 = vmatmul.msk.bf16.gmra.mxu3 %vm1029_vm3, %v5653_v56  ;;  %v1557_v36 = vrot.slane %v6277_v8, 1 }
  0xdc   : > { %v6665_v9 = vpop.f32.mrf.mxu0 }
  0xde   : > { %v6668_v54 = vpop.f32.mrf.mxu3 }
  0xdf   : > { %7998 = vst [vmem:[#allocation41_spill] sm:$0xff] %v6668_v54  ;;  %4979 = vmatmul.msk.bf16.gmra.mxu0 %vm1029_vm3, %v2334_v62 }
  0xe0   : > { %v6671_v49 = vpop.f32.mrf.mxu1 }
  0xe2   : > { %v6674_v26 = vpop.f32.mrf.mxu2 }
  0xe3   : > { %7999 = vst [vmem:[#allocation42_spill] sm:$0xff] %v6674_v26  ;;  %4881 = vmatmul.msk.bf16.gmra.mxu1 %vm1029_vm3, %v6396_v52 }
  0xe4   : > { %v6681_v56 = vpop.f32.mrf.mxu0 }
  0xe6   : > { %v6683_v50 = vpop.f32.mrf.mxu3 }
  0xe7   : > { %8001 = vst [vmem:[#allocation44_spill] sm:$0xff] %v6683_v50  ;;  %4914 = vmatmul.msk.bf16.gmra.mxu2 %vm1029_vm3, %v6679_v48  ;;  %v1549_v50 = vrot.slane %v6488_v13, 1 }
  0xe8   : > { %v6687_v62 = vpop.f32.mrf.mxu1 }
  0xe9   : > { %v6706_v15 = vsel %vm1537_vm4, %v1547_v7, %v1549_v50 }
  0xea   : > { %v6689_v25 = vpop.f32.mrf.mxu2  ;;  %8005 = vst [vmem:[#allocation48_spill] sm:$0xff] %v6706_v15 }
  0xeb   : > { %8002 = vst [vmem:[#allocation45_spill] sm:$0xff] %v6689_v25  ;;  %4947 = vmatmul.msk.bf16.gmra.mxu3 %vm1029_vm3, %v5655_v16 }
  0xec   : > { %v6692_v52 = vpop.f32.mrf.mxu0 }
  0xee   : > { %v6695_v42 = vpop.f32.mrf.mxu3 }
  0xef   : > { %8003 = vst [vmem:[#allocation46_spill] sm:$0xff] %v6695_v42  ;;  %4980 = vmatmul.msk.bf16.gmra.mxu0 %vm1029_vm3, %v2341_v34  ;;  %v2344_v42 = vor.u32 %v2342_v41, %v2340_v1  ;;  %v2352_v41 = vshll.u32 %v5661_v57, 16 }
  0xf0   : > { %v6698_v55 = vpop.f32.mrf.mxu1 }
  0xf1   : > { %v2348_v7 = vsel %vm773_vm2, %v2344_v42, %v2347_v30  ;;  %v2349_v42 = vshrl.u32 %v5659_v47, 16  ;;  %v2354_v14 = vrot.slane %v2352_v41, 1 }
  0xf2   : > { %v6701_v54 = vpop.f32.mrf.mxu2 }
  0xf3   : > { %8004 = vst [vmem:[#allocation47_spill] sm:$0xff] %v6701_v54  ;;  %4882 = vmatmul.msk.bf16.gmra.mxu1 %vm1029_vm3, %v6448_v37 }
  0xf4   : > { %v6708_v16 = vpop.f32.mrf.mxu0 }
  0xf6   : > { %v6710_v22 = vpop.f32.mrf.mxu3 }
  0xf7   : > { %8006 = vst [vmem:[#allocation49_spill] sm:$0xff] %v6710_v22  ;;  %4915 = vmatmul.msk.bf16.gmra.mxu2 %vm1029_vm3, %v6706_v15  ;;  %v1551_v15 = vrot.slane %v6516_v27, 1 }
  0xf8   : > { %v6714_v34 = vpop.f32.mrf.mxu1 }
  0xf9   : > { %v6733_v1 = vsel %vm1537_vm4, %v1549_v50, %v1551_v15 }
  0xfa   : > { %v6716_v61 = vpop.f32.mrf.mxu2  ;;  %8010 = vst [vmem:[#allocation53_spill] sm:$0xff] %v6733_v1 }
  0xfb   : > { %8007 = vst [vmem:[#allocation50_spill] sm:$0xff] %v6716_v61  ;;  %4948 = vmatmul.msk.bf16.gmra.mxu3 %vm1029_vm3, %v5657_v12 }
  0xfc   : > { %v6719_v37 = vpop.f32.mrf.mxu0 }
  0xfe   : > { %v6722_v24 = vpop.f32.mrf.mxu3 }
  0xff   : > { %8008 = vst [vmem:[#allocation51_spill] sm:$0xff] %v6722_v24  ;;  %4981 = vmatmul.msk.bf16.gmra.mxu0 %vm1029_vm3, %v2348_v7  ;;  %v2351_v24 = vor.u32 %v2349_v42, %v2347_v30  ;;  %v2359_v42 = vshll.u32 %v5663_v29, 16 }
 0x100   : > { %v6725_v22 = vpop.f32.mrf.mxu1 }
 0x101   : > { %v2355_v50 = vsel %vm773_vm2, %v2351_v24, %v2354_v14  ;;  %v2356_v24 = vshrl.u32 %v5661_v57, 16 }
 0x102   : > { %v6728_v48 = vpop.f32.mrf.mxu2 }
 0x103   : > { %8009 = vst [vmem:[#allocation52_spill] sm:$0xff] %v6728_v48  ;;  %4883 = vmatmul.msk.bf16.gmra.mxu1 %vm1029_vm3, %v6488_v13 }
 0x104   : > { %v6735_v12 = vpop.f32.mrf.mxu0 }
 0x106   : > { %v6737_v60 = vpop.f32.mrf.mxu3 }
 0x107   : > { %8011 = vst [vmem:[#allocation54_spill] sm:$0xff] %v6737_v60  ;;  %4916 = vmatmul.msk.bf16.gmra.mxu2 %vm1029_vm3, %v6733_v1  ;;  %v1553_v1 = vrot.slane %v6201_v23, 1  ;;  %v2358_v23 = vor.u32 %v2356_v24, %v2354_v14  ;;  %v5995_v14 = vld [vmem:[#allocation2 + $0x40] sm:$0xff]  }
 0x108   : > { %v6741_v7 = vpop.f32.mrf.mxu1 }
 0x10a   : > { %v6743_v31 = vpop.f32.mrf.mxu2 }
 0x10b   : > { %8012 = vst [vmem:[#allocation55_spill] sm:$0xff] %v6743_v31  ;;  %4949 = vmatmul.msk.bf16.gmra.mxu3 %vm1029_vm3, %v5659_v47  ;;  %v6760_v47 = vsel %vm1537_vm4, %v1551_v15, %v1553_v1  ;;  %v1555_v31 = vrot.slane %v6209_v28, 1 }
 0x10c   : > { %v6746_v13 = vpop.f32.mrf.mxu0  ;;  %8015 = vst [vmem:[#allocation58_spill] sm:$0xff] %v6760_v47 }
 0x10d   : > { %v6784_v24 = vsel %vm1537_vm4, %v1553_v1, %v1555_v31 }
 0x10e   : > { %v6749_v53 = vpop.f32.mrf.mxu3  ;;  %8020 = vst [vmem:[#allocation63_spill] sm:$0xff] %v6784_v24 }
 0x10f   : > { %8013 = vst [vmem:[#allocation56_spill] sm:$0xff] %v6749_v53  ;;  %4982 = vmatmul.msk.bf16.gmra.mxu0 %vm1029_vm3, %v2355_v50  ;;  %v2361_v53 = vrot.slane %v2359_v42, 1  ;;  %v2363_v42 = vshrl.u32 %v5663_v29, 16 }
 0x110   : > { %v6752_v60 = vpop.f32.mrf.mxu1 }
 0x111   : > { %v2362_v15 = vsel %vm773_vm2, %v2358_v23, %v2361_v53 }
 0x112   : > { %v6755_v20 = vpop.f32.mrf.mxu2 }
 0x113   : > { %8014 = vst [vmem:[#allocation57_spill] sm:$0xff] %v6755_v20  ;;  %4884 = vmatmul.msk.bf16.gmra.mxu1 %vm1029_vm3, %v6516_v27 }
 0x114   : > { %v6762_v30 = vpop.f32.mrf.mxu0 }
 0x116   : > { %v6764_v41 = vpop.f32.mrf.mxu3 }
 0x117   : > { %8016 = vst [vmem:[#allocation59_spill] sm:$0xff] %v6764_v41  ;;  %4917 = vmatmul.msk.bf16.gmra.mxu2 %vm1029_vm3, %v6760_v47  ;;  %v5665_v47 = vld [vmem:[#allocation2 + $0x54] sm:$0xff]  }
 0x118   : > { %v6768_v50 = vpop.f32.mrf.mxu1  ;;  %v2366_v23 = vshll.u32 %v5665_v47, 16 }
 0x11a   : > { %v6770_v58 = vpop.f32.mrf.mxu2  ;;  %v2368_v61 = vrot.slane %v2366_v23, 1 }
 0x11b   : > { %8017 = vst [vmem:[#allocation60_spill] sm:$0xff] %v6770_v58  ;;  %4950 = vmatmul.msk.bf16.gmra.mxu3 %vm1029_vm3, %v5661_v57 }
 0x11c   : > { %v6773_v27 = vpop.f32.mrf.mxu0 }
 0x11e   : > { %v6776_v20 = vpop.f32.mrf.mxu3 }
 0x11f   : > { %8018 = vst [vmem:[#allocation61_spill] sm:$0xff] %v6776_v20  ;;  %4983 = vmatmul.msk.bf16.gmra.mxu0 %vm1029_vm3, %v2362_v15  ;;  %v2365_v20 = vor.u32 %v2363_v42, %v2361_v53  ;;  %v5996_v42 = vld [vmem:[#allocation2 + $0x48] sm:$0xff]  }
 0x120   : > { %v1376_v41 = vpop.f32.mrf.mxu1 }
 0x121   : > { %v1377_v28 = vadd.f32 %v1376_v41, %v6590_v43  ;;  %v2369_v1 = vsel %vm773_vm2, %v2365_v20, %v2368_v61 }
 0x122   : > { %v6780_v48 = vpop.f32.mrf.mxu2 }
 0x123   : > { %8019 = vst [vmem:[#allocation62_spill] sm:$0xff] %v6780_v48  ;;  %4885 = vmatmul.msk.bf16.gmra.mxu1 %vm1029_vm3, %v5995_v14 }
 0x124   : > { %v6786_v57 = vpop.f32.mrf.mxu0 }
 0x126   : > { %v1296_v58 = vpop.f32.mrf.mxu3 }
 0x127   : > { %4918 = vmatmul.msk.bf16.gmra.mxu2 %vm1029_vm3, %v6784_v24 }
 0x128   : > { %v1378_v15 = vpop.f32.mrf.mxu1 }
 0x129   : > { %v1379_v24 = vadd.f32 %v1378_v15, %v6604_v39 }
 0x12a   : > { %v1709_v48 = vpop.f32.mrf.mxu2 }
 0x12b   : > { %4951 = vmatmul.msk.bf16.gmra.mxu3 %vm1029_vm3, %v5663_v29  ;;  %v1868_v14 = vadd.f32 %v1709_v48, %v1377_v28  ;;  %v6800_v29 = vsel %vm1537_vm4, %v1555_v31, %v1557_v36  ;;  %v2373_v48 = vshll.u32 %v5667_v40, 16 }
 0x12c   : > { %v2636_v54 = vpop.f32.mrf.mxu0 }
 0x12d   : > { %v2375_v15 = vrot.slane %v2373_v48, 1 }
 0x12e   : > { %v2077_v25 = vpop.f32.mrf.mxu3 }
 0x12f   : > { %v2236_v26 = vadd.f32 %v2077_v25, %v1868_v14  ;;  %4984 = vmatmul.msk.bf16.gmra.mxu0 %vm1029_vm3, %v2369_v1  ;;  %v2370_v25 = vshrl.u32 %v5665_v47, 16 }
 0x130   : > { %v1381_v58 = vpop.f32.mrf.mxu1 }
 0x131   : > { %v6796_v43 = vadd.f32 %v2636_v54, %v2236_v26  ;;  %v1382_v54 = vadd.f32 %v1381_v58, %v6614_v17  ;;  %v2372_v26 = vor.u32 %v2370_v25, %v2368_v61  ;;  %v5669_v61 = vld [vmem:[#allocation2 + $0x64] sm:$0xff]  }
 0x132   : > { %v1711_v53 = vpop.f32.mrf.mxu2 }
 0x133   : > { %8021 = vst [vmem:[#allocation64_spill] sm:$0xff] %v6796_v43  ;;  %v1869_v41 = vadd.f32 %v1711_v53, %v1379_v24  ;;  %4886 = vmatmul.msk.bf16.gmra.mxu1 %vm1029_vm3, %v5996_v42  ;;  %v2376_v53 = vsel %vm773_vm2, %v2372_v26, %v2375_v15 }
 0x134   : > { %v2638_v20 = vpop.f32.mrf.mxu0 }
 0x136   : > { %v2079_v23 = vpop.f32.mrf.mxu3 }
 0x137   : > { %v2237_v28 = vadd.f32 %v2079_v23, %v1869_v41  ;;  %4919 = vmatmul.msk.bf16.gmra.mxu2 %vm1029_vm3, %v6800_v29  ;;  %v1559_v23 = vrot.slane %v6318_v44, 1 }
 0x138   : > { %v1383_v39 = vpop.f32.mrf.mxu1 }
 0x139   : > { %v6805_v24 = vadd.f32 %v2638_v20, %v2237_v28  ;;  %v1384_v17 = vadd.f32 %v1383_v39, %v6628_v5  ;;  %v2377_v28 = vshrl.u32 %v5667_v40, 16 }
 0x13a   : > { %v1714_v14 = vpop.f32.mrf.mxu2 }
 0x13b   : > { %4952 = vmatmul.msk.bf16.gmra.mxu3 %vm1029_vm3, %v5665_v47  ;;  %v1870_v31 = vadd.f32 %v1714_v14, %v1382_v54  ;;  %v6817_v47 = vsel %vm1537_vm4, %v1557_v36, %v1559_v23  ;;  %v2380_v54 = vshll.u32 %v5669_v61, 16  ;;  %v2379_v39 = vor.u32 %v2377_v28, %v2375_v15  ;;  %v5671_v15 = vld [vmem:[#allocation2 + $0x6c] sm:$0xff]  }
 0x13c   : > { %v2641_v1 = vpop.f32.mrf.mxu0 }
 0x13e   : > { %v2082_v42 = vpop.f32.mrf.mxu3 }
 0x13f   : > { %v2238_v43 = vadd.f32 %v2082_v42, %v1870_v31  ;;  %4985 = vmatmul.msk.bf16.gmra.mxu0 %vm1029_vm3, %v2376_v53  ;;  %v2382_v31 = vrot.slane %v2380_v54, 1 }
 0x140   : > { %v1386_v41 = vpop.f32.mrf.mxu1 }
 0x141   : > { %v6812_v58 = vadd.f32 %v2641_v1, %v2238_v43  ;;  %v1387_v43 = vadd.f32 %v1386_v41, %v6638_v63  ;;  %v2383_v42 = vsel %vm773_vm2, %v2379_v39, %v2382_v31 }
 0x142   : > { %v1716_v20 = vpop.f32.mrf.mxu2 }
 0x143   : > { %v1871_v25 = vadd.f32 %v1716_v20, %v1384_v17  ;;  %4887 = vmatmul.msk.bf16.gmra.mxu1 %vm1029_vm3, %v6277_v8 }
 0x144   : > { %v2643_v48 = vpop.f32.mrf.mxu0 }
 0x146   : > { %v2084_v26 = vpop.f32.mrf.mxu3 }
 0x147   : > { %v2239_v14 = vadd.f32 %v2084_v26, %v1871_v25  ;;  %4920 = vmatmul.msk.bf16.gmra.mxu2 %vm1029_vm3, %v6817_v47  ;;  %v1561_v26 = vrot.slane %v6364_v18, 1 }
 0x148   : > { %v1388_v5 = vpop.f32.mrf.mxu1 }
 0x149   : > { %v6822_v1 = vadd.f32 %v2643_v48, %v2239_v14  ;;  %v1389_v63 = vadd.f32 %v1388_v5, %v6654_v19  ;;  %v2384_v14 = vshrl.u32 %v5669_v61, 16 }
 0x14a   : > { %v1719_v53 = vpop.f32.mrf.mxu2 }
 0x14b   : > { %4953 = vmatmul.msk.bf16.gmra.mxu3 %vm1029_vm3, %v5667_v40  ;;  %v1872_v8 = vadd.f32 %v1719_v53, %v1387_v43  ;;  %v6834_v40 = vsel %vm1537_vm4, %v1559_v23, %v1561_v26  ;;  %v2387_v43 = vshll.u32 %v5671_v15, 16 }
 0x14c   : > { %v2646_v36 = vpop.f32.mrf.mxu0 }
 0x14e   : > { %v2087_v17 = vpop.f32.mrf.mxu3 }
 0x14f   : > { %v2240_v20 = vadd.f32 %v2087_v17, %v1872_v8  ;;  %4986 = vmatmul.msk.bf16.gmra.mxu0 %vm1029_vm3, %v2383_v42  ;;  %v2386_v8 = vor.u32 %v2384_v14, %v2382_v31  ;;  %v5673_v31 = vld [vmem:[#allocation2 + $0x74] sm:$0xff]  }
 0x150   : > { %v1391_v25 = vpop.f32.mrf.mxu1 }
 0x151   : > { %v6829_v41 = vadd.f32 %v2646_v36, %v2240_v20  ;;  %v1392_v5 = vadd.f32 %v1391_v25, %v6665_v9  ;;  %v2389_v36 = vrot.slane %v2387_v43, 1 }
 0x152   : > { %v1721_v48 = vpop.f32.mrf.mxu2 }
 0x153   : > { %v1873_v28 = vadd.f32 %v1721_v48, %v1389_v63  ;;  %4888 = vmatmul.msk.bf16.gmra.mxu1 %vm1029_vm3, %v6318_v44  ;;  %v2390_v20 = vsel %vm773_vm2, %v2386_v8, %v2389_v36 }
 0x154   : > { %v2648_v54 = vpop.f32.mrf.mxu0 }
 0x156   : > { %v2089_v39 = vpop.f32.mrf.mxu3 }
 0x157   : > { %v2241_v53 = vadd.f32 %v2089_v39, %v1873_v28  ;;  %4921 = vmatmul.msk.bf16.gmra.mxu2 %vm1029_vm3, %v6834_v40  ;;  %v1563_v39 = vrot.slane %v6412_v4, 1 }
 0x158   : > { %v1393_v19 = vpop.f32.mrf.mxu1 }
 0x159   : > { %v6839_v42 = vadd.f32 %v2648_v54, %v2241_v53  ;;  %v1394_v9 = vadd.f32 %v1393_v19, %v6681_v56  ;;  %v2391_v53 = vshrl.u32 %v5671_v15, 16 }
 0x15a   : > { %v1724_v17 = vpop.f32.mrf.mxu2 }
 0x15b   : > { %4954 = vmatmul.msk.bf16.gmra.mxu3 %vm1029_vm3, %v5669_v61  ;;  %v1874_v44 = vadd.f32 %v1724_v17, %v1392_v5  ;;  %v6851_v61 = vsel %vm1537_vm4, %v1561_v26, %v1563_v39  ;;  %v2394_v5 = vshll.u32 %v5673_v31, 16 }
 0x15c   : > { %v2651_v23 = vpop.f32.mrf.mxu0 }
 0x15e   : > { %v2092_v63 = vpop.f32.mrf.mxu3 }
 0x15f   : > { %v2242_v48 = vadd.f32 %v2092_v63, %v1874_v44  ;;  %4987 = vmatmul.msk.bf16.gmra.mxu0 %vm1029_vm3, %v2390_v20  ;;  %v2393_v44 = vor.u32 %v2391_v53, %v2389_v36  ;;  %v5675_v36 = vld [vmem:[#allocation2 + $0x7c] sm:$0xff]  }
 0x160   : > { %v1396_v28 = vpop.f32.mrf.mxu1 }
 0x161   : > { %v6846_v25 = vadd.f32 %v2651_v23, %v2242_v48  ;;  %v1397_v19 = vadd.f32 %v1396_v28, %v6692_v52  ;;  %v2396_v23 = vrot.slane %v2394_v5, 1 }
 0x162   : > { %v1726_v54 = vpop.f32.mrf.mxu2 }
 0x163   : > { %v1875_v14 = vadd.f32 %v1726_v54, %v1394_v9  ;;  %4889 = vmatmul.msk.bf16.gmra.mxu1 %vm1029_vm3, %v6364_v18  ;;  %v2397_v48 = vsel %vm773_vm2, %v2393_v44, %v2396_v23 }
 0x164   : > { %v2653_v43 = vpop.f32.mrf.mxu0 }
 0x166   : > { %v2094_v8 = vpop.f32.mrf.mxu3 }
 0x167   : > { %v2243_v17 = vadd.f32 %v2094_v8, %v1875_v14  ;;  %4922 = vmatmul.msk.bf16.gmra.mxu2 %vm1029_vm3, %v6851_v61  ;;  %v1565_v8 = vrot.slane %v6463_v51, 1 }
 0x168   : > { %v1398_v56 = vpop.f32.mrf.mxu1 }
 0x169   : > { %v6856_v20 = vadd.f32 %v2653_v43, %v2243_v17  ;;  %v1399_v52 = vadd.f32 %v1398_v56, %v6708_v16  ;;  %v2398_v17 = vshrl.u32 %v5673_v31, 16 }
 0x16a   : > { %v1729_v63 = vpop.f32.mrf.mxu2 }
 0x16b   : > { %4955 = vmatmul.msk.bf16.gmra.mxu3 %vm1029_vm3, %v5671_v15  ;;  %v1876_v18 = vadd.f32 %v1729_v63, %v1397_v19  ;;  %v6868_v15 = vsel %vm1537_vm4, %v1563_v39, %v1565_v8  ;;  %v2401_v19 = vshll.u32 %v5675_v36, 16 }
 0x16c   : > { %v2656_v26 = vpop.f32.mrf.mxu0 }
 0x16e   : > { %v2097_v9 = vpop.f32.mrf.mxu3 }
 0x16f   : > { %v2244_v54 = vadd.f32 %v2097_v9, %v1876_v18  ;;  %4988 = vmatmul.msk.bf16.gmra.mxu0 %vm1029_vm3, %v2397_v48  ;;  %v2400_v18 = vor.u32 %v2398_v17, %v2396_v23  ;;  %v5677_v23 = vld [vmem:[#allocation2 + $0x84] sm:$0xff]  }
 0x170   : > { %v1401_v14 = vpop.f32.mrf.mxu1 }
 0x171   : > { %v6863_v28 = vadd.f32 %v2656_v26, %v2244_v54  ;;  %v1402_v56 = vadd.f32 %v1401_v14, %v6719_v37  ;;  %v2403_v26 = vrot.slane %v2401_v19, 1 }
 0x172   : > { %v1731_v43 = vpop.f32.mrf.mxu2 }
 0x173   : > { %v1877_v53 = vadd.f32 %v1731_v43, %v1399_v52  ;;  %4890 = vmatmul.msk.bf16.gmra.mxu1 %vm1029_vm3, %v6412_v4  ;;  %v2404_v54 = vsel %vm773_vm2, %v2400_v18, %v2403_v26 }
 0x174   : > { %v2658_v5 = vpop.f32.mrf.mxu0 }
 0x176   : > { %v2099_v44 = vpop.f32.mrf.mxu3 }
 0x177   : > { %v2245_v63 = vadd.f32 %v2099_v44, %v1877_v53  ;;  %4923 = vmatmul.msk.bf16.gmra.mxu2 %vm1029_vm3, %v6868_v15  ;;  %v1567_v44 = vrot.slane %v6497_v38, 1 }
 0x178   : > { %v1403_v16 = vpop.f32.mrf.mxu1 }
 0x179   : > { %v6873_v48 = vadd.f32 %v2658_v5, %v2245_v63  ;;  %v1404_v37 = vadd.f32 %v1403_v16, %v6735_v12  ;;  %v2405_v63 = vshrl.u32 %v5675_v36, 16 }
 0x17a   : > { %v1734_v9 = vpop.f32.mrf.mxu2 }
 0x17b   : > { %4956 = vmatmul.msk.bf16.gmra.mxu3 %vm1029_vm3, %v5673_v31  ;;  %v1878_v4 = vadd.f32 %v1734_v9, %v1402_v56  ;;  %v6885_v31 = vsel %vm1537_vm4, %v1565_v8, %v1567_v44  ;;  %v2408_v56 = vshll.u32 %v5677_v23, 16 }
 0x17c   : > { %v2661_v39 = vpop.f32.mrf.mxu0 }
 0x17e   : > { %v2102_v52 = vpop.f32.mrf.mxu3 }
 0x17f   : > { %v2246_v43 = vadd.f32 %v2102_v52, %v1878_v4  ;;  %4989 = vmatmul.msk.bf16.gmra.mxu0 %vm1029_vm3, %v2404_v54  ;;  %v2407_v4 = vor.u32 %v2405_v63, %v2403_v26  ;;  %v5679_v26 = vld [vmem:[#allocation2 + $0x8c] sm:$0xff]  }
 0x180   : > { %v1406_v53 = vpop.f32.mrf.mxu1 }
 0x181   : > { %v6880_v14 = vadd.f32 %v2661_v39, %v2246_v43  ;;  %v1407_v16 = vadd.f32 %v1406_v53, %v6746_v13  ;;  %v2410_v39 = vrot.slane %v2408_v56, 1 }
 0x182   : > { %v1736_v5 = vpop.f32.mrf.mxu2 }
 0x183   : > { %8022 = vst [vmem:[#allocation65_spill] sm:$0xff] %v6880_v14  ;;  %v1879_v17 = vadd.f32 %v1736_v5, %v1404_v37  ;;  %4891 = vmatmul.msk.bf16.gmra.mxu1 %vm1029_vm3, %v6463_v51  ;;  %v2411_v43 = vsel %vm773_vm2, %v2407_v4, %v2410_v39 }
 0x184   : > { %v2663_v19 = vpop.f32.mrf.mxu0 }
 0x186   : > { %v2104_v18 = vpop.f32.mrf.mxu3 }
 0x187   : > { %v2247_v9 = vadd.f32 %v2104_v18, %v1879_v17  ;;  %4924 = vmatmul.msk.bf16.gmra.mxu2 %vm1029_vm3, %v6885_v31  ;;  %v5997_v18 = vld [vmem:[#allocation2 + $0x80] sm:$0xff]  }
 0x188   : > { %v1408_v12 = vpop.f32.mrf.mxu1  ;;  %v1569_v14 = vrot.slane %v5997_v18, 1 }
 0x189   : > { %v6890_v54 = vadd.f32 %v2663_v19, %v2247_v9  ;;  %v1409_v13 = vadd.f32 %v1408_v12, %v6762_v30  ;;  %v2412_v9 = vshrl.u32 %v5677_v23, 16 }
 0x18a   : > { %v1739_v52 = vpop.f32.mrf.mxu2 }
 0x18b   : > { %4957 = vmatmul.msk.bf16.gmra.mxu3 %vm1029_vm3, %v5675_v36  ;;  %v1880_v51 = vadd.f32 %v1739_v52, %v1407_v16  ;;  %v6901_v36 = vsel %vm1537_vm4, %v1567_v44, %v1569_v14  ;;  %v2415_v16 = vshll.u32 %v5679_v26, 16 }
 0x18c   : > { %v2666_v8 = vpop.f32.mrf.mxu0 }
 0x18e   : > { %v2107_v37 = vpop.f32.mrf.mxu3 }
 0x18f   : > { %v2248_v5 = vadd.f32 %v2107_v37, %v1880_v51  ;;  %4990 = vmatmul.msk.bf16.gmra.mxu0 %vm1029_vm3, %v2411_v43  ;;  %v2414_v51 = vor.u32 %v2412_v9, %v2410_v39  ;;  %v5681_v39 = vld [vmem:[#allocation2 + $0x94] sm:$0xff]  }
 0x190   : > { %v1411_v17 = vpop.f32.mrf.mxu1 }
 0x191   : > { %v6896_v53 = vadd.f32 %v2666_v8, %v2248_v5  ;;  %v1412_v12 = vadd.f32 %v1411_v17, %v6773_v27  ;;  %v2417_v8 = vrot.slane %v2415_v16, 1 }
 0x192   : > { %v1741_v19 = vpop.f32.mrf.mxu2 }
 0x193   : > { %8023 = vst [vmem:[#allocation66_spill] sm:$0xff] %v6896_v53  ;;  %v1881_v63 = vadd.f32 %v1741_v19, %v1409_v13  ;;  %4892 = vmatmul.msk.bf16.gmra.mxu1 %vm1029_vm3, %v6497_v38  ;;  %v2418_v5 = vsel %vm773_vm2, %v2414_v51, %v2417_v8 }
 0x194   : > { %v2668_v56 = vpop.f32.mrf.mxu0 }
 0x196   : > { %v2109_v4 = vpop.f32.mrf.mxu3 }
 0x197   : > { %v2249_v52 = vadd.f32 %v2109_v4, %v1881_v63  ;;  %4925 = vmatmul.msk.bf16.gmra.mxu2 %vm1029_vm3, %v6901_v36  ;;  %v5998_v4 = vld [vmem:[#allocation2 + $0x88] sm:$0xff]  }
 0x198   : > { %v1413_v30 = vpop.f32.mrf.mxu1  ;;  %v1571_v53 = vrot.slane %v5998_v4, 1 }
 0x199   : > { %v6906_v43 = vadd.f32 %v2668_v56, %v2249_v52  ;;  %v1414_v27 = vadd.f32 %v1413_v30, %v6786_v57  ;;  %v2419_v52 = vshrl.u32 %v5679_v26, 16 }
 0x19a   : > { %v1744_v37 = vpop.f32.mrf.mxu2 }
 0x19b   : > { %4958 = vmatmul.msk.bf16.gmra.mxu3 %vm1029_vm3, %v5677_v23  ;;  %v1882_v38 = vadd.f32 %v1744_v37, %v1412_v12  ;;  %v6916_v23 = vsel %vm1537_vm4, %v1569_v14, %v1571_v53  ;;  %v2422_v12 = vshll.u32 %v5681_v39, 16  ;;  %v2421_v30 = vor.u32 %v2419_v52, %v2417_v8  ;;  %v5683_v8 = vld [vmem:[#allocation2 + $0x9c] sm:$0xff]  }
 0x19c   : > { %v2671_v44 = vpop.f32.mrf.mxu0 }
 0x19e   : > { %v2112_v13 = vpop.f32.mrf.mxu3 }
 0x19f   : > { %v2250_v19 = vadd.f32 %v2112_v13, %v1882_v38  ;;  %4991 = vmatmul.msk.bf16.gmra.mxu0 %vm1029_vm3, %v2418_v5 }
 0x1a0   : > { %v1416_v63 = vpop.f32.mrf.mxu1 }
 0x1a1   : > { %v6912_v17 = vadd.f32 %v2671_v44, %v2250_v19  ;;  %v1417_v57 = vadd.f32 %v1416_v63, %v6577_v35  ;;  %v2424_v44 = vrot.slane %v2422_v12, 1 }
 0x1a2   : > { %v1746_v56 = vpop.f32.mrf.mxu2 }
 0x1a3   : > { %8024 = vst [vmem:[#allocation67_spill] sm:$0xff] %v6912_v17  ;;  %v1883_v9 = vadd.f32 %v1746_v56, %v1414_v27  ;;  %4893 = vmatmul.msk.bf16.gmra.mxu1 %vm1029_vm3, %v5997_v18  ;;  %v2425_v19 = vsel %vm773_vm2, %v2421_v30, %v2424_v44 }
 0x1a4   : > { %v2673_v16 = vpop.f32.mrf.mxu0 }
 0x1a6   : > { %v2114_v51 = vpop.f32.mrf.mxu3 }
 0x1a7   : > { %v2251_v37 = vadd.f32 %v2114_v51, %v1883_v9  ;;  %4926 = vmatmul.msk.bf16.gmra.mxu2 %vm1029_vm3, %v6916_v23  ;;  %v5999_v51 = vld [vmem:[#allocation2 + $0x90] sm:$0xff]  }
 0x1a8   : > { %v1418_v38 = vpop.f32.mrf.mxu1  ;;  %v1573_v17 = vrot.slane %v5999_v51, 1 }
 0x1a9   : > { %v6921_v5 = vadd.f32 %v2673_v16, %v2251_v37  ;;  %v1419_v35 = vadd.f32 %v1418_v38, %v6585_v46  ;;  %v2426_v37 = vshrl.u32 %v5681_v39, 16 }
 0x1aa   : > { %v1749_v13 = vpop.f32.mrf.mxu2 }
 0x1ab   : > { %4959 = vmatmul.msk.bf16.gmra.mxu3 %vm1029_vm3, %v5679_v26  ;;  %v1884_v14 = vadd.f32 %v1749_v13, %v1417_v57  ;;  %v6931_v26 = vsel %vm1537_vm4, %v1571_v53, %v1573_v17  ;;  %v2429_v57 = vshll.u32 %v5683_v8, 16  ;;  %v2428_v38 = vor.u32 %v2426_v37, %v2424_v44  ;;  %v5685_v44 = vld [vmem:[#allocation2 + $0xa4] sm:$0xff]  }
 0x1ac   : > { %v2676_v18 = vpop.f32.mrf.mxu0 }
 0x1ae   : > { %v2117_v27 = vpop.f32.mrf.mxu3 }
 0x1af   : > { %v2252_v56 = vadd.f32 %v2117_v27, %v1884_v14  ;;  %4992 = vmatmul.msk.bf16.gmra.mxu0 %vm1029_vm3, %v2425_v19 }
 0x1b0   : > { %v1421_v9 = vpop.f32.mrf.mxu1 }
 0x1b1   : > { %v6927_v63 = vadd.f32 %v2676_v18, %v2252_v56  ;;  %v1422_v46 = vadd.f32 %v1421_v9, %v6596_v10  ;;  %v2431_v18 = vrot.slane %v2429_v57, 1 }
 0x1b2   : > { %v1751_v16 = vpop.f32.mrf.mxu2 }
 0x1b3   : > { %8025 = vst [vmem:[#allocation68_spill] sm:$0xff] %v6927_v63  ;;  %v1885_v52 = vadd.f32 %v1751_v16, %v1419_v35  ;;  %4894 = vmatmul.msk.bf16.gmra.mxu1 %vm1029_vm3, %v5998_v4  ;;  %v2432_v56 = vsel %vm773_vm2, %v2428_v38, %v2431_v18 }
 0x1b4   : > { %v2678_v12 = vpop.f32.mrf.mxu0 }
 0x1b6   : > { %v2119_v30 = vpop.f32.mrf.mxu3 }
 0x1b7   : > { %v2253_v13 = vadd.f32 %v2119_v30, %v1885_v52  ;;  %4927 = vmatmul.msk.bf16.gmra.mxu2 %vm1029_vm3, %v6931_v26  ;;  %v6000_v30 = vld [vmem:[#allocation2 + $0x98] sm:$0xff]  }
 0x1b8   : > { %v1423_v14 = vpop.f32.mrf.mxu1  ;;  %v1575_v63 = vrot.slane %v6000_v30, 1 }
 0x1b9   : > { %v6936_v19 = vadd.f32 %v2678_v12, %v2253_v13  ;;  %v1424_v10 = vadd.f32 %v1423_v14, %v6609_v59  ;;  %v2433_v13 = vshrl.u32 %v5683_v8, 16 }
 0x1ba   : > { %v1754_v27 = vpop.f32.mrf.mxu2 }
 0x1bb   : > { %4960 = vmatmul.msk.bf16.gmra.mxu3 %vm1029_vm3, %v5681_v39  ;;  %v1886_v53 = vadd.f32 %v1754_v27, %v1422_v46  ;;  %v6946_v39 = vsel %vm1537_vm4, %v1573_v17, %v1575_v63  ;;  %v2436_v46 = vshll.u32 %v5685_v44, 16  ;;  %v2435_v14 = vor.u32 %v2433_v13, %v2431_v18  ;;  %v5687_v18 = vld [vmem:[#allocation2 + $0xac] sm:$0xff]  }
 0x1bc   : > { %v2681_v4 = vpop.f32.mrf.mxu0 }
 0x1be   : > { %v2122_v35 = vpop.f32.mrf.mxu3 }
 0x1bf   : > { %v2254_v16 = vadd.f32 %v2122_v35, %v1886_v53  ;;  %4993 = vmatmul.msk.bf16.gmra.mxu0 %vm1029_vm3, %v2432_v56 }
 0x1c0   : > { %v1426_v52 = vpop.f32.mrf.mxu1 }
 0x1c1   : > { %v6942_v9 = vadd.f32 %v2681_v4, %v2254_v16  ;;  %v1427_v59 = vadd.f32 %v1426_v52, %v6620_v21  ;;  %v2438_v4 = vrot.slane %v2436_v46, 1 }
 0x1c2   : > { %v1756_v12 = vpop.f32.mrf.mxu2 }
 0x1c3   : > { %8026 = vst [vmem:[#allocation69_spill] sm:$0xff] %v6942_v9  ;;  %v1887_v37 = vadd.f32 %v1756_v12, %v1424_v10  ;;  %4895 = vmatmul.msk.bf16.gmra.mxu1 %vm1029_vm3, %v5999_v51  ;;  %v2439_v16 = vsel %vm773_vm2, %v2435_v14, %v2438_v4 }
 0x1c4   : > { %v2683_v57 = vpop.f32.mrf.mxu0 }
 0x1c6   : > { %v2124_v38 = vpop.f32.mrf.mxu3 }
 0x1c7   : > { %v2255_v27 = vadd.f32 %v2124_v38, %v1887_v37  ;;  %4928 = vmatmul.msk.bf16.gmra.mxu2 %vm1029_vm3, %v6946_v39  ;;  %v6001_v38 = vld [vmem:[#allocation2 + $0xa0] sm:$0xff]  }
 0x1c8   : > { %v1428_v53 = vpop.f32.mrf.mxu1  ;;  %v1577_v9 = vrot.slane %v6001_v38, 1 }
 0x1c9   : > { %v6951_v56 = vadd.f32 %v2683_v57, %v2255_v27  ;;  %v1429_v21 = vadd.f32 %v1428_v53, %v6633_v0  ;;  %v2440_v27 = vshrl.u32 %v5685_v44, 16 }
 0x1ca   : > { %v1759_v35 = vpop.f32.mrf.mxu2 }
 0x1cb   : > { %4961 = vmatmul.msk.bf16.gmra.mxu3 %vm1029_vm3, %v5683_v8  ;;  %v1888_v17 = vadd.f32 %v1759_v35, %v1427_v59  ;;  %v6961_v8 = vsel %vm1537_vm4, %v1575_v63, %v1577_v9  ;;  %v2443_v59 = vshll.u32 %v5687_v18, 16  ;;  %v2442_v53 = vor.u32 %v2440_v27, %v2438_v4  ;;  %v5689_v4 = vld [vmem:[#allocation2 + $0xb4] sm:$0xff]  }
 0x1cc   : > { %v2686_v51 = vpop.f32.mrf.mxu0 }
 0x1ce   : > { %v2127_v10 = vpop.f32.mrf.mxu3 }
 0x1cf   : > { %v2256_v12 = vadd.f32 %v2127_v10, %v1888_v17  ;;  %4994 = vmatmul.msk.bf16.gmra.mxu0 %vm1029_vm3, %v2439_v16 }
 0x1d0   : > { %v1431_v37 = vpop.f32.mrf.mxu1 }
 0x1d1   : > { %v6957_v52 = vadd.f32 %v2686_v51, %v2256_v12  ;;  %v1432_v0 = vadd.f32 %v1431_v37, %v6644_v2  ;;  %v2445_v51 = vrot.slane %v2443_v59, 1 }
 0x1d2   : > { %v1761_v57 = vpop.f32.mrf.mxu2 }
 0x1d3   : > { %8027 = vst [vmem:[#allocation70_spill] sm:$0xff] %v6957_v52  ;;  %v1889_v13 = vadd.f32 %v1761_v57, %v1429_v21  ;;  %4896 = vmatmul.msk.bf16.gmra.mxu1 %vm1029_vm3, %v6000_v30  ;;  %v2446_v12 = vsel %vm773_vm2, %v2442_v53, %v2445_v51 }
 0x1d4   : > { %v2688_v46 = vpop.f32.mrf.mxu0 }
 0x1d6   : > { %v2129_v14 = vpop.f32.mrf.mxu3 }
 0x1d7   : > { %v2257_v35 = vadd.f32 %v2129_v14, %v1889_v13  ;;  %4929 = vmatmul.msk.bf16.gmra.mxu2 %vm1029_vm3, %v6961_v8  ;;  %v6002_v14 = vld [vmem:[#allocation2 + $0xa8] sm:$0xff]  }
 0x1d8   : > { %v1433_v17 = vpop.f32.mrf.mxu1  ;;  %v1579_v52 = vrot.slane %v6002_v14, 1 }
 0x1d9   : > { %v6966_v16 = vadd.f32 %v2688_v46, %v2257_v35  ;;  %v1434_v2 = vadd.f32 %v1433_v17, %v6660_v33  ;;  %v2447_v35 = vshrl.u32 %v5687_v18, 16 }
 0x1da   : > { %v1764_v10 = vpop.f32.mrf.mxu2 }
 0x1db   : > { %4962 = vmatmul.msk.bf16.gmra.mxu3 %vm1029_vm3, %v5685_v44  ;;  %v1890_v63 = vadd.f32 %v1764_v10, %v1432_v0  ;;  %v6976_v44 = vsel %vm1537_vm4, %v1577_v9, %v1579_v52  ;;  %v2450_v0 = vshll.u32 %v5689_v4, 16  ;;  %v2449_v17 = vor.u32 %v2447_v35, %v2445_v51  ;;  %v5691_v51 = vld [vmem:[#allocation2 + $0xbc] sm:$0xff]  }
 0x1dc   : > { %v2691_v30 = vpop.f32.mrf.mxu0 }
 0x1de   : > { %v2132_v21 = vpop.f32.mrf.mxu3 }
 0x1df   : > { %v2258_v57 = vadd.f32 %v2132_v21, %v1890_v63  ;;  %4995 = vmatmul.msk.bf16.gmra.mxu0 %vm1029_vm3, %v2446_v12 }
 0x1e0   : > { %v1436_v13 = vpop.f32.mrf.mxu1 }
 0x1e1   : > { %v6972_v37 = vadd.f32 %v2691_v30, %v2258_v57  ;;  %v1437_v33 = vadd.f32 %v1436_v13, %v6671_v49  ;;  %v2452_v30 = vrot.slane %v2450_v0, 1 }
 0x1e2   : > { %v1766_v46 = vpop.f32.mrf.mxu2 }
 0x1e3   : > { %8028 = vst [vmem:[#allocation71_spill] sm:$0xff] %v6972_v37  ;;  %v1891_v27 = vadd.f32 %v1766_v46, %v1434_v2  ;;  %4897 = vmatmul.msk.bf16.gmra.mxu1 %vm1029_vm3, %v6001_v38  ;;  %v2453_v57 = vsel %vm773_vm2, %v2449_v17, %v2452_v30 }
 0x1e4   : > { %v2693_v59 = vpop.f32.mrf.mxu0 }
 0x1e6   : > { %v2134_v53 = vpop.f32.mrf.mxu3 }
 0x1e7   : > { %v2259_v10 = vadd.f32 %v2134_v53, %v1891_v27  ;;  %4930 = vmatmul.msk.bf16.gmra.mxu2 %vm1029_vm3, %v6976_v44  ;;  %v6003_v53 = vld [vmem:[#allocation2 + $0xb0] sm:$0xff]  }
 0x1e8   : > { %v1438_v63 = vpop.f32.mrf.mxu1  ;;  %v1581_v37 = vrot.slane %v6003_v53, 1 }
 0x1e9   : > { %v6981_v12 = vadd.f32 %v2693_v59, %v2259_v10  ;;  %v1439_v49 = vadd.f32 %v1438_v63, %v6687_v62  ;;  %v2454_v10 = vshrl.u32 %v5689_v4, 16 }
 0x1ea   : > { %v1769_v21 = vpop.f32.mrf.mxu2 }
 0x1eb   : > { %4963 = vmatmul.msk.bf16.gmra.mxu3 %vm1029_vm3, %v5687_v18  ;;  %v1892_v9 = vadd.f32 %v1769_v21, %v1437_v33  ;;  %v6991_v18 = vsel %vm1537_vm4, %v1579_v52, %v1581_v37  ;;  %v2457_v33 = vshll.u32 %v5691_v51, 16  ;;  %v2456_v63 = vor.u32 %v2454_v10, %v2452_v30  ;;  %v5693_v30 = vld [vmem:[#allocation2 + $0xc4] sm:$0xff]  }
 0x1ec   : > { %v2696_v38 = vpop.f32.mrf.mxu0 }
 0x1ee   : > { %v2137_v2 = vpop.f32.mrf.mxu3 }
 0x1ef   : > { %v2260_v46 = vadd.f32 %v2137_v2, %v1892_v9  ;;  %4996 = vmatmul.msk.bf16.gmra.mxu0 %vm1029_vm3, %v2453_v57 }
 0x1f0   : > { %v1441_v27 = vpop.f32.mrf.mxu1 }
 0x1f1   : > { %v6987_v13 = vadd.f32 %v2696_v38, %v2260_v46  ;;  %v1442_v62 = vadd.f32 %v1441_v27, %v6698_v55  ;;  %v2459_v38 = vrot.slane %v2457_v33, 1 }
 0x1f2   : > { %v1771_v59 = vpop.f32.mrf.mxu2 }
 0x1f3   : > { %8029 = vst [vmem:[#allocation72_spill] sm:$0xff] %v6987_v13  ;;  %v1893_v35 = vadd.f32 %v1771_v59, %v1439_v49  ;;  %4898 = vmatmul.msk.bf16.gmra.mxu1 %vm1029_vm3, %v6002_v14  ;;  %v2460_v46 = vsel %vm773_vm2, %v2456_v63, %v2459_v38 }
 0x1f4   : > { %v2698_v0 = vpop.f32.mrf.mxu0 }
 0x1f6   : > { %v2139_v17 = vpop.f32.mrf.mxu3 }
 0x1f7   : > { %v2261_v21 = vadd.f32 %v2139_v17, %v1893_v35  ;;  %4931 = vmatmul.msk.bf16.gmra.mxu2 %vm1029_vm3, %v6991_v18  ;;  %v6004_v17 = vld [vmem:[#allocation2 + $0xb8] sm:$0xff]  }
 0x1f8   : > { %v1443_v9 = vpop.f32.mrf.mxu1  ;;  %v1583_v13 = vrot.slane %v6004_v17, 1 }
 0x1f9   : > { %v6996_v57 = vadd.f32 %v2698_v0, %v2261_v21  ;;  %v1444_v55 = vadd.f32 %v1443_v9, %v6714_v34  ;;  %v2461_v21 = vshrl.u32 %v5691_v51, 16 }
 0x1fa   : > { %v1774_v2 = vpop.f32.mrf.mxu2 }
 0x1fb   : > { %4964 = vmatmul.msk.bf16.gmra.mxu3 %vm1029_vm3, %v5689_v4  ;;  %v1894_v52 = vadd.f32 %v1774_v2, %v1442_v62  ;;  %v7006_v4 = vsel %vm1537_vm4, %v1581_v37, %v1583_v13  ;;  %v2464_v62 = vshll.u32 %v5693_v30, 16  ;;  %v2463_v9 = vor.u32 %v2461_v21, %v2459_v38  ;;  %v5695_v38 = vld [vmem:[#allocation2 + $0xcc] sm:$0xff]  }
 0x1fc   : > { %v2701_v14 = vpop.f32.mrf.mxu0 }
 0x1fe   : > { %v2142_v49 = vpop.f32.mrf.mxu3 }
 0x1ff   : > { %v2262_v59 = vadd.f32 %v2142_v49, %v1894_v52  ;;  %4997 = vmatmul.msk.bf16.gmra.mxu0 %vm1029_vm3, %v2460_v46 }
 0x200   : > { %v1446_v35 = vpop.f32.mrf.mxu1 }
 0x201   : > { %v7002_v27 = vadd.f32 %v2701_v14, %v2262_v59  ;;  %v1447_v34 = vadd.f32 %v1446_v35, %v6725_v22  ;;  %v2466_v14 = vrot.slane %v2464_v62, 1 }
 0x202   : > { %v1776_v0 = vpop.f32.mrf.mxu2 }
 0x203   : > { %8030 = vst [vmem:[#allocation73_spill] sm:$0xff] %v7002_v27  ;;  %v1895_v10 = vadd.f32 %v1776_v0, %v1444_v55  ;;  %4899 = vmatmul.msk.bf16.gmra.mxu1 %vm1029_vm3, %v6003_v53  ;;  %v2467_v59 = vsel %vm773_vm2, %v2463_v9, %v2466_v14 }
 0x204   : > { %v2703_v33 = vpop.f32.mrf.mxu0 }
 0x206   : > { %v2144_v63 = vpop.f32.mrf.mxu3 }
 0x207   : > { %v2263_v2 = vadd.f32 %v2144_v63, %v1895_v10  ;;  %4932 = vmatmul.msk.bf16.gmra.mxu2 %vm1029_vm3, %v7006_v4  ;;  %v6005_v63 = vld [vmem:[#allocation2 + $0xc0] sm:$0xff]  }
 0x208   : > { %v1448_v52 = vpop.f32.mrf.mxu1  ;;  %v1585_v27 = vrot.slane %v6005_v63, 1 }
 0x209   : > { %v7011_v46 = vadd.f32 %v2703_v33, %v2263_v2  ;;  %v1449_v22 = vadd.f32 %v1448_v52, %v6741_v7  ;;  %v2468_v2 = vshrl.u32 %v5693_v30, 16 }
 0x20a   : > { %v1779_v49 = vpop.f32.mrf.mxu2 }
 0x20b   : > { %4965 = vmatmul.msk.bf16.gmra.mxu3 %vm1029_vm3, %v5691_v51  ;;  %v1896_v37 = vadd.f32 %v1779_v49, %v1447_v34  ;;  %v7021_v51 = vsel %vm1537_vm4, %v1583_v13, %v1585_v27  ;;  %v2471_v34 = vshll.u32 %v5695_v38, 16  ;;  %v2470_v52 = vor.u32 %v2468_v2, %v2466_v14  ;;  %v5697_v14 = vld [vmem:[#allocation2 + $0xd4] sm:$0xff]  }
 0x20c   : > { %v2706_v53 = vpop.f32.mrf.mxu0 }
 0x20e   : > { %v2147_v55 = vpop.f32.mrf.mxu3 }
 0x20f   : > { %v2264_v0 = vadd.f32 %v2147_v55, %v1896_v37  ;;  %4998 = vmatmul.msk.bf16.gmra.mxu0 %vm1029_vm3, %v2467_v59 }
 0x210   : > { %v1451_v10 = vpop.f32.mrf.mxu1 }
 0x211   : > { %v7017_v35 = vadd.f32 %v2706_v53, %v2264_v0  ;;  %v1452_v7 = vadd.f32 %v1451_v10, %v6752_v60  ;;  %v2473_v53 = vrot.slane %v2471_v34, 1 }
 0x212   : > { %v1781_v33 = vpop.f32.mrf.mxu2 }
 0x213   : > { %8031 = vst [vmem:[#allocation74_spill] sm:$0xff] %v7017_v35  ;;  %v1897_v21 = vadd.f32 %v1781_v33, %v1449_v22  ;;  %4900 = vmatmul.msk.bf16.gmra.mxu1 %vm1029_vm3, %v6004_v17  ;;  %v2474_v0 = vsel %vm773_vm2, %v2470_v52, %v2473_v53 }
 0x214   : > { %v2708_v62 = vpop.f32.mrf.mxu0 }
 0x216   : > { %v2149_v9 = vpop.f32.mrf.mxu3 }
 0x217   : > { %v2265_v49 = vadd.f32 %v2149_v9, %v1897_v21  ;;  %4933 = vmatmul.msk.bf16.gmra.mxu2 %vm1029_vm3, %v7021_v51  ;;  %v6006_v9 = vld [vmem:[#allocation2 + $0xc8] sm:$0xff]  }
 0x218   : > { %v1453_v37 = vpop.f32.mrf.mxu1  ;;  %v1587_v35 = vrot.slane %v6006_v9, 1 }
 0x219   : > { %v7026_v59 = vadd.f32 %v2708_v62, %v2265_v49  ;;  %v1454_v60 = vadd.f32 %v1453_v37, %v6768_v50  ;;  %v2475_v49 = vshrl.u32 %v5695_v38, 16 }
 0x21a   : > { %v1784_v55 = vpop.f32.mrf.mxu2 }
 0x21b   : > { %4966 = vmatmul.msk.bf16.gmra.mxu3 %vm1029_vm3, %v5693_v30  ;;  %v1898_v13 = vadd.f32 %v1784_v55, %v1452_v7  ;;  %v7036_v30 = vsel %vm1537_vm4, %v1585_v27, %v1587_v35  ;;  %v2478_v7 = vshll.u32 %v5697_v14, 16  ;;  %v2477_v37 = vor.u32 %v2475_v49, %v2473_v53  ;;  %v5699_v53 = vld [vmem:[#allocation2 + $0xdc] sm:$0xff]  }
 0x21c   : > { %v2711_v17 = vpop.f32.mrf.mxu0 }
 0x21e   : > { %v2152_v22 = vpop.f32.mrf.mxu3 }
 0x21f   : > { %v2266_v33 = vadd.f32 %v2152_v22, %v1898_v13  ;;  %4999 = vmatmul.msk.bf16.gmra.mxu0 %vm1029_vm3, %v2474_v0 }
 0x220   : > { %v1456_v21 = vpop.f32.mrf.mxu1 }
 0x221   : > { %v7032_v10 = vadd.f32 %v2711_v17, %v2266_v33  ;;  %v1457_v50 = vadd.f32 %v1456_v21, %v6587_v11  ;;  %v2480_v17 = vrot.slane %v2478_v7, 1 }
 0x222   : > { %v1786_v62 = vpop.f32.mrf.mxu2 }
 0x223   : > { %8032 = vst [vmem:[#allocation75_spill] sm:$0xff] %v7032_v10  ;;  %v1899_v2 = vadd.f32 %v1786_v62, %v1454_v60  ;;  %4901 = vmatmul.msk.bf16.gmra.mxu1 %vm1029_vm3, %v6005_v63  ;;  %v2481_v33 = vsel %vm773_vm2, %v2477_v37, %v2480_v17 }
 0x224   : > { %v2713_v34 = vpop.f32.mrf.mxu0 }
 0x226   : > { %v2154_v52 = vpop.f32.mrf.mxu3 }
 0x227   : > { %v2267_v55 = vadd.f32 %v2154_v52, %v1899_v2  ;;  %4934 = vmatmul.msk.bf16.gmra.mxu2 %vm1029_vm3, %v7036_v30  ;;  %v6007_v52 = vld [vmem:[#allocation2 + $0xd0] sm:$0xff]  }
 0x228   : > { %v1458_v13 = vpop.f32.mrf.mxu1  ;;  %v1589_v10 = vrot.slane %v6007_v52, 1 }
 0x229   : > { %v7041_v0 = vadd.f32 %v2713_v34, %v2267_v55  ;;  %v1459_v11 = vadd.f32 %v1458_v13, %v6599_v45  ;;  %v2482_v55 = vshrl.u32 %v5697_v14, 16 }
 0x22a   : > { %v1789_v22 = vpop.f32.mrf.mxu2 }
 0x22b   : > { %8033 = vst [vmem:[#allocation76_spill] sm:$0xff] %v7041_v0  ;;  %4967 = vmatmul.msk.bf16.gmra.mxu3 %vm1029_vm3, %v5695_v38  ;;  %v1900_v27 = vadd.f32 %v1789_v22, %v1457_v50  ;;  %v7051_v38 = vsel %vm1537_vm4, %v1587_v35, %v1589_v10  ;;  %v2485_v50 = vshll.u32 %v5699_v53, 16  ;;  %v2484_v13 = vor.u32 %v2482_v55, %v2480_v17  ;;  %v5701_v17 = vld [vmem:[#allocation2 + $0xe4] sm:$0xff]  }
 0x22c   : > { %v2716_v63 = vpop.f32.mrf.mxu0 }
 0x22e   : > { %v2157_v60 = vpop.f32.mrf.mxu3 }
 0x22f   : > { %v2268_v62 = vadd.f32 %v2157_v60, %v1900_v27  ;;  %5000 = vmatmul.msk.bf16.gmra.mxu0 %vm1029_vm3, %v2481_v33 }
 0x230   : > { %v1461_v2 = vpop.f32.mrf.mxu1 }
 0x231   : > { %v7047_v21 = vadd.f32 %v2716_v63, %v2268_v62  ;;  %v1462_v45 = vadd.f32 %v1461_v2, %v6611_v32  ;;  %v2487_v63 = vrot.slane %v2485_v50, 1 }
 0x232   : > { %v1791_v34 = vpop.f32.mrf.mxu2 }
 0x233   : > { %8034 = vst [vmem:[#allocation77_spill] sm:$0xff] %v7047_v21  ;;  %v1901_v49 = vadd.f32 %v1791_v34, %v1459_v11  ;;  %4902 = vmatmul.msk.bf16.gmra.mxu1 %vm1029_vm3, %v6006_v9  ;;  %v2488_v62 = vsel %vm773_vm2, %v2484_v13, %v2487_v63 }
 0x234   : > { %v2718_v7 = vpop.f32.mrf.mxu0 }
 0x236   : > { %v2159_v37 = vpop.f32.mrf.mxu3 }
 0x237   : > { %v2269_v22 = vadd.f32 %v2159_v37, %v1901_v49  ;;  %4935 = vmatmul.msk.bf16.gmra.mxu2 %vm1029_vm3, %v7051_v38  ;;  %v6008_v37 = vld [vmem:[#allocation2 + $0xd8] sm:$0xff]  }
 0x238   : > { %v1463_v27 = vpop.f32.mrf.mxu1  ;;  %v1591_v21 = vrot.slane %v6008_v37, 1 }
 0x239   : > { %v7056_v33 = vadd.f32 %v2718_v7, %v2269_v22  ;;  %v1464_v32 = vadd.f32 %v1463_v27, %v6623_v6  ;;  %v2489_v22 = vshrl.u32 %v5699_v53, 16 }
 0x23a   : > { %v1794_v60 = vpop.f32.mrf.mxu2 }
 0x23b   : > { %8035 = vst [vmem:[#allocation78_spill] sm:$0xff] %v7056_v33  ;;  %4968 = vmatmul.msk.bf16.gmra.mxu3 %vm1029_vm3, %v5697_v14  ;;  %v1902_v35 = vadd.f32 %v1794_v60, %v1462_v45  ;;  %v7066_v14 = vsel %vm1537_vm4, %v1589_v10, %v1591_v21  ;;  %v2492_v45 = vshll.u32 %v5701_v17, 16  ;;  %v2491_v27 = vor.u32 %v2489_v22, %v2487_v63  ;;  %v523_v22 = vld [vmem:[%s6446_s14 + $0x4] sm:$0xf] }
 0x23c   : > { %v2721_v9 = vpop.f32.mrf.mxu0  ;;  %8037 = vst [vmem:[#allocation80_spill] sm:$0xff] %v7066_v14 }
 0x23d   : > { %532 = vst.msk [vmem:[#allocation2 + $0x100] sm:$0xf] %vm458_vm1, %v523_v22 }
 0x23e   : > { %v2162_v11 = vpop.f32.mrf.mxu3 }
 0x23f   : > { %v2270_v34 = vadd.f32 %v2162_v11, %v1902_v35  ;;  %5001 = vmatmul.msk.bf16.gmra.mxu0 %vm1029_vm3, %v2488_v62 }
 0x240   : > { %v1466_v49 = vpop.f32.mrf.mxu1 }
 0x241   : > { %v7062_v2 = vadd.f32 %v2721_v9, %v2270_v34  ;;  %v1467_v6 = vadd.f32 %v1466_v49, %v6635_v3  ;;  %v2494_v9 = vrot.slane %v2492_v45, 1  ;;  %v8039_v3 = vld [vmem:[#allocation37_spill] sm:$0xff] }
 0x242   : > { %v1796_v7 = vpop.f32.mrf.mxu2  ;;  %v5702_v49 = vld [vmem:[#allocation2 + $0xec] sm:$0xff]  }
 0x243   : > { %8036 = vst [vmem:[#allocation79_spill] sm:$0xff] %v7062_v2  ;;  %v1903_v55 = vadd.f32 %v1796_v7, %v1464_v32  ;;  %4903 = vmatmul.msk.bf16.gmra.mxu1 %vm1029_vm3, %v6007_v52  ;;  %v2495_v34 = vsel %vm773_vm2, %v2491_v27, %v2494_v9  ;;  %v2496_v27 = vshrl.u32 %v5701_v17, 16 }
 0x244   : > { %v2723_v50 = vpop.f32.mrf.mxu0 }
 0x246   : > { %v2164_v13 = vpop.f32.mrf.mxu3 }
 0x247   : > { %v2271_v60 = vadd.f32 %v2164_v13, %v1903_v55  ;;  %4936 = vmatmul.msk.bf16.gmra.mxu2 %vm1029_vm3, %v7066_v14  ;;  %v6009_v13 = vld [vmem:[#allocation2 + $0xe0] sm:$0xff]  }
 0x248   : > { %v1468_v35 = vpop.f32.mrf.mxu1  ;;  %v1593_v2 = vrot.slane %v6009_v13, 1 }
 0x249   : > { %v7071_v62 = vadd.f32 %v2723_v50, %v2271_v60  ;;  %v1469_v63 = vadd.f32 %v1468_v35, %v8039_v3 }
 0x24a   : > { %v1799_v52 = vpop.f32.mrf.mxu2  ;;  %v7083_v60 = vsel %vm1537_vm4, %v1591_v21, %v1593_v2 }
 0x24b   : > { %8038 = vst [vmem:[#allocation81_spill] sm:$0xff] %v7071_v62  ;;  %4969 = vmatmul.msk.bf16.gmra.mxu3 %vm1029_vm3, %v5699_v53  ;;  %v1904_v10 = vadd.f32 %v1799_v52, %v1467_v6  ;;  %v2499_v52 = vshll.u32 %v5702_v49, 16 }
 0x24c   : > { %v2726_v11 = vpop.f32.mrf.mxu0  ;;  %8041 = vst [vmem:[#allocation82_spill] sm:$0xff] %v7083_v60 }
 0x24d   : > { %v2501_v3 = vrot.slane %v2499_v52, 1  ;;  %v526_v52 = vld [vmem:[%s6446_s14 + $0x10] sm:$0xf] }
 0x24e   : > { %v2167_v32 = vpop.f32.mrf.mxu3  ;;  %535 = vst.msk [vmem:[#allocation2 + $0x10c] sm:$0xf] %vm458_vm1, %v526_v52  ;;  %v8047_v52 = vld [vmem:[#allocation45_spill] sm:$0xff] }
 0x24f   : > { %v2272_v7 = vadd.f32 %v2167_v32, %v1904_v10  ;;  %5002 = vmatmul.msk.bf16.gmra.mxu0 %vm1029_vm3, %v2495_v34 }
 0x250   : > { %v1471_v55 = vpop.f32.mrf.mxu1 }
 0x251   : > { %v7078_v50 = vadd.f32 %v2726_v11, %v2272_v7  ;;  %v8042_v11 = vld [vmem:[#allocation40_spill] sm:$0xff]  ;;  %v2498_v7 = vor.u32 %v2496_v27, %v2494_v9 }
 0x252   : > { %v1801_v45 = vpop.f32.mrf.mxu2  ;;  %v1472_v32 = vadd.f32 %v1471_v55, %v8042_v11  ;;  %v524_v27 = vld [vmem:[%s6446_s14 + $0x8] sm:$0xf] }
 0x253   : > { %8040 = vst [vmem:[#allocation37_spill] sm:$0xff] %v7078_v50  ;;  %v1905_v53 = vadd.f32 %v1801_v45, %v1469_v63  ;;  %4904 = vmatmul.msk.bf16.gmra.mxu1 %vm1029_vm3, %v6008_v37  ;;  %v2502_v45 = vsel %vm773_vm2, %v2498_v7, %v2501_v3  ;;  %v7095_v50 = vld [vmem:[#allocation2 + $0xf8] sm:$0xff]   ;;  %v6012_v11 = vld [vmem:[#allocation2 + $0xe8] sm:$0xff]  }
 0x254   : > { %v2728_v6 = vpop.f32.mrf.mxu0  ;;  %v7098_v55 = vunpack.c.l.b16 %v7095_v50  ;;  %533 = vst.msk [vmem:[#allocation2 + $0x104] sm:$0xf] %vm458_vm1, %v524_v27  ;;  %v8044_v7 = vld [vmem:[#allocation42_spill] sm:$0xff]  ;;  %v2503_v27 = vshrl.u32 %v5702_v49, 16 }
 0x256   : > { %v2169_v10 = vpop.f32.mrf.mxu3 }
 0x257   : > { %v2273_v34 = vadd.f32 %v2169_v10, %v1905_v53  ;;  %4937 = vmatmul.msk.bf16.gmra.mxu2 %vm1029_vm3, %v7083_v60  ;;  %v7092_v53 = vld [vmem:[#allocation2 + $0xf0] sm:$0xff]  }
 0x258   : > { %v1473_v35 = vpop.f32.mrf.mxu1  ;;  %v5264_v10 = vunpack.c.h.b16 %v7092_v53 }
 0x259   : > { %v7088_v37 = vadd.f32 %v2728_v6, %v2273_v34  ;;  %v525_v6 = vld [vmem:[%s6446_s14 + $0xc] sm:$0xf] }
 0x25a   : > { %v1804_v21 = vpop.f32.mrf.mxu2  ;;  %534 = vst.msk [vmem:[#allocation2 + $0x108] sm:$0xf] %vm458_vm1, %v525_v6 }
 0x25b   : > { %8043 = vst [vmem:[#allocation40_spill] sm:$0xff] %v7088_v37  ;;  %4970 = vmatmul.msk.bf16.gmra.mxu3 %vm1029_vm3, %v5701_v17  ;;  %v1906_v63 = vadd.f32 %v1804_v21, %v1472_v32  ;;  %v1595_v32 = vrot.slane %v6012_v11, 1  ;;  %v1474_v21 = vadd.f32 %v1473_v35, %v8044_v7  ;;  %v7108_v37 = vpack.c.b16 %v7098_v55, %v5264_v10 }
 0x25c   : > { %v2731_v22 = vpop.f32.mrf.mxu0 }
 0x25d   : > { %v2506_v6 = vshll.u32 %v7108_v37, 16 }
 0x25e   : > { %v2172_v9 = vpop.f32.mrf.mxu3 }
 0x25f   : > { %v2274_v34 = vadd.f32 %v2172_v9, %v1906_v63  ;;  %5003 = vmatmul.msk.bf16.gmra.mxu0 %vm1029_vm3, %v2502_v45  ;;  %v7115_v45 = vsel %vm1537_vm4, %v1593_v2, %v1595_v32  ;;  %v2508_v7 = vrot.slane %v2506_v6, 1 }
 0x260   : > { %v1476_v17 = vpop.f32.mrf.mxu1  ;;  %8046 = vst [vmem:[#allocation83_spill] sm:$0xff] %v7115_v45 }
 0x261   : > { %v7111_v62 = vadd.f32 %v2731_v22, %v2274_v34  ;;  %v1477_v22 = vadd.f32 %v1476_v17, %v8047_v52  ;;  %v2505_v34 = vor.u32 %v2503_v27, %v2501_v3  ;;  %v5712_v3 = vld [vmem:[#allocation2 + $0xfc] sm:$0xff]  }
 0x262   : > { %v1806_v33 = vpop.f32.mrf.mxu2  ;;  %v2513_v52 = vshll.u32 %v5712_v3, 16 }
 0x263   : > { %8045 = vst [vmem:[#allocation42_spill] sm:$0xff] %v7111_v62  ;;  %v1907_v63 = vadd.f32 %v1806_v33, %v1474_v21  ;;  %4905 = vmatmul.msk.bf16.gmra.mxu1 %vm1029_vm3, %v6009_v13  ;;  %v2509_v62 = vsel %vm773_vm2, %v2505_v34, %v2508_v7 }
 0x264   : > { %v2733_v9 = vpop.f32.mrf.mxu0 }
 0x266   : > { %v2174_v60 = vpop.f32.mrf.mxu3 }
 0x267   : > { %v2275_v35 = vadd.f32 %v2174_v60, %v1907_v63  ;;  %4938 = vmatmul.msk.bf16.gmra.mxu2 %vm1029_vm3, %v7115_v45  ;;  %v1597_v63 = vrot.slane %v7092_v53, 1  ;;  %v8049_v45 = vld [vmem:[#allocation47_spill] sm:$0xff] }
 0x268   : > { %v1478_v10 = vpop.f32.mrf.mxu1 }
 0x269   : > { %v7121_v33 = vadd.f32 %v2733_v9, %v2275_v35  ;;  %v1479_v17 = vadd.f32 %v1478_v10, %v8049_v45  ;;  %v8052_v10 = vld [vmem:[#allocation50_spill] sm:$0xff] }
 0x26a   : > { %v1809_v13 = vpop.f32.mrf.mxu2 }
 0x26b   : > { %8048 = vst [vmem:[#allocation45_spill] sm:$0xff] %v7121_v33  ;;  %4971 = vmatmul.msk.bf16.gmra.mxu3 %vm1029_vm3, %v5702_v49  ;;  %v1908_v2 = vadd.f32 %v1809_v13, %v1477_v22  ;;  %v7132_v49 = vsel %vm1537_vm4, %v1595_v32, %v1597_v63  ;;  %v2515_v13 = vrot.slane %v2513_v52, 1  ;;  %v5468_v32 = vld [vmem:[#allocation2 + $0x108] sm:$0xff]  }
 0x26c   : > { %v2736_v21 = vpop.f32.mrf.mxu0  ;;  %8051 = vst [vmem:[#allocation84_spill] sm:$0xff] %v7132_v49 }
 0x26e   : > { %v2177_v0 = vpop.f32.mrf.mxu3 }
 0x26f   : > { %v2276_v14 = vadd.f32 %v2177_v0, %v1908_v2  ;;  %5004 = vmatmul.msk.bf16.gmra.mxu0 %vm1029_vm3, %v2509_v62  ;;  %v2510_v0 = vshrl.u32 %v7108_v37, 16 }
 0x270   : > { %v1481_v60 = vpop.f32.mrf.mxu1 }
 0x271   : > { %v7128_v27 = vadd.f32 %v2736_v21, %v2276_v14  ;;  %v1482_v14 = vadd.f32 %v1481_v60, %v8052_v10  ;;  %v2512_v34 = vor.u32 %v2510_v0, %v2508_v7  ;;  %v5467_v21 = vld [vmem:[#allocation2 + $0x100] sm:$0xff]   ;;  %v7145_v60 = vrot.slane %v7095_v50, 1 }
 0x272   : > { %v1811_v9 = vpop.f32.mrf.mxu2 }
 0x273   : > { %8050 = vst [vmem:[#allocation47_spill] sm:$0xff] %v7128_v27  ;;  %v1909_v6 = vadd.f32 %v1811_v9, %v1479_v17  ;;  %4906 = vmatmul.msk.bf16.gmra.mxu1 %vm1029_vm3, %v6012_v11  ;;  %v5275_v27 = vunpack.c.l.b16 %v5468_v32 }
 0x274   : > { %v2738_v35 = vpop.f32.mrf.mxu0 }
 0x276   : > { %v2179_v62 = vpop.f32.mrf.mxu3 }
 0x277   : > { %v2277_v22 = vadd.f32 %v2179_v62, %v1909_v6  ;;  %4939 = vmatmul.msk.bf16.gmra.mxu2 %vm1029_vm3, %v7132_v49  ;;  %v2516_v6 = vsel %vm773_vm2, %v2512_v34, %v2515_v13  ;;  %v5272_v62 = vunpack.c.h.b16 %v5467_v21 }
 0x278   : > { %v1483_v45 = vpop.f32.mrf.mxu1 }
 0x279   : > { %v7138_v2 = vadd.f32 %v2738_v35, %v2277_v22  ;;  %v8053_v35 = vld [vmem:[#allocation52_spill] sm:$0xff]  ;;  %v7148_v52 = vpack.c.b16 %v5275_v27, %v5272_v62 }
 0x27a   : > { %v1814_v11 = vpop.f32.mrf.mxu2  ;;  %v1484_v0 = vadd.f32 %v1483_v45, %v8053_v35 }
 0x27b   : > { %4972 = vmatmul.msk.bf16.gmra.mxu3 %vm1029_vm3, %v7108_v37  ;;  %v1910_v17 = vadd.f32 %v1814_v11, %v1482_v14  ;;  %v2517_v11 = vshrl.u32 %v5712_v3, 16  ;;  %v2521_v50 = vshll.u32 %v7148_v52, 16 }
 0x27c   : > { %v2741_v9 = vpop.f32.mrf.mxu0 }
 0x27e   : > { %v2182_v33 = vpop.f32.mrf.mxu3 }
 0x27f   : > { %v2278_v49 = vadd.f32 %v2182_v33, %v1910_v17  ;;  %5005 = vmatmul.msk.bf16.gmra.mxu0 %vm1029_vm3, %v2516_v6  ;;  %v7156_v33 = vsel %vm1537_vm4, %v1597_v63, %v7145_v60  ;;  %v2519_v17 = vor.u32 %v2517_v11, %v2515_v13 }
 0x280   : > { %v1486_v7 = vpop.f32.mrf.mxu1 }
 0x281   : > { %v7150_v22 = vadd.f32 %v2741_v9, %v2278_v49  ;;  %v8055_v49 = vld [vmem:[#allocation55_spill] sm:$0xff]  ;;  %v2523_v9 = vrot.slane %v2521_v50, 1 }
 0x282   : > { %v1816_v10 = vpop.f32.mrf.mxu2  ;;  %v1487_v45 = vadd.f32 %v1486_v7, %v8055_v49  ;;  %v8056_v7 = vld [vmem:[#allocation57_spill] sm:$0xff] }
 0x283   : > { %8054 = vst [vmem:[#allocation50_spill] sm:$0xff] %v7150_v22  ;;  %v1911_v14 = vadd.f32 %v1816_v10, %v1484_v0  ;;  %4907 = vmatmul.msk.bf16.gmra.mxu1 %vm1029_vm3, %v7092_v53  ;;  %v2524_v0 = vsel %vm773_vm2, %v2519_v17, %v2523_v9 }
 0x284   : > { %v2743_v34 = vpop.f32.mrf.mxu0 }
 0x286   : > { %v2184_v21 = vpop.f32.mrf.mxu3 }
 0x287   : > { %v2279_v32 = vadd.f32 %v2184_v21, %v1911_v14  ;;  %4940 = vmatmul.msk.bf16.gmra.mxu2 %vm1029_vm3, %v7156_v33  ;;  %v1298_v14 = vpack.c.b16 %v7098_v55, %v7098_v55  ;;  %v2525_v55 = vshrl.u32 %v7148_v52, 16 }
 0x288   : > { %v1488_v27 = vpop.f32.mrf.mxu1 }
 0x289   : > { %v7162_v6 = vadd.f32 %v2743_v34, %v2279_v32  ;;  %v1489_v13 = vadd.f32 %v1488_v27, %v8056_v7  ;;  %v6014_v7 = vld [vmem:[#allocation2 + $0x14] sm:$0xff]  }
 0x28a   : > { %v1819_v53 = vpop.f32.mrf.mxu2 }
 0x28b   : > { %4973 = vmatmul.msk.bf16.gmra.mxu3 %vm1029_vm3, %v5712_v3  ;;  %v1912_v63 = vadd.f32 %v1819_v53, %v1487_v45  ;;  %v1968_v45 = vpack.c.b16 %v5272_v62, %v5272_v62  ;;  %v8058_v53 = vld [vmem:[#allocation60_spill] sm:$0xff] }
 0x28c   : > { %v2746_v35 = vpop.f32.mrf.mxu0 }
 0x28e   : > { %v2187_v10 = vpop.f32.mrf.mxu3 }
 0x28f   : > { %v2280_v22 = vadd.f32 %v2187_v10, %v1912_v63  ;;  %5006 = vmatmul.msk.bf16.gmra.mxu0 %vm1029_vm3, %v2524_v0  ;;  %v6013_v10 = vld [vmem:[#allocation2 + $0xc] sm:$0xff]  }
 0x290   : > { %v1491_v21 = vpop.f32.mrf.mxu1 }
 0x291   : > { %v7170_v11 = vadd.f32 %v2746_v35, %v2280_v22  ;;  %v1492_v63 = vadd.f32 %v1491_v21, %v8058_v53  ;;  %v2527_v35 = vor.u32 %v2525_v55, %v2523_v9  ;;  %v8059_v21 = vld [vmem:[#allocation62_spill] sm:$0xff] }
 0x292   : > { %v1821_v34 = vpop.f32.mrf.mxu2 }
 0x293   : > { %8057 = vst [vmem:[#allocation52_spill] sm:$0xff] %v7170_v11  ;;  %v1913_v50 = vadd.f32 %v1821_v34, %v1489_v13  ;;  %4908 = vmatmul.msk.bf16.gmra.mxu1 %vm1029_vm3, %v1298_v14  ;;  %v2860_v14 = vrot.slane %v6013_v10, 1  ;;  %v2861_v13 = vrot.slane %v6014_v7, 1  ;;  %v8061_v10 = vld [vmem:[#allocation32_spill] sm:$0xff] }
 0x294   : > { %v2748_v3 = vpop.f32.mrf.mxu0 }
 0x295   : > { %v2862_v11 = vsel %vm1537_vm4, %v2860_v14, %v2861_v13 }
 0x296   : > { %v2189_v32 = vpop.f32.mrf.mxu3 }
 0x297   : > { %v2281_v49 = vadd.f32 %v2189_v32, %v1913_v50  ;;  %4941 = vmatmul.msk.bf16.gmra.mxu2 %vm1029_vm3, %v7145_v60 }
 0x298   : > { %v1493_v17 = vpop.f32.mrf.mxu1 }
 0x299   : > { %v7177_v0 = vadd.f32 %v2748_v3, %v2281_v49  ;;  %v1494_v3 = vadd.f32 %v1493_v17, %v8059_v21 }
 0x29a   : > { %v1824_v22 = vpop.f32.mrf.mxu2 }
 0x29b   : > { %4974 = vmatmul.msk.bf16.gmra.mxu3 %vm1029_vm3, %v1968_v45  ;;  %v1914_v27 = vadd.f32 %v1824_v22, %v1492_v63  ;;  %v6015_v22 = vld [vmem:[#allocation2 + $0x18] sm:$0xff]  }
 0x29c   : > { %v2751_v34 = vpop.f32.mrf.mxu0 }
 0x29e   : > { %v2192_v50 = vpop.f32.mrf.mxu3 }
 0x29f   : > { %v2282_v32 = vadd.f32 %v2192_v50, %v1914_v27  ;;  %5007 = vmatmul.msk.bf16.gmra.mxu0 %vm1029_vm3, %v2527_v35  ;;  %v8063_v50 = vld [vmem:[#allocation15_spill] sm:$0xff] }
 0x2a0   : > { %v1496_v62 = vpop.f32.mrf.mxu1 }
 0x2a1   : > { %v7183_v49 = vadd.f32 %v2751_v34, %v2282_v32  ;;  %v1497_v35 = vadd.f32 %v1496_v62, %v8061_v10  ;;  %v6016_v34 = vld [vmem:[#allocation2 + $0x1c] sm:$0xff]  }
 0x2a2   : > { %v1826_v53 = vpop.f32.mrf.mxu2  ;;  %v2863_v32 = vrot.slane %v6016_v34, 1  ;;  %v6017_v34 = vld [vmem:[#allocation2 + $0x20] sm:$0xff]  }
 0x2a3   : > { %8060 = vst [vmem:[#allocation55_spill] sm:$0xff] %v7183_v49  ;;  %v1915_v45 = vadd.f32 %v1826_v53, %v1494_v3  ;;  %5009 = vmatmul.msk.bf16.vlgmr.msra.gmra.mxu1 %vm1029_vm3, %v2862_v11  ;;  %v8064_v53 = vld [vmem:[#allocation38_spill] sm:$0xff]  ;;  %v8069_v49 = vld [vmem:[#allocation19_spill] sm:$0xff] }
 0x2a4   : > { %v2753_v9 = vpop.f32.mrf.mxu0 }
 0x2a6   : > { %v2194_v55 = vpop.f32.mrf.mxu3 }
 0x2a7   : > { %v2283_v63 = vadd.f32 %v2194_v55, %v1915_v45  ;;  %5042 = vmatmul.msk.bf16.vlgmr.msra.gmra.mxu2 %vm1029_vm3, %v6015_v22  ;;  %v2864_v55 = vsel %vm1537_vm4, %v2861_v13, %v2863_v32  ;;  %v8065_v22 = vld [vmem:[#allocation33_spill] sm:$0xff] }
 0x2a8   : > { %v1498_v27 = vpop.f32.mrf.mxu1 }
 0x2a9   : > { %v7188_v7 = vadd.f32 %v2753_v9, %v2283_v63  ;;  %v1499_v62 = vadd.f32 %v1498_v27, %v8065_v22 }
 0x2aa   : > { %v1829_v14 = vpop.f32.mrf.mxu2 }
 0x2ab   : > { %8062 = vst [vmem:[#allocation57_spill] sm:$0xff] %v7188_v7  ;;  %5075 = vmatmul.msk.bf16.vlgmr.msra.gmra.mxu3 %vm1029_vm3, %v8063_v50  ;;  %v1916_v17 = vadd.f32 %v1829_v14, %v1497_v35 }
 0x2ac   : > { %v2756_v21 = vpop.f32.mrf.mxu0 }
 0x2ae   : > { %v2197_v11 = vpop.f32.mrf.mxu3 }
 0x2af   : > { %v2284_v3 = vadd.f32 %v2197_v11, %v1916_v17  ;;  %5108 = vmatmul.msk.bf16.vlgmr.msra.gmra.mxu0 %vm1029_vm3, %v8064_v53  ;;  %v8067_v11 = vld [vmem:[#allocation34_spill] sm:$0xff] }
 0x2b0   : > { %v1501_v45 = vpop.f32.mrf.mxu1 }
 0x2b1   : > { %v7196_v9 = vadd.f32 %v2756_v21, %v2284_v3  ;;  %v1502_v53 = vadd.f32 %v1501_v45, %v8067_v11  ;;  %v6018_v21 = vld [vmem:[#allocation2 + $0x24] sm:$0xff]  }
 0x2b2   : > { %v1831_v63 = vpop.f32.mrf.mxu2  ;;  %v2865_v3 = vrot.slane %v6018_v21, 1  ;;  %v6019_v21 = vld [vmem:[#allocation2 + $0x28] sm:$0xff]  }
 0x2b3   : > { %8066 = vst [vmem:[#allocation60_spill] sm:$0xff] %v7196_v9  ;;  %v1917_v10 = vadd.f32 %v1831_v63, %v1499_v62  ;;  %5010 = vmatmul.msk.bf16.gmra.mxu1 %vm1029_vm3, %v2864_v55  ;;  %v8070_v63 = vld [vmem:[#allocation43_spill] sm:$0xff] }
 0x2b4   : > { %v2758_v35 = vpop.f32.mrf.mxu0  ;;  %v8075_v9 = vld [vmem:[#allocation23_spill] sm:$0xff] }
 0x2b6   : > { %v2199_v14 = vpop.f32.mrf.mxu3 }
 0x2b7   : > { %v2285_v50 = vadd.f32 %v2199_v14, %v1917_v10  ;;  %5043 = vmatmul.msk.bf16.gmra.mxu2 %vm1029_vm3, %v6017_v34  ;;  %v2866_v14 = vsel %vm1537_vm4, %v2863_v32, %v2865_v3  ;;  %v8071_v34 = vld [vmem:[#allocation35_spill] sm:$0xff] }
 0x2b8   : > { %v1503_v17 = vpop.f32.mrf.mxu1 }
 0x2b9   : > { %v7201_v7 = vadd.f32 %v2758_v35, %v2285_v50  ;;  %v1504_v45 = vadd.f32 %v1503_v17, %v8071_v34 }
 0x2ba   : > { %v1834_v13 = vpop.f32.mrf.mxu2 }
 0x2bb   : > { %8068 = vst [vmem:[#allocation62_spill] sm:$0xff] %v7201_v7  ;;  %5076 = vmatmul.msk.bf16.gmra.mxu3 %vm1029_vm3, %v8069_v49  ;;  %v1918_v27 = vadd.f32 %v1834_v13, %v1502_v53 }
 0x2bc   : > { %v2761_v22 = vpop.f32.mrf.mxu0 }
 0x2be   : > { %v2202_v55 = vpop.f32.mrf.mxu3 }
 0x2bf   : > { %v2286_v62 = vadd.f32 %v2202_v55, %v1918_v27  ;;  %5109 = vmatmul.msk.bf16.gmra.mxu0 %vm1029_vm3, %v8070_v63  ;;  %v8073_v55 = vld [vmem:[#allocation36_spill] sm:$0xff] }
 0x2c0   : > { %v1506_v10 = vpop.f32.mrf.mxu1 }
 0x2c1   : > { %v7209_v35 = vadd.f32 %v2761_v22, %v2286_v62  ;;  %v1507_v63 = vadd.f32 %v1506_v10, %v8073_v55  ;;  %v6020_v22 = vld [vmem:[#allocation2 + $0x2c] sm:$0xff]  }
 0x2c2   : > { %v1836_v50 = vpop.f32.mrf.mxu2  ;;  %v2867_v62 = vrot.slane %v6020_v22, 1  ;;  %v6021_v22 = vld [vmem:[#allocation2 + $0x30] sm:$0xff]  }
 0x2c3   : > { %8072 = vst [vmem:[#allocation32_spill] sm:$0xff] %v7209_v35  ;;  %v1919_v11 = vadd.f32 %v1836_v50, %v1504_v45  ;;  %5011 = vmatmul.msk.bf16.gmra.mxu1 %vm1029_vm3, %v2866_v14  ;;  %v8076_v50 = vld [vmem:[#allocation48_spill] sm:$0xff]  ;;  %v8081_v35 = vld [vmem:[#allocation27_spill] sm:$0xff] }
 0x2c4   : > { %v2763_v49 = vpop.f32.mrf.mxu0 }
 0x2c6   : > { %v2204_v53 = vpop.f32.mrf.mxu3 }
 0x2c7   : > { %v2287_v13 = vadd.f32 %v2204_v53, %v1919_v11  ;;  %5044 = vmatmul.msk.bf16.gmra.mxu2 %vm1029_vm3, %v6019_v21  ;;  %v2868_v53 = vsel %vm1537_vm4, %v2865_v3, %v2867_v62  ;;  %v8077_v21 = vld [vmem:[#allocation39_spill] sm:$0xff] }
 0x2c8   : > { %v1508_v27 = vpop.f32.mrf.mxu1 }
 0x2c9   : > { %v7214_v7 = vadd.f32 %v2763_v49, %v2287_v13  ;;  %v1509_v10 = vadd.f32 %v1508_v27, %v8077_v21 }
 0x2ca   : > { %v1839_v32 = vpop.f32.mrf.mxu2 }
 0x2cb   : > { %8074 = vst [vmem:[#allocation15_spill] sm:$0xff] %v7214_v7  ;;  %5077 = vmatmul.msk.bf16.gmra.mxu3 %vm1029_vm3, %v8075_v9  ;;  %v1920_v17 = vadd.f32 %v1839_v32, %v1507_v63 }
 0x2cc   : > { %v2766_v34 = vpop.f32.mrf.mxu0 }
 0x2ce   : > { %v2207_v14 = vpop.f32.mrf.mxu3 }
 0x2cf   : > { %v2288_v45 = vadd.f32 %v2207_v14, %v1920_v17  ;;  %5110 = vmatmul.msk.bf16.gmra.mxu0 %vm1029_vm3, %v8076_v50  ;;  %v8079_v14 = vld [vmem:[#allocation41_spill] sm:$0xff] }
 0x2d0   : > { %v1511_v11 = vpop.f32.mrf.mxu1 }
 0x2d1   : > { %v7222_v49 = vadd.f32 %v2766_v34, %v2288_v45  ;;  %v1512_v50 = vadd.f32 %v1511_v11, %v8079_v14  ;;  %v6022_v34 = vld [vmem:[#allocation2 + $0x34] sm:$0xff]  }
 0x2d2   : > { %v1841_v13 = vpop.f32.mrf.mxu2  ;;  %v2869_v45 = vrot.slane %v6022_v34, 1  ;;  %v6023_v34 = vld [vmem:[#allocation2 + $0x38] sm:$0xff]  }
 0x2d3   : > { %8078 = vst [vmem:[#allocation38_spill] sm:$0xff] %v7222_v49  ;;  %v1921_v55 = vadd.f32 %v1841_v13, %v1509_v10  ;;  %5012 = vmatmul.msk.bf16.gmra.mxu1 %vm1029_vm3, %v2868_v53  ;;  %v8082_v13 = vld [vmem:[#allocation53_spill] sm:$0xff]  ;;  %v8087_v49 = vld [vmem:[#allocation31_spill] sm:$0xff] }
 0x2d4   : > { %v2768_v9 = vpop.f32.mrf.mxu0 }
 0x2d6   : > { %v2209_v63 = vpop.f32.mrf.mxu3 }
 0x2d7   : > { %v2289_v32 = vadd.f32 %v2209_v63, %v1921_v55  ;;  %5045 = vmatmul.msk.bf16.gmra.mxu2 %vm1029_vm3, %v6021_v22  ;;  %v2870_v63 = vsel %vm1537_vm4, %v2867_v62, %v2869_v45  ;;  %v8083_v22 = vld [vmem:[#allocation44_spill] sm:$0xff] }
 0x2d8   : > { %v1513_v17 = vpop.f32.mrf.mxu1 }
 0x2d9   : > { %v7227_v7 = vadd.f32 %v2768_v9, %v2289_v32  ;;  %v1514_v11 = vadd.f32 %v1513_v17, %v8083_v22 }
 0x2da   : > { %v1844_v3 = vpop.f32.mrf.mxu2 }
 0x2db   : > { %8080 = vst [vmem:[#allocation33_spill] sm:$0xff] %v7227_v7  ;;  %5078 = vmatmul.msk.bf16.gmra.mxu3 %vm1029_vm3, %v8081_v35  ;;  %v1922_v27 = vadd.f32 %v1844_v3, %v1512_v50 }
 0x2dc   : > { %v2771_v21 = vpop.f32.mrf.mxu0 }
 0x2de   : > { %v2212_v53 = vpop.f32.mrf.mxu3 }
 0x2df   : > { %v2290_v10 = vadd.f32 %v2212_v53, %v1922_v27  ;;  %5111 = vmatmul.msk.bf16.gmra.mxu0 %vm1029_vm3, %v8082_v13  ;;  %v8085_v53 = vld [vmem:[#allocation46_spill] sm:$0xff] }
 0x2e0   : > { %v1516_v55 = vpop.f32.mrf.mxu1 }
 0x2e1   : > { %v7235_v9 = vadd.f32 %v2771_v21, %v2290_v10  ;;  %v1517_v13 = vadd.f32 %v1516_v55, %v8085_v53  ;;  %v6024_v21 = vld [vmem:[#allocation2 + $0x3c] sm:$0xff]  }
 0x2e2   : > { %v1846_v32 = vpop.f32.mrf.mxu2  ;;  %v2871_v10 = vrot.slane %v6024_v21, 1  ;;  %v6025_v21 = vld [vmem:[#allocation2 + $0x40] sm:$0xff]  }
 0x2e3   : > { %8084 = vst [vmem:[#allocation34_spill] sm:$0xff] %v7235_v9  ;;  %v1923_v14 = vadd.f32 %v1846_v32, %v1514_v11  ;;  %5013 = vmatmul.msk.bf16.gmra.mxu1 %vm1029_vm3, %v2870_v63  ;;  %v8088_v32 = vld [vmem:[#allocation58_spill] sm:$0xff]  ;;  %v8093_v9 = vld [vmem:[#allocation3_spill] sm:$0xff] }
 0x2e4   : > { %v2773_v35 = vpop.f32.mrf.mxu0 }
 0x2e6   : > { %v2214_v50 = vpop.f32.mrf.mxu3 }
 0x2e7   : > { %v2291_v3 = vadd.f32 %v2214_v50, %v1923_v14  ;;  %5046 = vmatmul.msk.bf16.gmra.mxu2 %vm1029_vm3, %v6023_v34  ;;  %v2872_v50 = vsel %vm1537_vm4, %v2869_v45, %v2871_v10  ;;  %v8089_v34 = vld [vmem:[#allocation49_spill] sm:$0xff] }
 0x2e8   : > { %v1518_v27 = vpop.f32.mrf.mxu1 }
 0x2e9   : > { %v7240_v7 = vadd.f32 %v2773_v35, %v2291_v3  ;;  %v1519_v55 = vadd.f32 %v1518_v27, %v8089_v34 }
 0x2ea   : > { %v1849_v62 = vpop.f32.mrf.mxu2 }
 0x2eb   : > { %8086 = vst [vmem:[#allocation19_spill] sm:$0xff] %v7240_v7  ;;  %5079 = vmatmul.msk.bf16.gmra.mxu3 %vm1029_vm3, %v8087_v49  ;;  %v1924_v17 = vadd.f32 %v1849_v62, %v1517_v13 }
 0x2ec   : > { %v2776_v22 = vpop.f32.mrf.mxu0 }
 0x2ee   : > { %v2217_v63 = vpop.f32.mrf.mxu3 }
 0x2ef   : > { %v2292_v11 = vadd.f32 %v2217_v63, %v1924_v17  ;;  %5112 = vmatmul.msk.bf16.gmra.mxu0 %vm1029_vm3, %v8088_v32  ;;  %v8091_v63 = vld [vmem:[#allocation51_spill] sm:$0xff] }
 0x2f0   : > { %v1521_v14 = vpop.f32.mrf.mxu1 }
 0x2f1   : > { %v7248_v35 = vadd.f32 %v2776_v22, %v2292_v11  ;;  %v1522_v32 = vadd.f32 %v1521_v14, %v8091_v63  ;;  %v6026_v22 = vld [vmem:[#allocation2 + $0x44] sm:$0xff]  }
 0x2f2   : > { %v1851_v3 = vpop.f32.mrf.mxu2  ;;  %v2873_v11 = vrot.slane %v6026_v22, 1  ;;  %v6027_v22 = vld [vmem:[#allocation2 + $0x48] sm:$0xff]  }
 0x2f3   : > { %8090 = vst [vmem:[#allocation43_spill] sm:$0xff] %v7248_v35  ;;  %v1925_v53 = vadd.f32 %v1851_v3, %v1519_v55  ;;  %5014 = vmatmul.msk.bf16.gmra.mxu1 %vm1029_vm3, %v2872_v50  ;;  %v8094_v3 = vld [vmem:[#allocation63_spill] sm:$0xff]  ;;  %v8098_v35 = vld [vmem:[#allocation6_spill] sm:$0xff] }
 0x2f4   : > { %v2778_v49 = vpop.f32.mrf.mxu0 }
 0x2f6   : > { %v2219_v13 = vpop.f32.mrf.mxu3 }
 0x2f7   : > { %v2293_v62 = vadd.f32 %v2219_v13, %v1925_v53  ;;  %5047 = vmatmul.msk.bf16.gmra.mxu2 %vm1029_vm3, %v6025_v21  ;;  %v2874_v13 = vsel %vm1537_vm4, %v2871_v10, %v2873_v11  ;;  %v8095_v21 = vld [vmem:[#allocation54_spill] sm:$0xff] }
 0x2f8   : > { %v1523_v17 = vpop.f32.mrf.mxu1 }
 0x2f9   : > { %v7253_v7 = vadd.f32 %v2778_v49, %v2293_v62  ;;  %v1524_v14 = vadd.f32 %v1523_v17, %v8095_v21 }
 0x2fa   : > { %v1854_v45 = vpop.f32.mrf.mxu2 }
 0x2fb   : > { %8092 = vst [vmem:[#allocation35_spill] sm:$0xff] %v7253_v7  ;;  %5080 = vmatmul.msk.bf16.gmra.mxu3 %vm1029_vm3, %v8093_v9  ;;  %v1926_v27 = vadd.f32 %v1854_v45, %v1522_v32 }
 0x2fc   : > { %v2781_v34 = vpop.f32.mrf.mxu0 }
 0x2fe   : > { %v2222_v50 = vpop.f32.mrf.mxu3 }
 0x2ff   : > { %v2294_v55 = vadd.f32 %v2222_v50, %v1926_v27  ;;  %5113 = vmatmul.msk.bf16.gmra.mxu0 %vm1029_vm3, %v8094_v3  ;;  %v8096_v50 = vld [vmem:[#allocation56_spill] sm:$0xff] }
 0x300   : > { %v1526_v53 = vpop.f32.mrf.mxu1 }
 0x301   : > { %v7261_v49 = vadd.f32 %v2781_v34, %v2294_v55  ;;  %v1527_v3 = vadd.f32 %v1526_v53, %v8096_v50  ;;  %v6028_v34 = vld [vmem:[#allocation2 + $0x4c] sm:$0xff]  }
 0x302   : > { %v1856_v62 = vpop.f32.mrf.mxu2  ;;  %v2875_v55 = vrot.slane %v6028_v34, 1  ;;  %v8100_v34 = vld [vmem:[#allocation61_spill] sm:$0xff] }
 0x303   : > { %v1927_v63 = vadd.f32 %v1856_v62, %v1524_v14  ;;  %5015 = vmatmul.msk.bf16.gmra.mxu1 %vm1029_vm3, %v2874_v13 }
 0x304   : > { %v2783_v9 = vpop.f32.mrf.mxu0 }
 0x306   : > { %v2224_v32 = vpop.f32.mrf.mxu3 }
 0x307   : > { %v2295_v45 = vadd.f32 %v2224_v32, %v1927_v63  ;;  %5048 = vmatmul.msk.bf16.gmra.mxu2 %vm1029_vm3, %v6027_v22  ;;  %v2876_v63 = vsel %vm1537_vm4, %v2873_v11, %v2875_v55  ;;  %v8099_v32 = vld [vmem:[#allocation59_spill] sm:$0xff] }
 0x308   : > { %v1528_v27 = vpop.f32.mrf.mxu1 }
 0x309   : > { %v7266_v7 = vadd.f32 %v2783_v9, %v2295_v45  ;;  %v1529_v53 = vadd.f32 %v1528_v27, %v8099_v32 }
 0x30a   : > { %v1859_v10 = vpop.f32.mrf.mxu2 }
 0x30b   : > { %8097 = vst [vmem:[#allocation36_spill] sm:$0xff] %v7266_v7  ;;  %5081 = vmatmul.msk.bf16.gmra.mxu3 %vm1029_vm3, %v8098_v35  ;;  %v1928_v17 = vadd.f32 %v1859_v10, %v1527_v3  ;;  %v6029_v10 = vld [vmem:[#allocation2 + $0x50] sm:$0xff]  }
 0x30c   : > { %v2786_v21 = vpop.f32.mrf.mxu0  ;;  %v8102_v7 = vld [vmem:[#allocation9_spill] sm:$0xff] }
 0x30e   : > { %v2227_v13 = vpop.f32.mrf.mxu3 }
 0x30f   : > { %v2296_v14 = vadd.f32 %v2227_v13, %v1928_v17  ;;  %5114 = vmatmul.msk.bf16.gmra.mxu0 %vm1029_vm3, %v6800_v29 }
 0x310   : > { %v1531_v62 = vpop.f32.mrf.mxu1 }
 0x311   : > { %v7274_v9 = vadd.f32 %v2786_v21, %v2296_v14  ;;  %v1532_v29 = vadd.f32 %v1531_v62, %v8100_v34  ;;  %v6030_v21 = vld [vmem:[#allocation2 + $0x54] sm:$0xff]  }
 0x312   : > { %v1861_v45 = vpop.f32.mrf.mxu2  ;;  %v2877_v14 = vrot.slane %v6030_v21, 1 }
 0x313   : > { %v1929_v22 = vadd.f32 %v1861_v45, %v1529_v53  ;;  %5016 = vmatmul.msk.bf16.gmra.mxu1 %vm1029_vm3, %v2876_v63 }
 0x314   : > { %v2788_v35 = vpop.f32.mrf.mxu0 }
 0x316   : > { %v2229_v50 = vpop.f32.mrf.mxu3 }
 0x317   : > { %v2297_v3 = vadd.f32 %v2229_v50, %v1929_v22  ;;  %5049 = vmatmul.msk.bf16.gmra.mxu2 %vm1029_vm3, %v6029_v10  ;;  %v2878_v22 = vsel %vm1537_vm4, %v2875_v55, %v2877_v14 }
 0x318   : > { %v1533_v17 = vpop.f32.mrf.mxu1 }
 0x319   : > { %v7279_v13 = vadd.f32 %v2788_v35, %v2297_v3  ;;  %v8104_v17 = vld [vmem:[#allocation64_spill] sm:$0xff] }
 0x31a   : > { %v1864_v11 = vpop.f32.mrf.mxu2 }
 0x31b   : > { %8101 = vst [vmem:[#allocation23_spill] sm:$0xff] %v7279_v13  ;;  %5082 = vmatmul.msk.bf16.gmra.mxu3 %vm1029_vm3, %v8102_v7  ;;  %v1930_v27 = vadd.f32 %v1864_v11, %v1532_v29  ;;  %v6031_v7 = vld [vmem:[#allocation2 + $0x58] sm:$0xff]   ;;  %v8105_v11 = vld [vmem:[#allocation12_spill] sm:$0xff] }
 0x31c   : > { %v2791_v32 = vpop.f32.mrf.mxu0 }
 0x31e   : > { %v2232_v63 = vpop.f32.mrf.mxu3 }
 0x31f   : > { %v2298_v53 = vadd.f32 %v2232_v63, %v1930_v27  ;;  %5115 = vmatmul.msk.bf16.gmra.mxu0 %vm1029_vm3, %v6817_v47  ;;  %v6032_v27 = vld [vmem:[#allocation2 + $0x5c] sm:$0xff]  }
 0x320   : > { %v3031_v45 = vpop.f32.mrf.mxu1  ;;  %v2879_v55 = vrot.slane %v6032_v27, 1  ;;  %v6033_v27 = vld [vmem:[#allocation2 + $0x60] sm:$0xff]  }
 0x321   : > { %v7286_v50 = vadd.f32 %v2791_v32, %v2298_v53  ;;  %v3190_v34 = vadd.f32 %v3031_v45, %v8104_v17  ;;  %v7296_v53 = vld [vmem:[%s7918_s3] ss:$0 sm:$0xff] }
 0x322   : > { %v1866_v62 = vpop.f32.mrf.mxu2  ;;  %v2880_v45 = vsel %vm1537_vm4, %v2877_v14, %v2879_v55 }
 0x323   : > { %8103 = vst [vmem:[#allocation48_spill] sm:$0xff] %v7286_v50  ;;  %5017 = vmatmul.msk.bf16.gmra.mxu1 %vm1029_vm3, %v2878_v22 }
 0x324   : > { %v2793_v35 = vpop.f32.mrf.mxu0 }
 0x325   : > { %v7304_v35 = vld [vmem:[%s7919_s4] ss:$0 sm:$0xff] }
 0x326   : > { %v2234_v3 = vpop.f32.mrf.mxu3 }
 0x327   : > { %5050 = vmatmul.msk.bf16.gmra.mxu2 %vm1029_vm3, %v6031_v7 }
 0x328   : > { %v3033_v10 = vpop.f32.mrf.mxu1 }
 0x329   : > { %v3191_v3 = vadd.f32 %v3033_v10, %v6805_v24 }
 0x32a   : > { %v3285_v29 = vpop.f32.mrf.mxu2 }
 0x32b   : > { %5083 = vmatmul.msk.bf16.gmra.mxu3 %vm1029_vm3, %v8105_v11  ;;  %v3444_v47 = vadd.f32 %v3285_v29, %v3190_v34 }
 0x32c   : > { %v3812_v21 = vpop.f32.mrf.mxu0 }
 0x32e   : > { %v3558_v32 = vpop.f32.mrf.mxu3 }
 0x32f   : > { %v3717_v63 = vadd.f32 %v3558_v32, %v3444_v47  ;;  %5116 = vmatmul.msk.bf16.gmra.mxu0 %vm1029_vm3, %v6834_v40 }
 0x330   : > { %v3036_v22 = vpop.f32.mrf.mxu1 }
 0x331   : > { %v3971_v62 = vadd.f32 %v3812_v21, %v3717_v63  ;;  %v3192_v10 = vadd.f32 %v3036_v22, %v6812_v58 }
 0x332   : > { %v3287_v7 = vpop.f32.mrf.mxu2 }
 0x333   : > { %v4038_v17 = vmul.f32 %v7296_v53, %v3971_v62  ;;  %v3445_v34 = vadd.f32 %v3287_v7, %v3191_v3  ;;  %5018 = vmatmul.msk.bf16.gmra.mxu1 %vm1029_vm3, %v2880_v45  ;;  %v8106_v45 = vld [vmem:[#allocation16_spill] sm:$0xff] }
 0x334   : > { %v3814_v40 = vpop.f32.mrf.mxu0  ;;  %v6034_v7 = vld [vmem:[#allocation2 + $0x64] sm:$0xff]  }
 0x335   : > { %v7310_v29 = vadd.f32 %v7304_v35, %v4038_v17  ;;  %v2881_v17 = vrot.slane %v6034_v7, 1 }
 0x336   : > { %v3560_v11 = vpop.f32.mrf.mxu3 }
 0x337   : > { %v4168_v14 = vsub.f32 0.0, %v7310_v29  ;;  %v3718_v47 = vadd.f32 %v3560_v11, %v3445_v34  ;;  %5051 = vmatmul.msk.bf16.gmra.mxu2 %vm1029_vm3, %v6033_v27  ;;  %v2882_v22 = vsel %vm1537_vm4, %v2879_v55, %v2881_v17 }
 0x338   : > { %v3038_v21 = vpop.f32.mrf.mxu1 }
 0x339   : > { %v4231_v32 = vmul.f32 1.442695, %v4168_v14  ;;  %v3972_v24 = vadd.f32 %v3814_v40, %v3718_v47  ;;  %v3193_v47 = vadd.f32 %v3038_v21, %v6822_v1 }
 0x33a   : > { %v3290_v63 = vpop.f32.mrf.mxu2 }
 0x33b   : > { %v4039_v62 = vmul.f32 %v7296_v53, %v3972_v24  ;;  %5084 = vmatmul.msk.bf16.gmra.mxu3 %vm1029_vm3, %v8106_v45  ;;  %v3446_v3 = vadd.f32 %v3290_v63, %v3192_v10  ;;  %5743 = vpow2.f32 %v4231_v32 }
 0x33c   : > { %v3817_v11 = vpop.f32.mrf.mxu0 }
 0x33d   : > { %v4106_v34 = vadd.f32 %v7304_v35, %v4039_v62 }
 0x33e   : > { %v3563_v50 = vpop.f32.mrf.mxu3 }
 0x33f   : > { %v4169_v27 = vsub.f32 0.0, %v4106_v34  ;;  %v3719_v13 = vadd.f32 %v3563_v50, %v3446_v3  ;;  %5117 = vmatmul.msk.bf16.gmra.mxu0 %vm1029_vm3, %v6851_v61 }
 0x340   : > { %v3041_v58 = vpop.f32.mrf.mxu1 }
 0x341   : > { %v4233_v40 = vmul.f32 1.442695, %v4169_v27  ;;  %v3973_v14 = vadd.f32 %v3817_v11, %v3719_v13  ;;  %v5744_v24 = vpop.eup %5743  ;;  %v6035_v13 = vld [vmem:[#allocation2 + $0x68] sm:$0xff]   ;;  %v3194_v27 = vadd.f32 %v3041_v58, %v6829_v41 }
 0x342   : > { %v3292_v32 = vpop.f32.mrf.mxu2  ;;  %v4357_v62 = vadd.f32 1.0, %v5744_v24 }
 0x343   : > { %5745 = vpow2.f32 %v4233_v40  ;;  %v4040_v10 = vmul.f32 %v7296_v53, %v3973_v14  ;;  %v3447_v63 = vadd.f32 %v3292_v32, %v3193_v47  ;;  %5019 = vmatmul.msk.bf16.gmra.mxu1 %vm1029_vm3, %v2882_v22  ;;  %v8107_v47 = vld [vmem:[#allocation20_spill] sm:$0xff] }
 0x344   : > { %v3819_v61 = vpop.f32.mrf.mxu0  ;;  %5747 = vrcp.f32 %v4357_v62  ;;  %v6036_v32 = vld [vmem:[#allocation2 + $0x6c] sm:$0xff]  }
 0x345   : > { %v7326_v50 = vadd.f32 %v7304_v35, %v4040_v10  ;;  %v2883_v10 = vrot.slane %v6036_v32, 1 }
 0x346   : > { %v3565_v45 = vpop.f32.mrf.mxu3 }
 0x347   : > { %v4170_v55 = vsub.f32 0.0, %v7326_v50  ;;  %v3720_v3 = vadd.f32 %v3565_v45, %v3447_v63  ;;  %5052 = vmatmul.msk.bf16.gmra.mxu2 %vm1029_vm3, %v6035_v13 }
 0x348   : > { %v3043_v1 = vpop.f32.mrf.mxu1 }
 0x349   : > { %v5746_v21 = vpop.eup %5745  ;;  %v4235_v7 = vmul.f32 1.442695, %v4170_v55  ;;  %v3974_v11 = vadd.f32 %v3819_v61, %v3720_v3  ;;  %v2884_v3 = vsel %vm1537_vm4, %v2881_v17, %v2883_v10 }
 0x34a   : > { %v4358_v22 = vadd.f32 1.0, %v5746_v21  ;;  %v3295_v40 = vpop.f32.mrf.mxu2  ;;  %v5748_v45 = vpop.eup %5747 }
 0x34b   : > { %5749 = vpow2.f32 %v4235_v7  ;;  %v4041_v14 = vmul.f32 %v7296_v53, %v3974_v11  ;;  %5085 = vmatmul.msk.bf16.gmra.mxu3 %vm1029_vm3, %v8107_v47  ;;  %v3448_v24 = vadd.f32 %v3295_v40, %v3194_v27  ;;  %v3195_v11 = vadd.f32 %v3043_v1, %v6839_v42 }
 0x34c   : > { %5751 = vrcp.f32 %v4358_v22  ;;  %v3822_v62 = vpop.f32.mrf.mxu0  ;;  %v4483_v22 = vmul.f32 %v5748_v45, %v7310_v29 }
 0x34d   : > { %v7335_v63 = vadd.f32 %v7304_v35, %v4041_v14 }
 0x34e   : > { %v3568_v61 = vpop.f32.mrf.mxu3 }
 0x34f   : > { %v4171_v41 = vsub.f32 0.0, %v7335_v63  ;;  %v3721_v58 = vadd.f32 %v3568_v61, %v3448_v24  ;;  %5118 = vmatmul.msk.bf16.gmra.mxu0 %vm1029_vm3, %v6868_v15 }
 0x350   : > { %v3046_v55 = vpop.f32.mrf.mxu1 }
 0x351   : > { %v5750_v13 = vpop.eup %5749  ;;  %v4237_v21 = vmul.f32 1.442695, %v4171_v41  ;;  %v3975_v7 = vadd.f32 %v3822_v62, %v3721_v58  ;;  %v6037_v62 = vld [vmem:[#allocation2 + $0x70] sm:$0xff]  }
 0x352   : > { %v5752_v27 = vpop.eup %5751  ;;  %v3297_v40 = vpop.f32.mrf.mxu2  ;;  %v4359_v17 = vadd.f32 1.0, %v5750_v13 }
 0x353   : > { %v4484_v14 = vmul.f32 %v5752_v27, %v4106_v34  ;;  %5753 = vpow2.f32 %v4237_v21  ;;  %v4042_v47 = vmul.f32 %v7296_v53, %v3975_v7  ;;  %v3449_v24 = vadd.f32 %v3297_v40, %v3195_v11  ;;  %5020 = vmatmul.msk.bf16.gmra.mxu1 %vm1029_vm3, %v2884_v3  ;;  %v8108_v11 = vld [vmem:[#allocation24_spill] sm:$0xff] }
 0x354   : > { %v3824_v29 = vpop.f32.mrf.mxu0  ;;  %5755 = vrcp.f32 %v4359_v17  ;;  %v3196_v3 = vadd.f32 %v3046_v55, %v6846_v25 }
 0x355   : > { %v5284_v15 = vpack.c.bf16 %v4484_v14, %v4483_v22  ;;  %v7352_v42 = vadd.f32 %v7304_v35, %v4042_v47  ;;  %v6038_v22 = vld [vmem:[#allocation2 + $0x74] sm:$0xff]  }
 0x356   : > { %v3570_v1 = vpop.f32.mrf.mxu3  ;;  %v2885_v40 = vrot.slane %v6038_v22, 1 }
 0x357   : > { %5285 = vst [vmem:[%s7349_s8] sm:$0xff] %v5284_v15   ;;  %v4172_v34 = vsub.f32 0.0, %v7352_v42  ;;  %v3722_v32 = vadd.f32 %v3570_v1, %v3449_v24  ;;  %5053 = vmatmul.msk.bf16.gmra.mxu2 %vm1029_vm3, %v6037_v62 }
 0x358   : > { %v3048_v61 = vpop.f32.mrf.mxu1  ;;  %v2886_v55 = vsel %vm1537_vm4, %v2883_v10, %v2885_v40 }
 0x359   : > { %v5754_v45 = vpop.eup %5753  ;;  %v4239_v41 = vmul.f32 1.442695, %v4172_v34  ;;  %v3976_v58 = vadd.f32 %v3824_v29, %v3722_v32  ;;  %v3197_v62 = vadd.f32 %v3048_v61, %v6856_v20  ;;  %v6039_v61 = vld [vmem:[#allocation2 + $0x78] sm:$0xff]  }
 0x35a   : > { %v4360_v13 = vadd.f32 1.0, %v5754_v45  ;;  %v3300_v21 = vpop.f32.mrf.mxu2  ;;  %v5756_v15 = vpop.eup %5755 }
 0x35b   : > { %5757 = vpow2.f32 %v4239_v41  ;;  %v4043_v7 = vmul.f32 %v7296_v53, %v3976_v58  ;;  %5086 = vmatmul.msk.bf16.gmra.mxu3 %vm1029_vm3, %v8108_v11  ;;  %v3450_v27 = vadd.f32 %v3300_v21, %v3196_v3  ;;  %v4485_v41 = vmul.f32 %v5756_v15, %v7326_v50 }
 0x35c   : > { %5759 = vrcp.f32 %v4360_v13  ;;  %v3827_v47 = vpop.f32.mrf.mxu0 }
 0x35d   : > { %v4110_v14 = vadd.f32 %v7304_v35, %v4043_v7 }
 0x35e   : > { %v3573_v24 = vpop.f32.mrf.mxu3 }
 0x35f   : > { %v4173_v17 = vsub.f32 0.0, %v4110_v14  ;;  %v3723_v29 = vadd.f32 %v3573_v24, %v3450_v27  ;;  %5119 = vmatmul.msk.bf16.gmra.mxu0 %vm1029_vm3, %v6885_v31 }
 0x360   : > { %v3051_v25 = vpop.f32.mrf.mxu1 }
 0x361   : > { %v5758_v1 = vpop.eup %5757  ;;  %v4241_v34 = vmul.f32 1.442695, %v4173_v17  ;;  %v3977_v32 = vadd.f32 %v3827_v47, %v3723_v29  ;;  %v3198_v15 = vadd.f32 %v3051_v25, %v6863_v28 }
 0x362   : > { %v5760_v45 = vpop.eup %5759  ;;  %v3302_v58 = vpop.f32.mrf.mxu2  ;;  %v4361_v10 = vadd.f32 1.0, %v5758_v1  ;;  %v8109_v1 = vld [vmem:[#allocation28_spill] sm:$0xff] }
 0x363   : > { %v4486_v3 = vmul.f32 %v5760_v45, %v7335_v63  ;;  %5761 = vpow2.f32 %v4241_v34  ;;  %v4044_v13 = vmul.f32 %v7296_v53, %v3977_v32  ;;  %v3451_v21 = vadd.f32 %v3302_v58, %v3197_v62  ;;  %5021 = vmatmul.msk.bf16.gmra.mxu1 %vm1029_vm3, %v2886_v55  ;;  %v6040_v32 = vld [vmem:[#allocation2 + $0x7c] sm:$0xff]  }
 0x364   : > { %v3829_v11 = vpop.f32.mrf.mxu0  ;;  %5763 = vrcp.f32 %v4361_v10  ;;  %v2887_v62 = vrot.slane %v6040_v32, 1  ;;  %v8110_v32 = vld [vmem:[#allocation65_spill] sm:$0xff] }
 0x365   : > { %v5289_v31 = vpack.c.bf16 %v4486_v3, %v4485_v41  ;;  %v7371_v7 = vadd.f32 %v7304_v35, %v4044_v13 }
 0x366   : > { %v3575_v27 = vpop.f32.mrf.mxu3  ;;  %v2888_v25 = vsel %vm1537_vm4, %v2885_v40, %v2887_v62 }
 0x367   : > { %5615 = vst [vmem:[%s7349_s8 + $0x8] sm:$0xff] %v5289_v31   ;;  %v4174_v20 = vsub.f32 0.0, %v7371_v7  ;;  %v3724_v50 = vadd.f32 %v3575_v27, %v3451_v21  ;;  %5054 = vmatmul.msk.bf16.gmra.mxu2 %vm1029_vm3, %v6039_v61 }
 0x368   : > { %v3053_v63 = vpop.f32.mrf.mxu1 }
 0x369   : > { %v5762_v22 = vpop.eup %5761  ;;  %v4243_v47 = vmul.f32 1.442695, %v4174_v20  ;;  %v3978_v24 = vadd.f32 %v3829_v11, %v3724_v50  ;;  %v3199_v27 = vadd.f32 %v3053_v63, %v6873_v48 }
 0x36a   : > { %v4362_v17 = vadd.f32 1.0, %v5762_v22  ;;  %v3305_v29 = vpop.f32.mrf.mxu2  ;;  %v5764_v3 = vpop.eup %5763 }
 0x36b   : > { %5765 = vpow2.f32 %v4243_v47  ;;  %v4045_v55 = vmul.f32 %v7296_v53, %v3978_v24  ;;  %5087 = vmatmul.msk.bf16.gmra.mxu3 %vm1029_vm3, %v8109_v1  ;;  %v3452_v34 = vadd.f32 %v3305_v29, %v3198_v15  ;;  %v4487_v50 = vmul.f32 %v5764_v3, %v7352_v42  ;;  %v6041_v42 = vld [vmem:[#allocation2 + $0x80] sm:$0xff]  }
 0x36c   : > { %5767 = vrcp.f32 %v4362_v17  ;;  %v3832_v41 = vpop.f32.mrf.mxu0 }
 0x36d   : > { %v4112_v45 = vadd.f32 %v7304_v35, %v4045_v55 }
 0x36e   : > { %v3578_v58 = vpop.f32.mrf.mxu3 }
 0x36f   : > { %v4175_v13 = vsub.f32 0.0, %v4112_v45  ;;  %v3725_v21 = vadd.f32 %v3578_v58, %v3452_v34  ;;  %5120 = vmatmul.msk.bf16.gmra.mxu0 %vm1029_vm3, %v6901_v36 }
 0x370   : > { %v3056_v28 = vpop.f32.mrf.mxu1 }
 0x371   : > { %v5766_v31 = vpop.eup %5765  ;;  %v4245_v10 = vmul.f32 1.442695, %v4175_v13  ;;  %v3979_v11 = vadd.f32 %v3832_v41, %v3725_v21  ;;  %v3200_v41 = vadd.f32 %v3056_v28, %v8110_v32  ;;  %v8111_v21 = vld [vmem:[#allocation4_spill] sm:$0xff] }
 0x372   : > { %v5768_v20 = vpop.eup %5767  ;;  %v3307_v61 = vpop.f32.mrf.mxu2  ;;  %v4363_v15 = vadd.f32 1.0, %v5766_v31  ;;  %v6042_v31 = vld [vmem:[#allocation2 + $0x84] sm:$0xff]  }
 0x373   : > { %v4488_v22 = vmul.f32 %v5768_v20, %v4110_v14  ;;  %5769 = vpow2.f32 %v4245_v10  ;;  %v4046_v47 = vmul.f32 %v7296_v53, %v3979_v11  ;;  %v3453_v24 = vadd.f32 %v3307_v61, %v3199_v27  ;;  %5022 = vmatmul.msk.bf16.gmra.mxu1 %vm1029_vm3, %v2888_v25 }
 0x374   : > { %v3834_v17 = vpop.f32.mrf.mxu0  ;;  %5771 = vrcp.f32 %v4363_v15  ;;  %v2889_v10 = vrot.slane %v6042_v31, 1 }
 0x375   : > { %v5294_v36 = vpack.c.bf16 %v4488_v22, %v4487_v50  ;;  %v7389_v40 = vadd.f32 %v7304_v35, %v4046_v47 }
 0x376   : > { %v3580_v29 = vpop.f32.mrf.mxu3  ;;  %v2890_v47 = vsel %vm1537_vm4, %v2887_v62, %v2889_v10 }
 0x377   : > { %5616 = vst [vmem:[%s7349_s8 + $0x10] sm:$0xff] %v5294_v36   ;;  %v4176_v48 = vsub.f32 0.0, %v7389_v40  ;;  %v3726_v63 = vadd.f32 %v3580_v29, %v3453_v24  ;;  %5055 = vmatmul.msk.bf16.gmra.mxu2 %vm1029_vm3, %v6041_v42 }
 0x378   : > { %v3058_v14 = vpop.f32.mrf.mxu1 }
 0x379   : > { %v5770_v55 = vpop.eup %5769  ;;  %v4247_v1 = vmul.f32 1.442695, %v4176_v48  ;;  %v3980_v34 = vadd.f32 %v3834_v17, %v3726_v63  ;;  %v3201_v17 = vadd.f32 %v3058_v14, %v6890_v54 }
 0x37a   : > { %v4364_v58 = vadd.f32 1.0, %v5770_v55  ;;  %v3310_v3 = vpop.f32.mrf.mxu2  ;;  %v5772_v50 = vpop.eup %5771 }
 0x37b   : > { %5773 = vpow2.f32 %v4247_v1  ;;  %v4047_v13 = vmul.f32 %v7296_v53, %v3980_v34  ;;  %5088 = vmatmul.msk.bf16.gmra.mxu3 %vm1029_vm3, %v8111_v21  ;;  %v3454_v25 = vadd.f32 %v3310_v3, %v3200_v41  ;;  %v4489_v48 = vmul.f32 %v5772_v50, %v7371_v7  ;;  %v6043_v7 = vld [vmem:[#allocation2 + $0x88] sm:$0xff]   ;;  %v8112_v21 = vld [vmem:[#allocation66_spill] sm:$0xff]  ;;  %v8113_v50 = vld [vmem:[#allocation7_spill] sm:$0xff] }
 0x37c   : > { %5775 = vrcp.f32 %v4364_v58  ;;  %v3837_v27 = vpop.f32.mrf.mxu0 }
 0x37d   : > { %v4114_v11 = vadd.f32 %v7304_v35, %v4047_v13 }
 0x37e   : > { %v3583_v20 = vpop.f32.mrf.mxu3 }
 0x37f   : > { %v4177_v61 = vsub.f32 0.0, %v4114_v11  ;;  %v3727_v22 = vadd.f32 %v3583_v20, %v3454_v25  ;;  %5121 = vmatmul.msk.bf16.gmra.mxu0 %vm1029_vm3, %v6916_v23 }
 0x380   : > { %v3061_v28 = vpop.f32.mrf.mxu1 }
 0x381   : > { %v5774_v24 = vpop.eup %5773  ;;  %v4249_v36 = vmul.f32 1.442695, %v4177_v61  ;;  %v3981_v15 = vadd.f32 %v3837_v27, %v3727_v22  ;;  %v3202_v25 = vadd.f32 %v3061_v28, %v8112_v21  ;;  %v6044_v22 = vld [vmem:[#allocation2 + $0x8c] sm:$0xff]  }
 0x382   : > { %v5776_v29 = vpop.eup %5775  ;;  %v3312_v63 = vpop.f32.mrf.mxu2  ;;  %v4365_v34 = vadd.f32 1.0, %v5774_v24 }
 0x383   : > { %v4490_v42 = vmul.f32 %v5776_v29, %v4112_v45  ;;  %5777 = vpow2.f32 %v4249_v36  ;;  %v4048_v55 = vmul.f32 %v7296_v53, %v3981_v15  ;;  %v3455_v1 = vadd.f32 %v3312_v63, %v3201_v17  ;;  %5023 = vmatmul.msk.bf16.gmra.mxu1 %vm1029_vm3, %v2890_v47 }
 0x384   : > { %v3839_v32 = vpop.f32.mrf.mxu0  ;;  %5779 = vrcp.f32 %v4365_v34  ;;  %v2891_v47 = vrot.slane %v6044_v22, 1 }
 0x385   : > { %v5299_v23 = vpack.c.bf16 %v4490_v42, %v4489_v48  ;;  %v7407_v62 = vadd.f32 %v7304_v35, %v4048_v55 }
 0x386   : > { %v3585_v41 = vpop.f32.mrf.mxu3  ;;  %v2892_v63 = vsel %vm1537_vm4, %v2889_v10, %v2891_v47 }
 0x387   : > { %5617 = vst [vmem:[%s7349_s8 + $0x18] sm:$0xff] %v5299_v23   ;;  %v4178_v54 = vsub.f32 0.0, %v7407_v62  ;;  %v3728_v14 = vadd.f32 %v3585_v41, %v3455_v1  ;;  %5056 = vmatmul.msk.bf16.gmra.mxu2 %vm1029_vm3, %v6043_v7 }
 0x388   : > { %v3063_v45 = vpop.f32.mrf.mxu1 }
 0x389   : > { %v5778_v58 = vpop.eup %5777  ;;  %v4251_v3 = vmul.f32 1.442695, %v4178_v54  ;;  %v3982_v13 = vadd.f32 %v3839_v32, %v3728_v14  ;;  %v3203_v23 = vadd.f32 %v3063_v45, %v6906_v43 }
 0x38a   : > { %v4366_v31 = vadd.f32 1.0, %v5778_v58  ;;  %v3315_v27 = vpop.f32.mrf.mxu2  ;;  %v5780_v17 = vpop.eup %5779 }
 0x38b   : > { %5781 = vpow2.f32 %v4251_v3  ;;  %v4049_v20 = vmul.f32 %v7296_v53, %v3982_v13  ;;  %5089 = vmatmul.msk.bf16.gmra.mxu3 %vm1029_vm3, %v8113_v50  ;;  %v3456_v61 = vadd.f32 %v3315_v27, %v3202_v25  ;;  %v4491_v32 = vmul.f32 %v5780_v17, %v7389_v40  ;;  %v6045_v40 = vld [vmem:[#allocation2 + $0x90] sm:$0xff]   ;;  %v8114_v27 = vld [vmem:[#allocation67_spill] sm:$0xff] }
 0x38c   : > { %5783 = vrcp.f32 %v4366_v31  ;;  %v3842_v36 = vpop.f32.mrf.mxu0  ;;  %v6046_v17 = vld [vmem:[#allocation2 + $0x94] sm:$0xff]  }
 0x38d   : > { %v4116_v24 = vadd.f32 %v7304_v35, %v4049_v20 }
 0x38e   : > { %v3588_v15 = vpop.f32.mrf.mxu3 }
 0x38f   : > { %v4179_v29 = vsub.f32 0.0, %v4116_v24  ;;  %v3729_v48 = vadd.f32 %v3588_v15, %v3456_v61  ;;  %5122 = vmatmul.msk.bf16.gmra.mxu0 %vm1029_vm3, %v6931_v26 }
 0x390   : > { %v3066_v28 = vpop.f32.mrf.mxu1 }
 0x391   : > { %v5782_v42 = vpop.eup %5781  ;;  %v4253_v55 = vmul.f32 1.442695, %v4179_v29  ;;  %v3983_v1 = vadd.f32 %v3842_v36, %v3729_v48  ;;  %v3204_v20 = vadd.f32 %v3066_v28, %v8114_v27  ;;  %v8115_v36 = vld [vmem:[#allocation10_spill] sm:$0xff]  ;;  %v2893_v29 = vrot.slane %v6046_v17, 1 }
 0x392   : > { %v5784_v34 = vpop.eup %5783  ;;  %v3317_v41 = vpop.f32.mrf.mxu2  ;;  %v4367_v58 = vadd.f32 1.0, %v5782_v42 }
 0x393   : > { %v4492_v54 = vmul.f32 %v5784_v34, %v4114_v11  ;;  %5785 = vpow2.f32 %v4253_v55  ;;  %v4050_v14 = vmul.f32 %v7296_v53, %v3983_v1  ;;  %v3457_v7 = vadd.f32 %v3317_v41, %v3203_v23  ;;  %5024 = vmatmul.msk.bf16.gmra.mxu1 %vm1029_vm3, %v2892_v63 }
 0x394   : > { %v3844_v3 = vpop.f32.mrf.mxu0  ;;  %5787 = vrcp.f32 %v4367_v58  ;;  %v2894_v34 = vsel %vm1537_vm4, %v2891_v47, %v2893_v29 }
 0x395   : > { %v5304_v26 = vpack.c.bf16 %v4492_v54, %v4491_v32  ;;  %v7425_v10 = vadd.f32 %v7304_v35, %v4050_v14 }
 0x396   : > { %v3590_v13 = vpop.f32.mrf.mxu3 }
 0x397   : > { %5618 = vst [vmem:[%s7349_s8 + $0x20] sm:$0xff] %v5304_v26   ;;  %v4180_v43 = vsub.f32 0.0, %v7425_v10  ;;  %v3730_v45 = vadd.f32 %v3590_v13, %v3457_v7  ;;  %5057 = vmatmul.msk.bf16.gmra.mxu2 %vm1029_vm3, %v6045_v40 }
 0x398   : > { %v3068_v11 = vpop.f32.mrf.mxu1 }
 0x399   : > { %v5786_v21 = vpop.eup %5785  ;;  %v4255_v25 = vmul.f32 1.442695, %v4180_v43  ;;  %v3984_v31 = vadd.f32 %v3844_v3, %v3730_v45  ;;  %v3205_v14 = vadd.f32 %v3068_v11, %v6921_v5 }
 0x39a   : > { %v4368_v50 = vadd.f32 1.0, %v5786_v21  ;;  %v3320_v61 = vpop.f32.mrf.mxu2  ;;  %v5788_v55 = vpop.eup %5787 }
 0x39b   : > { %5789 = vpow2.f32 %v4255_v25  ;;  %v4051_v22 = vmul.f32 %v7296_v53, %v3984_v31  ;;  %5090 = vmatmul.msk.bf16.gmra.mxu3 %vm1029_vm3, %v8115_v36  ;;  %v3458_v15 = vadd.f32 %v3320_v61, %v3204_v20  ;;  %v4493_v26 = vmul.f32 %v5788_v55, %v7407_v62  ;;  %v6047_v62 = vld [vmem:[#allocation2 + $0x98] sm:$0xff]   ;;  %v8116_v20 = vld [vmem:[#allocation68_spill] sm:$0xff] }
 0x39c   : > { %5791 = vrcp.f32 %v4368_v50  ;;  %v3847_v63 = vpop.f32.mrf.mxu0 }
 0x39d   : > { %v4118_v48 = vadd.f32 %v7304_v35, %v4051_v22 }
 0x39e   : > { %v3593_v42 = vpop.f32.mrf.mxu3 }
 0x39f   : > { %v4181_v1 = vsub.f32 0.0, %v4118_v48  ;;  %v3731_v23 = vadd.f32 %v3593_v42, %v3458_v15  ;;  %5123 = vmatmul.msk.bf16.gmra.mxu0 %vm1029_vm3, %v6946_v39  ;;  %v8117_v15 = vld [vmem:[#allocation13_spill] sm:$0xff] }
 0x3a0   : > { %v3071_v28 = vpop.f32.mrf.mxu1 }
 0x3a1   : > { %v5790_v32 = vpop.eup %5789  ;;  %v4257_v41 = vmul.f32 1.442695, %v4181_v1  ;;  %v3985_v54 = vadd.f32 %v3847_v63, %v3731_v23  ;;  %v3206_v50 = vadd.f32 %v3071_v28, %v8116_v20  ;;  %v6048_v63 = vld [vmem:[#allocation2 + $0x9c] sm:$0xff]  }
 0x3a2   : > { %v5792_v7 = vpop.eup %5791  ;;  %v3322_v58 = vpop.f32.mrf.mxu2  ;;  %v4369_v45 = vadd.f32 1.0, %v5790_v32  ;;  %v2895_v42 = vrot.slane %v6048_v63, 1 }
 0x3a3   : > { %v4494_v3 = vmul.f32 %v5792_v7, %v4116_v24  ;;  %5793 = vpow2.f32 %v4257_v41  ;;  %v4052_v13 = vmul.f32 %v7296_v53, %v3985_v54  ;;  %v3459_v43 = vadd.f32 %v3322_v58, %v3205_v14  ;;  %5025 = vmatmul.msk.bf16.gmra.mxu1 %vm1029_vm3, %v2894_v34 }
 0x3a4   : > { %v3849_v40 = vpop.f32.mrf.mxu0  ;;  %5795 = vrcp.f32 %v4369_v45  ;;  %v2896_v54 = vsel %vm1537_vm4, %v2893_v29, %v2895_v42 }
 0x3a5   : > { %v5309_v39 = vpack.c.bf16 %v4494_v3, %v4493_v26  ;;  %v7443_v47 = vadd.f32 %v7304_v35, %v4052_v13 }
 0x3a6   : > { %v3595_v21 = vpop.f32.mrf.mxu3 }
 0x3a7   : > { %5619 = vst [vmem:[%s7349_s8 + $0x28] sm:$0xff] %v5309_v39   ;;  %v4182_v5 = vsub.f32 0.0, %v7443_v47  ;;  %v3732_v11 = vadd.f32 %v3595_v21, %v3459_v43  ;;  %5058 = vmatmul.msk.bf16.gmra.mxu2 %vm1029_vm3, %v6047_v62 }
 0x3a8   : > { %v3073_v24 = vpop.f32.mrf.mxu1 }
 0x3a9   : > { %v5794_v25 = vpop.eup %5793  ;;  %v4259_v31 = vmul.f32 1.442695, %v4182_v5  ;;  %v3986_v27 = vadd.f32 %v3849_v40, %v3732_v11  ;;  %v3207_v58 = vadd.f32 %v3073_v24, %v6936_v19 }
 0x3aa   : > { %v4370_v61 = vadd.f32 1.0, %v5794_v25  ;;  %v3325_v22 = vpop.f32.mrf.mxu2  ;;  %v5796_v34 = vpop.eup %5795 }
 0x3ab   : > { %5797 = vpow2.f32 %v4259_v31  ;;  %v4053_v36 = vmul.f32 %v7296_v53, %v3986_v27  ;;  %5091 = vmatmul.msk.bf16.gmra.mxu3 %vm1029_vm3, %v8117_v15  ;;  %v3460_v17 = vadd.f32 %v3325_v22, %v3206_v50  ;;  %v4495_v13 = vmul.f32 %v5796_v34, %v7425_v10  ;;  %v6049_v10 = vld [vmem:[#allocation2 + $0xa0] sm:$0xff]   ;;  %v8118_v27 = vld [vmem:[#allocation69_spill] sm:$0xff] }
 0x3ac   : > { %5799 = vrcp.f32 %v4370_v61  ;;  %v3852_v1 = vpop.f32.mrf.mxu0 }
 0x3ad   : > { %v4120_v55 = vadd.f32 %v7304_v35, %v4053_v36  ;;  %v8119_v36 = vld [vmem:[#allocation17_spill] sm:$0xff] }
 0x3ae   : > { %v3598_v23 = vpop.f32.mrf.mxu3 }
 0x3af   : > { %v4183_v32 = vsub.f32 0.0, %v4120_v55  ;;  %v3733_v41 = vadd.f32 %v3598_v23, %v3460_v17  ;;  %5124 = vmatmul.msk.bf16.gmra.mxu0 %vm1029_vm3, %v6961_v8  ;;  %v6050_v17 = vld [vmem:[#allocation2 + $0xa4] sm:$0xff]  }
 0x3b0   : > { %v3076_v28 = vpop.f32.mrf.mxu1  ;;  %v2897_v63 = vrot.slane %v6050_v17, 1 }
 0x3b1   : > { %v5798_v14 = vpop.eup %5797  ;;  %v4261_v7 = vmul.f32 1.442695, %v4183_v32  ;;  %v3987_v26 = vadd.f32 %v3852_v1, %v3733_v41  ;;  %v3208_v20 = vadd.f32 %v3076_v28, %v8118_v27 }
 0x3b2   : > { %v5800_v3 = vpop.eup %5799  ;;  %v3327_v43 = vpop.f32.mrf.mxu2  ;;  %v4371_v21 = vadd.f32 1.0, %v5798_v14  ;;  %v2898_v14 = vsel %vm1537_vm4, %v2895_v42, %v2897_v63 }
 0x3b3   : > { %v4496_v39 = vmul.f32 %v5800_v3, %v4118_v48  ;;  %5801 = vpow2.f32 %v4261_v7  ;;  %v4054_v45 = vmul.f32 %v7296_v53, %v3987_v26  ;;  %v3461_v40 = vadd.f32 %v3327_v43, %v3207_v58  ;;  %5026 = vmatmul.msk.bf16.gmra.mxu1 %vm1029_vm3, %v2896_v54 }
 0x3b4   : > { %v3854_v5 = vpop.f32.mrf.mxu0  ;;  %5803 = vrcp.f32 %v4371_v21 }
 0x3b5   : > { %v5314_v8 = vpack.c.bf16 %v4496_v39, %v4495_v13  ;;  %v7461_v29 = vadd.f32 %v7304_v35, %v4054_v45 }
 0x3b6   : > { %v3600_v11 = vpop.f32.mrf.mxu3 }
 0x3b7   : > { %5620 = vst [vmem:[%s7349_s8 + $0x30] sm:$0xff] %v5314_v8   ;;  %v4184_v19 = vsub.f32 0.0, %v7461_v29  ;;  %v3734_v62 = vadd.f32 %v3600_v11, %v3461_v40  ;;  %5059 = vmatmul.msk.bf16.gmra.mxu2 %vm1029_vm3, %v6049_v10 }
 0x3b8   : > { %v3078_v48 = vpop.f32.mrf.mxu1 }
 0x3b9   : > { %v5802_v24 = vpop.eup %5801  ;;  %v4263_v25 = vmul.f32 1.442695, %v4184_v19  ;;  %v3988_v31 = vadd.f32 %v3854_v5, %v3734_v62  ;;  %v3209_v3 = vadd.f32 %v3078_v48, %v6951_v56 }
 0x3ba   : > { %v4372_v50 = vadd.f32 1.0, %v5802_v24  ;;  %v3330_v61 = vpop.f32.mrf.mxu2  ;;  %v5804_v32 = vpop.eup %5803  ;;  %v8120_v24 = vld [vmem:[#allocation70_spill] sm:$0xff] }
 0x3bb   : > { %5805 = vpow2.f32 %v4263_v25  ;;  %v4055_v22 = vmul.f32 %v7296_v53, %v3988_v31  ;;  %5092 = vmatmul.msk.bf16.gmra.mxu3 %vm1029_vm3, %v8119_v36  ;;  %v3462_v15 = vadd.f32 %v3330_v61, %v3208_v20  ;;  %v4497_v43 = vmul.f32 %v5804_v32, %v7443_v47  ;;  %v6051_v47 = vld [vmem:[#allocation2 + $0xa8] sm:$0xff]  }
 0x3bc   : > { %5807 = vrcp.f32 %v4372_v50  ;;  %v3857_v23 = vpop.f32.mrf.mxu0  ;;  %v8121_v50 = vld [vmem:[#allocation21_spill] sm:$0xff] }
 0x3bd   : > { %v4122_v1 = vadd.f32 %v7304_v35, %v4055_v22  ;;  %v6052_v22 = vld [vmem:[#allocation2 + $0xac] sm:$0xff]  }
 0x3be   : > { %v3603_v34 = vpop.f32.mrf.mxu3  ;;  %v2899_v36 = vrot.slane %v6052_v22, 1 }
 0x3bf   : > { %v4185_v41 = vsub.f32 0.0, %v4122_v1  ;;  %v3735_v54 = vadd.f32 %v3603_v34, %v3462_v15  ;;  %5125 = vmatmul.msk.bf16.gmra.mxu0 %vm1029_vm3, %v6976_v44 }
 0x3c0   : > { %v3081_v28 = vpop.f32.mrf.mxu1 }
 0x3c1   : > { %v5806_v7 = vpop.eup %5805  ;;  %v4265_v26 = vmul.f32 1.442695, %v4185_v41  ;;  %v3989_v58 = vadd.f32 %v3857_v23, %v3735_v54  ;;  %v3210_v25 = vadd.f32 %v3081_v28, %v8120_v24  ;;  %v2900_v28 = vsel %vm1537_vm4, %v2897_v63, %v2899_v36  ;;  %v8123_v24 = vld [vmem:[#allocation25_spill] sm:$0xff] }
 0x3c2   : > { %v5808_v13 = vpop.eup %5807  ;;  %v3332_v39 = vpop.f32.mrf.mxu2  ;;  %v4373_v21 = vadd.f32 1.0, %v5806_v7 }
 0x3c3   : > { %v4498_v45 = vmul.f32 %v5808_v13, %v4120_v55  ;;  %5809 = vpow2.f32 %v4265_v26  ;;  %v4056_v40 = vmul.f32 %v7296_v53, %v3989_v58  ;;  %v3463_v8 = vadd.f32 %v3332_v39, %v3209_v3  ;;  %5027 = vmatmul.msk.bf16.gmra.mxu1 %vm1029_vm3, %v2898_v14 }
 0x3c4   : > { %v3859_v5 = vpop.f32.mrf.mxu0  ;;  %5811 = vrcp.f32 %v4373_v21 }
 0x3c5   : > { %v5319_v44 = vpack.c.bf16 %v4498_v45, %v4497_v43  ;;  %v7479_v42 = vadd.f32 %v7304_v35, %v4056_v40 }
 0x3c6   : > { %v3605_v11 = vpop.f32.mrf.mxu3 }
 0x3c7   : > { %5621 = vst [vmem:[%s7349_s8 + $0x38] sm:$0xff] %v5319_v44   ;;  %v4186_v56 = vsub.f32 0.0, %v7479_v42  ;;  %v3736_v19 = vadd.f32 %v3605_v11, %v3463_v8  ;;  %5060 = vmatmul.msk.bf16.gmra.mxu2 %vm1029_vm3, %v6051_v47  ;;  %v8122_v47 = vld [vmem:[#allocation71_spill] sm:$0xff] }
 0x3c8   : > { %v3083_v55 = vpop.f32.mrf.mxu1 }
 0x3c9   : > { %v5810_v62 = vpop.eup %5809  ;;  %v4267_v10 = vmul.f32 1.442695, %v4186_v56  ;;  %v3990_v48 = vadd.f32 %v3859_v5, %v3736_v19  ;;  %v3211_v58 = vadd.f32 %v3083_v55, %v6966_v16 }
 0x3ca   : > { %v4374_v31 = vadd.f32 1.0, %v5810_v62  ;;  %v3335_v27 = vpop.f32.mrf.mxu2  ;;  %v5812_v34 = vpop.eup %5811 }
 0x3cb   : > { %5813 = vpow2.f32 %v4267_v10  ;;  %v4057_v20 = vmul.f32 %v7296_v53, %v3990_v48  ;;  %5093 = vmatmul.msk.bf16.gmra.mxu3 %vm1029_vm3, %v8121_v50  ;;  %v3464_v61 = vadd.f32 %v3335_v27, %v3210_v25  ;;  %v4499_v13 = vmul.f32 %v5812_v34, %v7461_v29  ;;  %v6053_v29 = vld [vmem:[#allocation2 + $0xb0] sm:$0xff]  }
 0x3cc   : > { %5815 = vrcp.f32 %v4374_v31  ;;  %v3862_v17 = vpop.f32.mrf.mxu0  ;;  %v6054_v31 = vld [vmem:[#allocation2 + $0xb4] sm:$0xff]  }
 0x3cd   : > { %v4124_v15 = vadd.f32 %v7304_v35, %v4057_v20  ;;  %v2901_v27 = vrot.slane %v6054_v31, 1 }
 0x3ce   : > { %v3608_v23 = vpop.f32.mrf.mxu3 }
 0x3cf   : > { %v4187_v32 = vsub.f32 0.0, %v4124_v15  ;;  %v3737_v41 = vadd.f32 %v3608_v23, %v3464_v61  ;;  %5126 = vmatmul.msk.bf16.gmra.mxu0 %vm1029_vm3, %v6991_v18 }
 0x3d0   : > { %v3086_v54 = vpop.f32.mrf.mxu1 }
 0x3d1   : > { %v5814_v14 = vpop.eup %5813  ;;  %v4269_v7 = vmul.f32 1.442695, %v4187_v32  ;;  %v3991_v26 = vadd.f32 %v3862_v17, %v3737_v41  ;;  %v3212_v55 = vadd.f32 %v3086_v54, %v8122_v47  ;;  %v2902_v32 = vsel %vm1537_vm4, %v2899_v36, %v2901_v27  ;;  %v6056_v47 = vld [vmem:[#allocation2 + $0xbc] sm:$0xff]  }
 0x3d2   : > { %v5816_v3 = vpop.eup %5815  ;;  %v3337_v43 = vpop.f32.mrf.mxu2  ;;  %v4375_v8 = vadd.f32 1.0, %v5814_v14 }
 0x3d3   : > { %v4500_v39 = vmul.f32 %v5816_v3, %v4122_v1  ;;  %5817 = vpow2.f32 %v4269_v7  ;;  %v4058_v45 = vmul.f32 %v7296_v53, %v3991_v26  ;;  %v3465_v40 = vadd.f32 %v3337_v43, %v3211_v58  ;;  %5028 = vmatmul.msk.bf16.gmra.mxu1 %vm1029_vm3, %v2900_v28 }
 0x3d4   : > { %v3864_v44 = vpop.f32.mrf.mxu0  ;;  %5819 = vrcp.f32 %v4375_v8 }
 0x3d5   : > { %v5324_v18 = vpack.c.bf16 %v4500_v39, %v4499_v13  ;;  %v7497_v63 = vadd.f32 %v7304_v35, %v4058_v45 }
 0x3d6   : > { %v3610_v21 = vpop.f32.mrf.mxu3 }
 0x3d7   : > { %5622 = vst [vmem:[%s7349_s8 + $0x40] sm:$0xff] %v5324_v18   ;;  %v4188_v16 = vsub.f32 0.0, %v7497_v63  ;;  %v3738_v5 = vadd.f32 %v3610_v21, %v3465_v40  ;;  %5061 = vmatmul.msk.bf16.gmra.mxu2 %vm1029_vm3, %v6053_v29 }
 0x3d8   : > { %v3088_v1 = vpop.f32.mrf.mxu1 }
 0x3d9   : > { %v5818_v11 = vpop.eup %5817  ;;  %v4271_v56 = vmul.f32 1.442695, %v4188_v16  ;;  %v3992_v19 = vadd.f32 %v3864_v44, %v3738_v5  ;;  %v3213_v14 = vadd.f32 %v3088_v1, %v6981_v12  ;;  %v8124_v16 = vld [vmem:[#allocation72_spill] sm:$0xff] }
 0x3da   : > { %v4376_v62 = vadd.f32 1.0, %v5818_v11  ;;  %v3340_v10 = vpop.f32.mrf.mxu2  ;;  %v5820_v22 = vpop.eup %5819 }
 0x3db   : > { %5821 = vpow2.f32 %v4271_v56  ;;  %v4059_v48 = vmul.f32 %v7296_v53, %v3992_v19  ;;  %5094 = vmatmul.msk.bf16.gmra.mxu3 %vm1029_vm3, %v8123_v24  ;;  %v3466_v25 = vadd.f32 %v3340_v10, %v3212_v55  ;;  %v4501_v26 = vmul.f32 %v5820_v22, %v7479_v42  ;;  %v6055_v42 = vld [vmem:[#allocation2 + $0xb8] sm:$0xff]   ;;  %v8125_v56 = vld [vmem:[#allocation29_spill] sm:$0xff] }
 0x3dc   : > { %5823 = vrcp.f32 %v4376_v62  ;;  %v3867_v50 = vpop.f32.mrf.mxu0  ;;  %v2903_v55 = vrot.slane %v6056_v47, 1 }
 0x3dd   : > { %v4126_v20 = vadd.f32 %v7304_v35, %v4059_v48 }
 0x3de   : > { %v3613_v61 = vpop.f32.mrf.mxu3 }
 0x3df   : > { %v4189_v17 = vsub.f32 0.0, %v4126_v20  ;;  %v3739_v23 = vadd.f32 %v3613_v61, %v3466_v25  ;;  %5127 = vmatmul.msk.bf16.gmra.mxu0 %vm1029_vm3, %v7006_v4 }
 0x3e0   : > { %v3091_v34 = vpop.f32.mrf.mxu1 }
 0x3e1   : > { %v5822_v41 = vpop.eup %5821  ;;  %v4273_v54 = vmul.f32 1.442695, %v4189_v17  ;;  %v3993_v28 = vadd.f32 %v3867_v50, %v3739_v23  ;;  %v3214_v5 = vadd.f32 %v3091_v34, %v8124_v16  ;;  %v2904_v50 = vsel %vm1537_vm4, %v2901_v27, %v2903_v55 }
 0x3e2   : > { %v5824_v7 = vpop.eup %5823  ;;  %v3342_v58 = vpop.f32.mrf.mxu2  ;;  %v4377_v39 = vadd.f32 1.0, %v5822_v41 }
 0x3e3   : > { %v4502_v3 = vmul.f32 %v5824_v7, %v4124_v15  ;;  %5825 = vpow2.f32 %v4273_v54  ;;  %v4060_v13 = vmul.f32 %v7296_v53, %v3993_v28  ;;  %v3467_v43 = vadd.f32 %v3342_v58, %v3213_v14  ;;  %5029 = vmatmul.msk.bf16.gmra.mxu1 %vm1029_vm3, %v2902_v32  ;;  %v7536_v54 = vld [vmem:[%s7918_s3] ss:$0 sm:$0xff] }
 0x3e4   : > { %v3869_v45 = vpop.f32.mrf.mxu0  ;;  %5827 = vrcp.f32 %v4377_v39 }
 0x3e5   : > { %v5329_v4 = vpack.c.bf16 %v4502_v3, %v4501_v26  ;;  %v7515_v36 = vadd.f32 %v7304_v35, %v4060_v13  ;;  %v6059_v3 = vld [vmem:[#allocation2 + $0xc0] sm:$0xff]  }
 0x3e6   : > { %v3615_v40 = vpop.f32.mrf.mxu3 }
 0x3e7   : > { %5623 = vst [vmem:[%s7349_s8 + $0x48] sm:$0xff] %v5329_v4   ;;  %v4190_v12 = vsub.f32 0.0, %v7515_v36  ;;  %v3740_v18 = vadd.f32 %v3615_v40, %v3467_v43  ;;  %5062 = vmatmul.msk.bf16.gmra.mxu2 %vm1029_vm3, %v6055_v42 }
 0x3e8   : > { %v3093_v15 = vpop.f32.mrf.mxu1 }
 0x3e9   : > { %v5826_v8 = vpop.eup %5825  ;;  %v4275_v44 = vmul.f32 1.442695, %v4190_v12  ;;  %v3994_v21 = vadd.f32 %v3869_v45, %v3740_v18  ;;  %v3215_v23 = vadd.f32 %v3093_v15, %v6996_v57  ;;  %v7543_v57 = vld [vmem:[%s7919_s4] ss:$0 sm:$0xff]  ;;  %v8126_v45 = vld [vmem:[#allocation73_spill] sm:$0xff] }
 0x3ea   : > { %v4378_v29 = vadd.f32 1.0, %v5826_v8  ;;  %v3345_v1 = vpop.f32.mrf.mxu2  ;;  %v5828_v24 = vpop.eup %5827  ;;  %v8127_v15 = vld [vmem:[#allocation5_spill] sm:$0xff] }
 0x3eb   : > { %5829 = vpow2.f32 %v4275_v44  ;;  %v4061_v11 = vmul.f32 %v7296_v53, %v3994_v21  ;;  %5095 = vmatmul.msk.bf16.gmra.mxu3 %vm1029_vm3, %v8125_v56  ;;  %v3468_v19 = vadd.f32 %v3345_v1, %v3214_v5  ;;  %v4503_v34 = vmul.f32 %v5828_v24, %v7497_v63  ;;  %v6060_v44 = vld [vmem:[#allocation2 + $0xc4] sm:$0xff]  }
 0x3ec   : > { %5831 = vrcp.f32 %v4378_v29  ;;  %v3872_v10 = vpop.f32.mrf.mxu0  ;;  %v2905_v21 = vrot.slane %v6060_v44, 1 }
 0x3ed   : > { %v7525_v62 = vadd.f32 %v7304_v35, %v4061_v11 }
 0x3ee   : > { %v3618_v48 = vpop.f32.mrf.mxu3  ;;  %v2906_v47 = vsel %vm1537_vm4, %v2903_v55, %v2905_v21 }
 0x3ef   : > { %v4191_v25 = vsub.f32 0.0, %v7525_v62  ;;  %v3741_v31 = vadd.f32 %v3618_v48, %v3468_v19  ;;  %5128 = vmatmul.msk.bf16.gmra.mxu0 %vm1029_vm3, %v7021_v51 }
 0x3f0   : > { %v3096_v53 = vpop.f32.mrf.mxu1 }
 0x3f1   : > { %v5830_v61 = vpop.eup %5829  ;;  %v4277_v22 = vmul.f32 1.442695, %v4191_v25  ;;  %v3995_v17 = vadd.f32 %v3872_v10, %v3741_v31  ;;  %v3216_v40 = vadd.f32 %v3096_v53, %v8126_v45 }
 0x3f2   : > { %v5832_v35 = vpop.eup %5831  ;;  %v3347_v32 = vpop.f32.mrf.mxu2  ;;  %v4379_v14 = vadd.f32 1.0, %v5830_v61 }
 0x3f3   : > { %v4504_v41 = vmul.f32 %v5832_v35, %v4126_v20  ;;  %5833 = vpow2.f32 %v4277_v22  ;;  %v4062_v51 = vmul.f32 %v7536_v54, %v3995_v17  ;;  %v3469_v27 = vadd.f32 %v3347_v32, %v3215_v23  ;;  %5030 = vmatmul.msk.bf16.gmra.mxu1 %vm1029_vm3, %v2904_v50  ;;  %v6061_v32 = vld [vmem:[#allocation2 + $0xc8] sm:$0xff]  }
 0x3f4   : > { %v3874_v20 = vpop.f32.mrf.mxu0  ;;  %5835 = vrcp.f32 %v4379_v14 }
 0x3f5   : > { %v5334_v28 = vpack.c.bf16 %v4504_v41, %v4503_v34  ;;  %v7546_v63 = vadd.f32 %v7543_v57, %v4062_v51 }
 0x3f6   : > { %v3620_v7 = vpop.f32.mrf.mxu3 }
 0x3f7   : > { %5624 = vst [vmem:[%s7349_s8 + $0x50] sm:$0xff] %v5334_v28   ;;  %v4192_v26 = vsub.f32 0.0, %v7546_v63  ;;  %v3742_v58 = vadd.f32 %v3620_v7, %v3469_v27  ;;  %5063 = vmatmul.msk.bf16.gmra.mxu2 %vm1029_vm3, %v6059_v3  ;;  %v8128_v28 = vld [vmem:[#allocation74_spill] sm:$0xff] }
 0x3f8   : > { %v3098_v13 = vpop.f32.mrf.mxu1 }
 0x3f9   : > { %v5834_v43 = vpop.eup %5833  ;;  %v4279_v4 = vmul.f32 1.442695, %v4192_v26  ;;  %v3996_v39 = vadd.f32 %v3874_v20, %v3742_v58  ;;  %v3217_v25 = vadd.f32 %v3098_v13, %v7011_v46  ;;  %v8129_v58 = vld [vmem:[#allocation8_spill] sm:$0xff] }
 0x3fa   : > { %v4380_v12 = vadd.f32 1.0, %v5834_v43  ;;  %v3350_v18 = vpop.f32.mrf.mxu2  ;;  %v5836_v1 = vpop.eup %5835  ;;  %v6062_v13 = vld [vmem:[#allocation2 + $0xcc] sm:$0xff]  }
 0x3fb   : > { %5837 = vpow2.f32 %v4279_v4  ;;  %v4063_v42 = vmul.f32 %v7536_v54, %v3996_v39  ;;  %5096 = vmatmul.msk.bf16.gmra.mxu3 %vm1029_vm3, %v8127_v15  ;;  %v3470_v8 = vadd.f32 %v3350_v18, %v3216_v40  ;;  %v4505_v53 = vmul.f32 %v5836_v1, %v7515_v36 }
 0x3fc   : > { %5839 = vrcp.f32 %v4380_v12  ;;  %v3877_v5 = vpop.f32.mrf.mxu0  ;;  %v2907_v43 = vrot.slane %v6062_v13, 1 }
 0x3fd   : > { %v4130_v16 = vadd.f32 %v7543_v57, %v4063_v42 }
 0x3fe   : > { %v3623_v29 = vpop.f32.mrf.mxu3  ;;  %v2908_v15 = vsel %vm1537_vm4, %v2905_v21, %v2907_v43 }
 0x3ff   : > { %v4193_v11 = vsub.f32 0.0, %v4130_v16  ;;  %v3743_v56 = vadd.f32 %v3623_v29, %v3470_v8  ;;  %5129 = vmatmul.msk.bf16.gmra.mxu0 %vm1029_vm3, %v7036_v30 }
 0x400   : > { %v3101_v19 = vpop.f32.mrf.mxu1 }
 0x401   : > { %v5838_v10 = vpop.eup %5837  ;;  %v4281_v48 = vmul.f32 1.442695, %v4193_v11  ;;  %v3997_v24 = vadd.f32 %v3877_v5, %v3743_v56  ;;  %v3218_v14 = vadd.f32 %v3101_v19, %v8128_v28 }
 0x402   : > { %v5840_v31 = vpop.eup %5839  ;;  %v3352_v50 = vpop.f32.mrf.mxu2  ;;  %v4381_v55 = vadd.f32 1.0, %v5838_v10 }
 0x403   : > { %v4506_v61 = vmul.f32 %v5840_v31, %v7525_v62  ;;  %5841 = vpow2.f32 %v4281_v48  ;;  %v4064_v22 = vmul.f32 %v7536_v54, %v3997_v24  ;;  %v3471_v17 = vadd.f32 %v3352_v50, %v3217_v25  ;;  %5031 = vmatmul.msk.bf16.gmra.mxu1 %vm1029_vm3, %v2906_v47 }
 0x404   : > { %v3879_v35 = vpop.f32.mrf.mxu0  ;;  %5843 = vrcp.f32 %v4381_v55 }
 0x405   : > { %v5339_v30 = vpack.c.bf16 %v4506_v61, %v4505_v53  ;;  %v7565_v23 = vadd.f32 %v7543_v57, %v4064_v22  ;;  %v8130_v22 = vld [vmem:[#allocation75_spill] sm:$0xff] }
 0x406   : > { %v3625_v34 = vpop.f32.mrf.mxu3 }
 0x407   : > { %5625 = vst [vmem:[%s7349_s8 + $0x58] sm:$0xff] %v5339_v30   ;;  %v4194_v46 = vsub.f32 0.0, %v7565_v23  ;;  %v3744_v36 = vadd.f32 %v3625_v34, %v3471_v17  ;;  %5064 = vmatmul.msk.bf16.gmra.mxu2 %vm1029_vm3, %v6061_v32  ;;  %v8131_v34 = vld [vmem:[#allocation11_spill] sm:$0xff] }
 0x408   : > { %v3103_v62 = vpop.f32.mrf.mxu1 }
 0x409   : > { %v5842_v41 = vpop.eup %5841  ;;  %v4283_v51 = vmul.f32 1.442695, %v4194_v46  ;;  %v3998_v27 = vadd.f32 %v3879_v35, %v3744_v36  ;;  %v3219_v29 = vadd.f32 %v3103_v62, %v7026_v59  ;;  %v6064_v36 = vld [vmem:[#allocation2 + $0xd4] sm:$0xff]  }
 0x40a   : > { %v4382_v20 = vadd.f32 1.0, %v5842_v41  ;;  %v3355_v7 = vpop.f32.mrf.mxu2  ;;  %v5844_v40 = vpop.eup %5843  ;;  %v2909_v32 = vrot.slane %v6064_v36, 1 }
 0x40b   : > { %5845 = vpow2.f32 %v4283_v51  ;;  %v4065_v26 = vmul.f32 %v7536_v54, %v3998_v27  ;;  %5097 = vmatmul.msk.bf16.gmra.mxu3 %vm1029_vm3, %v8129_v58  ;;  %v3472_v3 = vadd.f32 %v3355_v7, %v3218_v14  ;;  %v4507_v11 = vmul.f32 %v5844_v40, %v7546_v63  ;;  %v6063_v63 = vld [vmem:[#allocation2 + $0xd0] sm:$0xff]  }
 0x40c   : > { %5847 = vrcp.f32 %v4382_v20  ;;  %v3882_v39 = vpop.f32.mrf.mxu0  ;;  %v8132_v20 = vld [vmem:[#allocation80_spill] sm:$0xff] }
 0x40d   : > { %v4132_v4 = vadd.f32 %v7543_v57, %v4065_v26  ;;  %v2910_v26 = vsel %vm1537_vm4, %v2907_v43, %v2909_v32 }
 0x40e   : > { %v3628_v45 = vpop.f32.mrf.mxu3 }
 0x40f   : > { %v4195_v12 = vsub.f32 0.0, %v4132_v4  ;;  %v3745_v18 = vadd.f32 %v3628_v45, %v3472_v3  ;;  %5130 = vmatmul.msk.bf16.gmra.mxu0 %vm1029_vm3, %v7051_v38 }
 0x410   : > { %v3106_v42 = vpop.f32.mrf.mxu1 }
 0x411   : > { %v5846_v8 = vpop.eup %5845  ;;  %v4285_v44 = vmul.f32 1.442695, %v4195_v12  ;;  %v3999_v5 = vadd.f32 %v3882_v39, %v3745_v18  ;;  %v3220_v17 = vadd.f32 %v3106_v42, %v8130_v22  ;;  %v8133_v39 = vld [vmem:[#allocation76_spill] sm:$0xff] }
 0x412   : > { %v5848_v1 = vpop.eup %5847  ;;  %v3357_v56 = vpop.f32.mrf.mxu2  ;;  %v4383_v48 = vadd.f32 1.0, %v5846_v8 }
 0x413   : > { %v4508_v19 = vmul.f32 %v5848_v1, %v4130_v16  ;;  %5849 = vpow2.f32 %v4285_v44  ;;  %v4066_v47 = vmul.f32 %v7536_v54, %v3999_v5  ;;  %v3473_v10 = vadd.f32 %v3357_v56, %v3219_v29  ;;  %5032 = vmatmul.msk.bf16.gmra.mxu1 %vm1029_vm3, %v2908_v15 }
 0x414   : > { %v3884_v24 = vpop.f32.mrf.mxu0  ;;  %5851 = vrcp.f32 %v4383_v48 }
 0x415   : > { %v5344_v38 = vpack.c.bf16 %v4508_v19, %v4507_v11  ;;  %v7583_v21 = vadd.f32 %v7543_v57, %v4066_v47 }
 0x416   : > { %v3630_v25 = vpop.f32.mrf.mxu3 }
 0x417   : > { %5626 = vst [vmem:[%s7349_s8 + $0x60] sm:$0xff] %v5344_v38   ;;  %v4196_v59 = vsub.f32 0.0, %v7583_v21  ;;  %v3746_v31 = vadd.f32 %v3630_v25, %v3473_v10  ;;  %5065 = vmatmul.msk.bf16.gmra.mxu2 %vm1029_vm3, %v6063_v63  ;;  %v8134_v38 = vld [vmem:[#allocation77_spill] sm:$0xff] }
 0x418   : > { %v3108_v16 = vpop.f32.mrf.mxu1 }
 0x419   : > { %v5850_v53 = vpop.eup %5849  ;;  %v4287_v50 = vmul.f32 1.442695, %v4196_v59  ;;  %v4000_v61 = vadd.f32 %v3884_v24, %v3746_v31  ;;  %v3221_v45 = vadd.f32 %v3108_v16, %v8133_v39  ;;  %v8135_v31 = vld [vmem:[#allocation14_spill] sm:$0xff] }
 0x41a   : > { %v4384_v30 = vadd.f32 1.0, %v5850_v53  ;;  %v3360_v55 = vpop.f32.mrf.mxu2  ;;  %v5852_v27 = vpop.eup %5851  ;;  %v6066_v16 = vld [vmem:[#allocation2 + $0xdc] sm:$0xff]  }
 0x41b   : > { %5853 = vpow2.f32 %v4287_v50  ;;  %v4067_v35 = vmul.f32 %v7536_v54, %v4000_v61  ;;  %5098 = vmatmul.msk.bf16.gmra.mxu3 %vm1029_vm3, %v8131_v34  ;;  %v3474_v46 = vadd.f32 %v3360_v55, %v3220_v17  ;;  %v4509_v12 = vmul.f32 %v5852_v27, %v7565_v23  ;;  %v6065_v23 = vld [vmem:[#allocation2 + $0xd8] sm:$0xff]  }
 0x41c   : > { %5855 = vrcp.f32 %v4384_v30  ;;  %v3887_v41 = vpop.f32.mrf.mxu0  ;;  %v2911_v53 = vrot.slane %v6066_v16, 1  ;;  %v8137_v27 = vld [vmem:[#allocation78_spill] sm:$0xff] }
 0x41d   : > { %v4134_v62 = vadd.f32 %v7543_v57, %v4067_v35  ;;  %v8136_v35 = vld [vmem:[#allocation82_spill] sm:$0xff] }
 0x41e   : > { %v3633_v51 = vpop.f32.mrf.mxu3 }
 0x41f   : > { %v4197_v28 = vsub.f32 0.0, %v4134_v62  ;;  %v3747_v14 = vadd.f32 %v3633_v51, %v3474_v46  ;;  %5131 = vmatmul.msk.bf16.gmra.mxu0 %vm1029_vm3, %v8132_v20  ;;  %v2912_v46 = vsel %vm1537_vm4, %v2909_v32, %v2911_v53 }
 0x420   : > { %v3111_v7 = vpop.f32.mrf.mxu1 }
 0x421   : > { %v5854_v58 = vpop.eup %5853  ;;  %v4289_v3 = vmul.f32 1.442695, %v4197_v28  ;;  %v4001_v13 = vadd.f32 %v3887_v41, %v3747_v14  ;;  %v3222_v48 = vadd.f32 %v3111_v7, %v8134_v38 }
 0x422   : > { %v5856_v40 = vpop.eup %5855  ;;  %v3362_v18 = vpop.f32.mrf.mxu2  ;;  %v4385_v5 = vadd.f32 1.0, %v5854_v58 }
 0x423   : > { %v4510_v42 = vmul.f32 %v5856_v40, %v4132_v4  ;;  %5857 = vpow2.f32 %v4289_v3  ;;  %v4068_v15 = vmul.f32 %v7536_v54, %v4001_v13  ;;  %v3475_v8 = vadd.f32 %v3362_v18, %v3221_v45  ;;  %5033 = vmatmul.msk.bf16.gmra.mxu1 %vm1029_vm3, %v2910_v26 }
 0x424   : > { %v3889_v29 = vpop.f32.mrf.mxu0  ;;  %5859 = vrcp.f32 %v4385_v5 }
 0x425   : > { %v5349_v44 = vpack.c.bf16 %v4510_v42, %v4509_v12  ;;  %v7601_v43 = vadd.f32 %v7543_v57, %v4068_v15 }
 0x426   : > { %v3635_v1 = vpop.f32.mrf.mxu3 }
 0x427   : > { %5627 = vst [vmem:[%s7349_s8 + $0x68] sm:$0xff] %v5349_v44   ;;  %v4198_v11 = vsub.f32 0.0, %v7601_v43  ;;  %v3748_v56 = vadd.f32 %v3635_v1, %v3475_v8  ;;  %5066 = vmatmul.msk.bf16.gmra.mxu2 %vm1029_vm3, %v6065_v23  ;;  %v8138_v44 = vld [vmem:[#allocation79_spill] sm:$0xff] }
 0x428   : > { %v3113_v4 = vpop.f32.mrf.mxu1 }
 0x429   : > { %v5858_v19 = vpop.eup %5857  ;;  %v4291_v47 = vmul.f32 1.442695, %v4198_v11  ;;  %v4002_v10 = vadd.f32 %v3889_v29, %v3748_v56  ;;  %v3223_v28 = vadd.f32 %v3113_v4, %v8137_v27  ;;  %v8139_v56 = vld [vmem:[#allocation18_spill] sm:$0xff]  ;;  %v6068_v4 = vld [vmem:[#allocation2 + $0xe4] sm:$0xff]  }
 0x42a   : > { %v4386_v24 = vadd.f32 1.0, %v5858_v19  ;;  %v3365_v25 = vpop.f32.mrf.mxu2  ;;  %v5860_v17 = vpop.eup %5859  ;;  %v2913_v19 = vrot.slane %v6068_v4, 1 }
 0x42b   : > { %5861 = vpow2.f32 %v4291_v47  ;;  %v4069_v59 = vmul.f32 %v7536_v54, %v4002_v10  ;;  %5099 = vmatmul.msk.bf16.gmra.mxu3 %vm1029_vm3, %v8135_v31  ;;  %v3476_v63 = vadd.f32 %v3365_v25, %v3222_v48  ;;  %v4511_v20 = vmul.f32 %v5860_v17, %v7583_v21  ;;  %v6067_v21 = vld [vmem:[#allocation2 + $0xe0] sm:$0xff]   ;;  %v8141_v17 = vld [vmem:[#allocation81_spill] sm:$0xff] }
 0x42c   : > { %5863 = vrcp.f32 %v4386_v24  ;;  %v3892_v61 = vpop.f32.mrf.mxu0 }
 0x42d   : > { %v4136_v50 = vadd.f32 %v7543_v57, %v4069_v59  ;;  %v8140_v59 = vld [vmem:[#allocation83_spill] sm:$0xff] }
 0x42e   : > { %v3638_v22 = vpop.f32.mrf.mxu3 }
 0x42f   : > { %v4199_v30 = vsub.f32 0.0, %v4136_v50  ;;  %v3749_v55 = vadd.f32 %v3638_v22, %v3476_v63  ;;  %5132 = vmatmul.msk.bf16.gmra.mxu0 %vm1029_vm3, %v8136_v35  ;;  %v2914_v63 = vsel %vm1537_vm4, %v2911_v53, %v2913_v19 }
 0x430   : > { %v3116_v34 = vpop.f32.mrf.mxu1 }
 0x431   : > { %v5862_v36 = vpop.eup %5861  ;;  %v4293_v41 = vmul.f32 1.442695, %v4199_v30  ;;  %v4003_v51 = vadd.f32 %v3892_v61, %v3749_v55  ;;  %v3224_v5 = vadd.f32 %v3116_v34, %v8138_v44 }
 0x432   : > { %v5864_v14 = vpop.eup %5863  ;;  %v3367_v7 = vpop.f32.mrf.mxu2  ;;  %v4387_v39 = vadd.f32 1.0, %v5862_v36 }
 0x433   : > { %v4512_v26 = vmul.f32 %v5864_v14, %v4134_v62  ;;  %5865 = vpow2.f32 %v4293_v41  ;;  %v4070_v58 = vmul.f32 %v7536_v54, %v4003_v51  ;;  %v3477_v3 = vadd.f32 %v3367_v7, %v3223_v28  ;;  %5034 = vmatmul.msk.bf16.gmra.mxu1 %vm1029_vm3, %v2912_v46 }
 0x434   : > { %v3894_v45 = vpop.f32.mrf.mxu0  ;;  %5867 = vrcp.f32 %v4387_v39 }
 0x435   : > { %v5354_v13 = vpack.c.bf16 %v4512_v26, %v4511_v20  ;;  %v7619_v32 = vadd.f32 %v7543_v57, %v4070_v58 }
 0x436   : > { %v3640_v40 = vpop.f32.mrf.mxu3 }
 0x437   : > { %5628 = vst [vmem:[%s7349_s8 + $0x70] sm:$0xff] %v5354_v13   ;;  %v4200_v12 = vsub.f32 0.0, %v7619_v32  ;;  %v3750_v18 = vadd.f32 %v3640_v40, %v3477_v3  ;;  %5067 = vmatmul.msk.bf16.gmra.mxu2 %vm1029_vm3, %v6067_v21  ;;  %v8142_v13 = vld [vmem:[#allocation37_spill] sm:$0xff] }
 0x438   : > { %v3118_v62 = vpop.f32.mrf.mxu1 }
 0x439   : > { %v5866_v42 = vpop.eup %5865  ;;  %v4295_v15 = vmul.f32 1.442695, %v4200_v12  ;;  %v4004_v8 = vadd.f32 %v3894_v45, %v3750_v18  ;;  %v3225_v30 = vadd.f32 %v3118_v62, %v8141_v17  ;;  %v8143_v18 = vld [vmem:[#allocation22_spill] sm:$0xff]  ;;  %v6070_v62 = vld [vmem:[#allocation2 + $0xec] sm:$0xff]  }
 0x43a   : > { %v4388_v29 = vadd.f32 1.0, %v5866_v42  ;;  %v3370_v1 = vpop.f32.mrf.mxu2  ;;  %v5868_v48 = vpop.eup %5867  ;;  %v2915_v42 = vrot.slane %v6070_v62, 1  ;;  %v527_v62 = vld [vmem:[%s6446_s14 + $0x14] sm:$0xf] }
 0x43b   : > { %5869 = vpow2.f32 %v4295_v15  ;;  %v4071_v11 = vmul.f32 %v7536_v54, %v4004_v8  ;;  %5100 = vmatmul.msk.bf16.gmra.mxu3 %vm1029_vm3, %v8139_v56  ;;  %v3478_v23 = vadd.f32 %v3370_v1, %v3224_v5  ;;  %v4513_v35 = vmul.f32 %v5868_v48, %v7601_v43  ;;  %v6069_v43 = vld [vmem:[#allocation2 + $0xe8] sm:$0xff]   ;;  %536 = vst.msk [vmem:[#allocation2 + $0x110] sm:$0xf] %vm458_vm1, %v527_v62 }
 0x43c   : > { %5871 = vrcp.f32 %v4388_v29  ;;  %v3897_v10 = vpop.f32.mrf.mxu0  ;;  %v8145_v48 = vld [vmem:[#allocation40_spill] sm:$0xff] }
 0x43d   : > { %v4138_v47 = vadd.f32 %v7543_v57, %v4071_v11  ;;  %v8144_v11 = vld [vmem:[#allocation84_spill] sm:$0xff] }
 0x43e   : > { %v3643_v38 = vpop.f32.mrf.mxu3 }
 0x43f   : > { %v4201_v24 = vsub.f32 0.0, %v4138_v47  ;;  %v3751_v25 = vadd.f32 %v3643_v38, %v3478_v23  ;;  %5133 = vmatmul.msk.bf16.gmra.mxu0 %vm1029_vm3, %v8140_v59  ;;  %v2916_v23 = vsel %vm1537_vm4, %v2913_v19, %v2915_v42 }
 0x440   : > { %v3121_v31 = vpop.f32.mrf.mxu1 }
 0x441   : > { %v5870_v16 = vpop.eup %5869  ;;  %v4297_v61 = vmul.f32 1.442695, %v4201_v24  ;;  %v4005_v22 = vadd.f32 %v3897_v10, %v3751_v25  ;;  %v3226_v39 = vadd.f32 %v3121_v31, %v8142_v13 }
 0x442   : > { %v5872_v55 = vpop.eup %5871  ;;  %v3372_v34 = vpop.f32.mrf.mxu2  ;;  %v4389_v27 = vadd.f32 1.0, %v5870_v16 }
 0x443   : > { %v4514_v46 = vmul.f32 %v5872_v55, %v4136_v50  ;;  %5873 = vpow2.f32 %v4297_v61  ;;  %v4072_v36 = vmul.f32 %v7536_v54, %v4005_v22  ;;  %v3479_v41 = vadd.f32 %v3372_v34, %v3225_v30  ;;  %5035 = vmatmul.msk.bf16.gmra.mxu1 %vm1029_vm3, %v2914_v63 }
 0x444   : > { %v3899_v28 = vpop.f32.mrf.mxu0  ;;  %5875 = vrcp.f32 %v4389_v27 }
 0x445   : > { %v5359_v51 = vpack.c.bf16 %v4514_v46, %v4513_v35  ;;  %v7637_v53 = vadd.f32 %v7543_v57, %v4072_v36 }
 0x446   : > { %v3645_v14 = vpop.f32.mrf.mxu3 }
 0x447   : > { %5629 = vst [vmem:[%s7349_s8 + $0x78] sm:$0xff] %v5359_v51   ;;  %v4202_v20 = vsub.f32 0.0, %v7637_v53  ;;  %v3752_v7 = vadd.f32 %v3645_v14, %v3479_v41  ;;  %5068 = vmatmul.msk.bf16.gmra.mxu2 %vm1029_vm3, %v6069_v43  ;;  %v8146_v51 = vld [vmem:[#allocation42_spill] sm:$0xff] }
 0x448   : > { %v3123_v50 = vpop.f32.mrf.mxu1 }
 0x449   : > { %v5874_v26 = vpop.eup %5873  ;;  %v4299_v58 = vmul.f32 1.442695, %v4202_v20  ;;  %v4006_v3 = vadd.f32 %v3899_v28, %v3752_v7  ;;  %v3227_v24 = vadd.f32 %v3123_v50, %v8145_v48  ;;  %v8147_v7 = vld [vmem:[#allocation26_spill] sm:$0xff]  ;;  %v2917_v50 = vrot.slane %v7108_v37, 1 }
 0x44a   : > { %v4390_v45 = vadd.f32 1.0, %v5874_v26  ;;  %v3375_v40 = vpop.f32.mrf.mxu2  ;;  %v5876_v5 = vpop.eup %5875 }
 0x44b   : > { %5877 = vpow2.f32 %v4299_v58  ;;  %v4073_v12 = vmul.f32 %v7536_v54, %v4006_v3  ;;  %5101 = vmatmul.msk.bf16.gmra.mxu3 %vm1029_vm3, %v8143_v18  ;;  %v3480_v21 = vadd.f32 %v3375_v40, %v3226_v39  ;;  %v4515_v59 = vmul.f32 %v5876_v5, %v7619_v32  ;;  %v6071_v32 = vld [vmem:[#allocation2 + $0xf0] sm:$0xff]   ;;  %v7677_v18 = vld [vmem:[#allocation2 + $0x100] sm:$0xff]  }
 0x44c   : > { %5879 = vrcp.f32 %v4390_v45  ;;  %v3902_v8 = vpop.f32.mrf.mxu0 }
 0x44d   : > { %v7647_v15 = vadd.f32 %v7543_v57, %v4073_v12  ;;  %v2918_v12 = vsel %vm1537_vm4, %v2915_v42, %v2917_v50 }
 0x44e   : > { %v3648_v44 = vpop.f32.mrf.mxu3 }
 0x44f   : > { %v4203_v29 = vsub.f32 0.0, %v7647_v15  ;;  %v3753_v1 = vadd.f32 %v3648_v44, %v3480_v21  ;;  %5134 = vmatmul.msk.bf16.gmra.mxu0 %vm1029_vm3, %v8144_v11  ;;  %v3512_v21 = vshll.u32 %v7677_v18, 16 }
 0x450   : > { %v3126_v56 = vpop.f32.mrf.mxu1 }
 0x451   : > { %v5878_v4 = vpop.eup %5877  ;;  %v4301_v10 = vmul.f32 1.442695, %v4203_v29  ;;  %v4007_v38 = vadd.f32 %v3902_v8, %v3753_v1  ;;  %v3228_v27 = vadd.f32 %v3126_v56, %v8146_v51  ;;  %v528_v8 = vld [vmem:[%s6446_s14 + $0x18] sm:$0xf]  ;;  %v8148_v1 = vld [vmem:[#allocation45_spill] sm:$0xff]  ;;  %v7701_v51 = vld [vmem:[#allocation2 + $0xfc] sm:$0xff]  }
 0x452   : > { %v5880_v25 = vpop.eup %5879  ;;  %v3377_v31 = vpop.f32.mrf.mxu2  ;;  %v4391_v17 = vadd.f32 1.0, %v5878_v4  ;;  %537 = vst.msk [vmem:[#allocation2 + $0x114] sm:$0xf] %vm458_vm1, %v528_v8 }
 0x453   : > { %v4516_v63 = vmul.f32 %v5880_v25, %v4138_v47  ;;  %5881 = vpow2.f32 %v4301_v10  ;;  %v4074_v16 = vmul.f32 %v7536_v54, %v4007_v38  ;;  %v3481_v61 = vadd.f32 %v3377_v31, %v3227_v24  ;;  %5036 = vmatmul.msk.bf16.gmra.mxu1 %vm1029_vm3, %v2916_v23 }
 0x454   : > { %v3904_v30 = vpop.f32.mrf.mxu0  ;;  %5883 = vrcp.f32 %v4391_v17  ;;  %v3514_v38 = vrot.slane %v3512_v21, 1 }
 0x455   : > { %v5364_v22 = vpack.c.bf16 %v4516_v63, %v4515_v59  ;;  %v7658_v19 = vadd.f32 %v7543_v57, %v4074_v16  ;;  %v6073_v16 = vld [vmem:[#allocation2 + $0xf8] sm:$0xff]  }
 0x456   : > { %v3650_v55 = vpop.f32.mrf.mxu3 }
 0x457   : > { %5630 = vst [vmem:[%s7349_s8 + $0x80] sm:$0xff] %v5364_v22   ;;  %v4204_v35 = vsub.f32 0.0, %v7658_v19  ;;  %v3754_v34 = vadd.f32 %v3650_v55, %v3481_v61  ;;  %5069 = vmatmul.msk.bf16.gmra.mxu2 %vm1029_vm3, %v6071_v32  ;;  %v3782_v22 = vrot.slane %v7677_v18, 1 }
 0x458   : > { %v3128_v47 = vpop.f32.mrf.mxu1 }
 0x459   : > { %v5882_v46 = vpop.eup %5881  ;;  %v4303_v36 = vmul.f32 1.442695, %v4204_v35  ;;  %v4008_v41 = vadd.f32 %v3904_v30, %v3754_v34  ;;  %v3229_v11 = vadd.f32 %v3128_v47, %v8148_v1  ;;  %v8150_v34 = vld [vmem:[#allocation47_spill] sm:$0xff] }
 0x45a   : > { %v4392_v28 = vadd.f32 1.0, %v5882_v46  ;;  %v3380_v14 = vpop.f32.mrf.mxu2  ;;  %v5884_v13 = vpop.eup %5883 }
 0x45b   : > { %5885 = vpow2.f32 %v4303_v36  ;;  %v4075_v20 = vmul.f32 %v7536_v54, %v4008_v41  ;;  %5102 = vmatmul.msk.bf16.gmra.mxu3 %vm1029_vm3, %v8147_v7  ;;  %v3482_v43 = vadd.f32 %v3380_v14, %v3228_v27  ;;  %v4517_v56 = vmul.f32 %v5884_v13, %v7637_v53 }
 0x45c   : > { %5887 = vrcp.f32 %v4392_v28  ;;  %v3907_v58 = vpop.f32.mrf.mxu0  ;;  %v2919_v27 = vrot.slane %v7701_v51, 1 }
 0x45d   : > { %v7669_v26 = vadd.f32 %v7543_v57, %v4075_v20  ;;  %v3783_v20 = vsel %vm1537_vm4, %v7145_v60, %v3782_v22 }
 0x45e   : > { %v3653_v3 = vpop.f32.mrf.mxu3 }
 0x45f   : > { %v4205_v39 = vsub.f32 0.0, %v7669_v26  ;;  %v3755_v45 = vadd.f32 %v3653_v3, %v3482_v43  ;;  %5135 = vmatmul.msk.bf16.gmra.mxu0 %vm1029_vm3, %v7156_v33 }
 0x460   : > { %v3131_v40 = vpop.f32.mrf.mxu1 }
 0x461   : > { %v5886_v44 = vpop.eup %5885  ;;  %v4305_v5 = vmul.f32 1.442695, %v4205_v39  ;;  %v4009_v29 = vadd.f32 %v3907_v58, %v3755_v45  ;;  %v3230_v32 = vadd.f32 %v3131_v40, %v8150_v34  ;;  %v2920_v39 = vsel %vm1537_vm4, %v2917_v50, %v2919_v27  ;;  %v7719_v40 = vld [vmem:[#allocation2 + $0x108] sm:$0xff]  }
 0x462   : > { %v5888_v33 = vpop.eup %5887  ;;  %v3382_v23 = vpop.f32.mrf.mxu2  ;;  %v4393_v24 = vadd.f32 1.0, %v5886_v44  ;;  %v3516_v45 = vshrl.u32 %v7677_v18, 16  ;;  %v3519_v60 = vshll.u32 %v7719_v40, 16 }
 0x463   : > { %v4518_v42 = vmul.f32 %v5888_v33, %v7647_v15  ;;  %5889 = vpow2.f32 %v4305_v5  ;;  %v4076_v4 = vmul.f32 %v7536_v54, %v4009_v29  ;;  %v3483_v10 = vadd.f32 %v3382_v23, %v3229_v11  ;;  %5037 = vmatmul.msk.bf16.gmra.mxu1 %vm1029_vm3, %v2918_v12  ;;  %v8149_v15 = vld [vmem:[#allocation30_spill] sm:$0xff] }
 0x464   : > { %v3909_v59 = vpop.f32.mrf.mxu0  ;;  %v3515_v61 = vsel %vm773_vm2, %v8149_v15, %v3514_v38  ;;  %5891 = vrcp.f32 %v4393_v24  ;;  %v3518_v11 = vor.u32 %v3516_v45, %v3514_v38  ;;  %v3521_v33 = vrot.slane %v3519_v60, 1 }
 0x465   : > { %v5369_v48 = vpack.c.bf16 %v4518_v42, %v4517_v56  ;;  %v7690_v25 = vadd.f32 %v7543_v57, %v4076_v4 }
 0x466   : > { %v3655_v31 = vpop.f32.mrf.mxu3 }
 0x467   : > { %5631 = vst [vmem:[%s7349_s8 + $0x88] sm:$0xff] %v5369_v48   ;;  %v4206_v53 = vsub.f32 0.0, %v7690_v25  ;;  %v3756_v63 = vadd.f32 %v3655_v31, %v3483_v10  ;;  %5070 = vmatmul.msk.bf16.gmra.mxu2 %vm1029_vm3, %v6073_v16  ;;  %v3784_v48 = vrot.slane %v7719_v40, 1 }
 0x468   : > { %v3133_v17 = vpop.f32.mrf.mxu1 }
 0x469   : > { %v5890_v30 = vpop.eup %5889  ;;  %v4307_v55 = vmul.f32 1.442695, %v4206_v53  ;;  %v4010_v35 = vadd.f32 %v3909_v59, %v3756_v63  ;;  %v3231_v8 = vadd.f32 %v3133_v17, %v7138_v2  ;;  %v8151_v53 = vld [vmem:[#allocation50_spill] sm:$0xff]  ;;  %v3785_v34 = vsel %vm1537_vm4, %v3782_v22, %v3784_v48 }
 0x46a   : > { %v4394_v47 = vadd.f32 1.0, %v5890_v30  ;;  %v3385_v46 = vpop.f32.mrf.mxu2  ;;  %v5892_v43 = vpop.eup %5891  ;;  %v2921_v30 = vrot.slane %v7148_v52, 1 }
 0x46b   : > { %5893 = vpow2.f32 %v4307_v55  ;;  %v4077_v36 = vmul.f32 %v7536_v54, %v4010_v35  ;;  %5103 = vmatmul.msk.bf16.gmra.mxu3 %vm1029_vm3, %v3515_v61  ;;  %v3484_v41 = vadd.f32 %v3385_v46, %v3230_v32  ;;  %v4519_v5 = vmul.f32 %v5892_v43, %v7658_v19  ;;  %v7748_v32 = vld [vmem:[#allocation2 + $0x110] sm:$0xff]  }
 0x46c   : > { %5895 = vrcp.f32 %v4394_v47  ;;  %v3912_v14 = vpop.f32.mrf.mxu0  ;;  %v3527_v22 = vshll.u32 %v7748_v32, 16 }
 0x46d   : > { %v7705_v28 = vadd.f32 %v7543_v57, %v4077_v36 }
 0x46e   : > { %v3658_v7 = vpop.f32.mrf.mxu3 }
 0x46f   : > { %v4207_v58 = vsub.f32 0.0, %v7705_v28  ;;  %v3757_v3 = vadd.f32 %v3658_v7, %v3484_v41  ;;  %5136 = vmatmul.msk.bf16.gmra.mxu0 %vm1029_vm3, %v3783_v20  ;;  %v2922_v20 = vsel %vm1537_vm4, %v2919_v27, %v2921_v30 }
 0x470   : > { %v3136_v13 = vpop.f32.mrf.mxu1 }
 0x471   : > { %v5894_v12 = vpop.eup %5893  ;;  %v4309_v21 = vmul.f32 1.442695, %v4207_v58  ;;  %v4011_v62 = vadd.f32 %v3912_v14, %v3757_v3  ;;  %v3232_v63 = vadd.f32 %v3136_v13, %v8151_v53 }
 0x472   : > { %v5896_v44 = vpop.eup %5895  ;;  %v3387_v29 = vpop.f32.mrf.mxu2  ;;  %v4395_v23 = vadd.f32 1.0, %v5894_v12 }
 0x473   : > { %v4520_v37 = vmul.f32 %v5896_v44, %v7669_v26  ;;  %5897 = vpow2.f32 %v4309_v21  ;;  %v4078_v50 = vmul.f32 %v7536_v54, %v4011_v62  ;;  %v3485_v1 = vadd.f32 %v3387_v29, %v3231_v8  ;;  %5038 = vmatmul.msk.bf16.gmra.mxu1 %vm1029_vm3, %v2920_v39 }
 0x474   : > { %v3914_v2 = vpop.f32.mrf.mxu0  ;;  %v3522_v26 = vsel %vm773_vm2, %v3518_v11, %v3521_v33  ;;  %5899 = vrcp.f32 %v4395_v23  ;;  %v3529_v21 = vrot.slane %v3527_v22, 1 }
 0x475   : > { %v5374_v56 = vpack.c.bf16 %v4520_v37, %v4519_v5  ;;  %v7728_v42 = vadd.f32 %v7543_v57, %v4078_v50  ;;  %v3786_v37 = vrot.slane %v7748_v32, 1 }
 0x476   : > { %v3660_v4 = vpop.f32.mrf.mxu3 }
 0x477   : > { %5632 = vst [vmem:[%s7349_s8 + $0x90] sm:$0xff] %v5374_v56   ;;  %v4208_v19 = vsub.f32 0.0, %v7728_v42  ;;  %v3758_v10 = vadd.f32 %v3660_v4, %v3485_v1  ;;  %5071 = vmatmul.msk.bf16.gmra.mxu2 %vm1029_vm3, %v7677_v18  ;;  %v3523_v18 = vshrl.u32 %v7719_v40, 16  ;;  %v8152_v56 = vld [vmem:[#allocation52_spill] sm:$0xff] }
 0x478   : > { %v3138_v38 = vpop.f32.mrf.mxu1 }
 0x479   : > { %v5898_v24 = vpop.eup %5897  ;;  %v4311_v59 = vmul.f32 1.442695, %v4208_v19  ;;  %v4012_v31 = vadd.f32 %v3914_v2, %v3758_v10  ;;  %v3233_v3 = vadd.f32 %v3138_v38, %v7162_v6  ;;  %v3525_v12 = vor.u32 %v3523_v18, %v3521_v33 }
 0x47a   : > { %v4396_v16 = vadd.f32 1.0, %v5898_v24  ;;  %v3390_v15 = vpop.f32.mrf.mxu2  ;;  %v5900_v46 = vpop.eup %5899  ;;  %v3787_v24 = vsel %vm1537_vm4, %v3784_v48, %v3786_v37 }
 0x47b   : > { %5901 = vpow2.f32 %v4311_v59  ;;  %v4079_v61 = vmul.f32 %v7536_v54, %v4012_v31  ;;  %5104 = vmatmul.msk.bf16.gmra.mxu3 %vm1029_vm3, %v3522_v26  ;;  %v3486_v17 = vadd.f32 %v3390_v15, %v3232_v63  ;;  %v4521_v39 = vmul.f32 %v5900_v46, %v7690_v25 }
 0x47c   : > { %5903 = vrcp.f32 %v4396_v16  ;;  %v3917_v35 = vpop.f32.mrf.mxu0  ;;  %v5279_v31 = vunpack.c.l.b16 %v7748_v32 }
 0x47d   : > { %v7741_v55 = vadd.f32 %v7543_v57, %v4079_v61 }
 0x47e   : > { %v3663_v47 = vpop.f32.mrf.mxu3  ;;  %v3261_v48 = vpack.c.b16 %v5279_v31, %v5279_v31 }
 0x47f   : > { %v4209_v36 = vsub.f32 0.0, %v7741_v55  ;;  %v3759_v41 = vadd.f32 %v3663_v47, %v3486_v17  ;;  %5137 = vmatmul.msk.bf16.gmra.mxu0 %vm1029_vm3, %v3785_v34 }
 0x480   : > { %v3141_v14 = vpop.f32.mrf.mxu1 }
 0x481   : > { %v5902_v7 = vpop.eup %5901  ;;  %v4313_v43 = vmul.f32 1.442695, %v4209_v36  ;;  %v4013_v58 = vadd.f32 %v3917_v35, %v3759_v41  ;;  %v3234_v23 = vadd.f32 %v3141_v14, %v8152_v56  ;;  %v3531_v36 = vshrl.u32 %v7748_v32, 16 }
 0x482   : > { %v5904_v13 = vpop.eup %5903  ;;  %v3392_v45 = vpop.f32.mrf.mxu2  ;;  %v4397_v8 = vadd.f32 1.0, %v5902_v7 }
 0x483   : > { %v4522_v60 = vmul.f32 %v5904_v13, %v7705_v28  ;;  %5905 = vpow2.f32 %v4313_v43  ;;  %v4080_v51 = vmul.f32 %v7536_v54, %v4013_v58  ;;  %v3487_v27 = vadd.f32 %v3392_v45, %v3233_v3  ;;  %5039 = vmatmul.msk.bf16.gmra.mxu1 %vm1029_vm3, %v2922_v20 }
 0x484   : > { %v3919_v6 = vpop.f32.mrf.mxu0  ;;  %v3530_v28 = vsel %vm773_vm2, %v3525_v12, %v3529_v21  ;;  %5907 = vrcp.f32 %v4397_v8 }
 0x485   : > { %v5379_v62 = vpack.c.bf16 %v4522_v60, %v4521_v39  ;;  %v7765_v44 = vadd.f32 %v7543_v57, %v4080_v51 }
 0x486   : > { %v3665_v5 = vpop.f32.mrf.mxu3 }
 0x487   : > { %5633 = vst [vmem:[%s7349_s8 + $0x98] sm:$0xff] %v5379_v62   ;;  %v4210_v25 = vsub.f32 0.0, %v7765_v44  ;;  %v3760_v29 = vadd.f32 %v3665_v5, %v3487_v27  ;;  %5072 = vmatmul.msk.bf16.gmra.mxu2 %vm1029_vm3, %v7719_v40 }
 0x488   : > { %v3143_v50 = vpop.f32.mrf.mxu1 }
 0x489   : > { %v5906_v1 = vpop.eup %5905  ;;  %v4315_v11 = vmul.f32 1.442695, %v4210_v25  ;;  %v4014_v33 = vadd.f32 %v3919_v6, %v3760_v29  ;;  %v3235_v34 = vadd.f32 %v3143_v50, %v7177_v0 }
 0x48a   : > { %v4398_v2 = vadd.f32 1.0, %v5906_v1  ;;  %v3395_v4 = vpop.f32.mrf.mxu2  ;;  %v5908_v53 = vpop.eup %5907 }
 0x48b   : > { %5909 = vpow2.f32 %v4315_v11  ;;  %v4081_v19 = vmul.f32 %v7536_v54, %v4014_v33  ;;  %5105 = vmatmul.msk.bf16.gmra.mxu3 %vm1029_vm3, %v3530_v28  ;;  %v3488_v10 = vadd.f32 %v3395_v4, %v3234_v23  ;;  %v4523_v40 = vmul.f32 %v5908_v53, %v7728_v42  ;;  %v8154_v11 = vld [vmem:[#allocation57_spill] sm:$0xff] }
 0x48c   : > { %5911 = vrcp.f32 %v4398_v2  ;;  %v3922_v38 = vpop.f32.mrf.mxu0 }
 0x48d   : > { %v4148_v26 = vadd.f32 %v7543_v57, %v4081_v19 }
 0x48e   : > { %v3668_v59 = vpop.f32.mrf.mxu3 }
 0x48f   : > { %v4211_v63 = vsub.f32 0.0, %v4148_v26  ;;  %v3761_v16 = vadd.f32 %v3668_v59, %v3488_v10  ;;  %5138 = vmatmul.msk.bf16.gmra.mxu0 %vm1029_vm3, %v3787_v24 }
 0x490   : > { %v3146_v15 = vpop.f32.mrf.mxu1 }
 0x491   : > { %v5910_v61 = vpop.eup %5909  ;;  %v4317_v17 = vmul.f32 1.442695, %v4211_v63  ;;  %v4015_v35 = vadd.f32 %v3922_v38, %v3761_v16 }
 0x492   : > { %v5912_v47 = vpop.eup %5911  ;;  %v3397_v46 = vpop.f32.mrf.mxu2  ;;  %v4399_v0 = vadd.f32 1.0, %v5910_v61 }
 0x493   : > { %v4524_v41 = vmul.f32 %v5912_v47, %v7741_v55  ;;  %5913 = vpow2.f32 %v4317_v17  ;;  %v4082_v14 = vmul.f32 %v7536_v54, %v4015_v35  ;;  %v3489_v20 = vadd.f32 %v3397_v46, %v3235_v34  ;;  %5040 = vmatmul.msk.bf16.gmra.mxu1 %vm1029_vm3, %v2921_v30  ;;  %v8153_v30 = vld [vmem:[#allocation55_spill] sm:$0xff] }
 0x494   : > { %v3924_v42 = vpop.f32.mrf.mxu0  ;;  %v3533_v55 = vor.u32 %v3531_v36, %v3529_v21  ;;  %5915 = vrcp.f32 %v4399_v0  ;;  %v3236_v45 = vadd.f32 %v3146_v15, %v8153_v30  ;;  %v8155_v15 = vld [vmem:[#allocation60_spill] sm:$0xff]  ;;  %v7823_v47 = vld [vmem:[%s7919_s4] ss:$0 sm:$0xff] }
 0x495   : > { %v5384_v18 = vpack.c.bf16 %v4524_v41, %v4523_v40  ;;  %v7793_v22 = vadd.f32 %v7543_v57, %v4082_v14 }
 0x496   : > { %v3670_v7 = vpop.f32.mrf.mxu3 }
 0x497   : > { %5634 = vst [vmem:[%s7349_s8 + $0xa0] sm:$0xff] %v5384_v18   ;;  %v4212_v43 = vsub.f32 0.0, %v7793_v22  ;;  %v3762_v58 = vadd.f32 %v3670_v7, %v3489_v20  ;;  %5073 = vmatmul.msk.bf16.gmra.mxu2 %vm1029_vm3, %v3261_v48  ;;  %v8156_v7 = vld [vmem:[#allocation62_spill] sm:$0xff] }
 0x498   : > { %v3148_v3 = vpop.f32.mrf.mxu1 }
 0x499   : > { %v5914_v13 = vpop.eup %5913  ;;  %v4319_v52 = vmul.f32 1.442695, %v4212_v43  ;;  %v4016_v39 = vadd.f32 %v3924_v42, %v3762_v58  ;;  %v3237_v33 = vadd.f32 %v3148_v3, %v8154_v11 }
 0x49a   : > { %v4400_v60 = vadd.f32 1.0, %v5914_v13  ;;  %v3400_v51 = vpop.f32.mrf.mxu2  ;;  %v5916_v6 = vpop.eup %5915 }
 0x49b   : > { %5917 = vpow2.f32 %v4319_v52  ;;  %v4083_v27 = vmul.f32 %v7536_v54, %v4016_v39  ;;  %5106 = vmatmul.msk.bf16.gmra.mxu3 %vm1029_vm3, %v3533_v55  ;;  %v3490_v12 = vadd.f32 %v3400_v51, %v3236_v45  ;;  %v4525_v23 = vmul.f32 %v5916_v6, %v7765_v44 }
 0x49c   : > { %5919 = vrcp.f32 %v4400_v60  ;;  %v3927_v8 = vpop.f32.mrf.mxu0 }
 0x49d   : > { %v4150_v62 = vadd.f32 %v7543_v57, %v4083_v27 }
 0x49e   : > { %v3673_v21 = vpop.f32.mrf.mxu3 }
 0x49f   : > { %v4213_v5 = vsub.f32 0.0, %v4150_v62  ;;  %v3763_v25 = vadd.f32 %v3673_v21, %v3490_v12  ;;  %5139 = vmatmul.msk.bf16.gmra.mxu0 %vm1029_vm3, %v3786_v37 }
 0x4a0   : > { %v3151_v29 = vpop.f32.mrf.mxu1 }
 0x4a1   : > { %v5918_v28 = vpop.eup %5917  ;;  %v4321_v50 = vmul.f32 1.442695, %v4213_v5  ;;  %v4017_v1 = vadd.f32 %v3927_v8, %v3763_v25  ;;  %v3238_v61 = vadd.f32 %v3151_v29, %v8155_v15  ;;  %v8157_v5 = vld [vmem:[#allocation32_spill] sm:$0xff] }
 0x4a2   : > { %v5920_v56 = vpop.eup %5919  ;;  %v3402_v2 = vpop.f32.mrf.mxu2  ;;  %v4401_v32 = vadd.f32 1.0, %v5918_v28 }
 0x4a3   : > { %v4526_v4 = vmul.f32 %v5920_v56, %v4148_v26  ;;  %5921 = vpow2.f32 %v4321_v50  ;;  %v4084_v19 = vmul.f32 %v7536_v54, %v4017_v1  ;;  %v3491_v10 = vadd.f32 %v3402_v2, %v3237_v33 }
 0x4a4   : > { %v3929_v24 = vpop.f32.mrf.mxu0  ;;  %5923 = vrcp.f32 %v4401_v32 }
 0x4a5   : > { %v5389_v38 = vpack.c.bf16 %v4526_v4, %v4525_v23  ;;  %v7809_v37 = vadd.f32 %v7543_v57, %v4084_v19  ;;  %v7817_v57 = vld [vmem:[%s7918_s3] ss:$0 sm:$0xff] }
 0x4a6   : > { %v3675_v59 = vpop.f32.mrf.mxu3 }
 0x4a7   : > { %5635 = vst [vmem:[%s7349_s8 + $0xa8] sm:$0xff] %v5389_v38   ;;  %v4214_v31 = vsub.f32 0.0, %v7809_v37  ;;  %v3764_v53 = vadd.f32 %v3675_v59, %v3491_v10 }
 0x4a8   : > { %v3153_v63 = vpop.f32.mrf.mxu1 }
 0x4a9   : > { %v5922_v16 = vpop.eup %5921  ;;  %v4323_v44 = vmul.f32 1.442695, %v4214_v31  ;;  %v4018_v26 = vadd.f32 %v3929_v24, %v3764_v53  ;;  %v3239_v43 = vadd.f32 %v3153_v63, %v8156_v7  ;;  %v8158_v24 = vld [vmem:[#allocation15_spill] sm:$0xff] }
 0x4aa   : > { %v4402_v54 = vadd.f32 1.0, %v5922_v16  ;;  %v3405_v17 = vpop.f32.mrf.mxu2  ;;  %v5924_v36 = vpop.eup %5923 }
 0x4ab   : > { %5925 = vpow2.f32 %v4323_v44  ;;  %v4085_v35 = vmul.f32 %v7817_v57, %v4018_v26  ;;  %v3492_v34 = vadd.f32 %v3405_v17, %v3238_v61  ;;  %v4527_v55 = vmul.f32 %v5924_v36, %v7793_v22 }
 0x4ac   : > { %5927 = vrcp.f32 %v4402_v54  ;;  %v3932_v46 = vpop.f32.mrf.mxu0 }
 0x4ad   : > { %v4152_v40 = vadd.f32 %v7823_v47, %v4085_v35 }
 0x4ae   : > { %v3678_v48 = vpop.f32.mrf.mxu3 }
 0x4af   : > { %v4215_v41 = vsub.f32 0.0, %v4152_v40  ;;  %v3765_v14 = vadd.f32 %v3678_v48, %v3492_v34 }
 0x4b0   : > { %v3156_v20 = vpop.f32.mrf.mxu1 }
 0x4b1   : > { %v5926_v18 = vpop.eup %5925  ;;  %v4325_v0 = vmul.f32 1.442695, %v4215_v41  ;;  %v4019_v42 = vadd.f32 %v3932_v46, %v3765_v14  ;;  %v3240_v25 = vadd.f32 %v3156_v20, %v8157_v5  ;;  %v8159_v41 = vld [vmem:[#allocation38_spill] sm:$0xff] }
 0x4b2   : > { %v5928_v58 = vpop.eup %5927  ;;  %v3407_v3 = vpop.f32.mrf.mxu2  ;;  %v4403_v45 = vadd.f32 1.0, %v5926_v18 }
 0x4b3   : > { %v4528_v13 = vmul.f32 %v5928_v58, %v4150_v62  ;;  %5929 = vpow2.f32 %v4325_v0  ;;  %v4086_v52 = vmul.f32 %v7817_v57, %v4019_v42  ;;  %v3493_v39 = vadd.f32 %v3407_v3, %v3239_v43 }
 0x4b4   : > { %v3934_v51 = vpop.f32.mrf.mxu0  ;;  %5931 = vrcp.f32 %v4403_v45 }
 0x4b5   : > { %v5394_v30 = vpack.c.bf16 %v4528_v13, %v4527_v55  ;;  %v7830_v60 = vadd.f32 %v7823_v47, %v4086_v52 }
 0x4b6   : > { %v3680_v27 = vpop.f32.mrf.mxu3 }
 0x4b7   : > { %5636 = vst [vmem:[%s7349_s8 + $0xb0] sm:$0xff] %v5394_v30   ;;  %v4216_v12 = vsub.f32 0.0, %v7830_v60  ;;  %v3766_v8 = vadd.f32 %v3680_v27, %v3493_v39 }
 0x4b8   : > { %v3158_v21 = vpop.f32.mrf.mxu1 }
 0x4b9   : > { %v5930_v6 = vpop.eup %5929  ;;  %v4327_v22 = vmul.f32 1.442695, %v4216_v12  ;;  %v4020_v62 = vadd.f32 %v3934_v51, %v3766_v8  ;;  %v3241_v59 = vadd.f32 %v3158_v21, %v8158_v24  ;;  %v8160_v51 = vld [vmem:[#allocation33_spill] sm:$0xff] }
 0x4ba   : > { %v4404_v29 = vadd.f32 1.0, %v5930_v6  ;;  %v3410_v28 = vpop.f32.mrf.mxu2  ;;  %v5932_v23 = vpop.eup %5931 }
 0x4bb   : > { %5933 = vpow2.f32 %v4327_v22  ;;  %v4087_v50 = vmul.f32 %v7817_v57, %v4020_v62  ;;  %v3494_v1 = vadd.f32 %v3410_v28, %v3240_v25  ;;  %v4529_v53 = vmul.f32 %v5932_v23, %v7809_v37 }
 0x4bc   : > { %5935 = vrcp.f32 %v4404_v29  ;;  %v3937_v33 = vpop.f32.mrf.mxu0 }
 0x4bd   : > { %v4154_v11 = vadd.f32 %v7823_v47, %v4087_v50 }
 0x4be   : > { %v3683_v56 = vpop.f32.mrf.mxu3 }
 0x4bf   : > { %v4217_v2 = vsub.f32 0.0, %v4154_v11  ;;  %v3767_v4 = vadd.f32 %v3683_v56, %v3494_v1 }
 0x4c0   : > { %v3161_v19 = vpop.f32.mrf.mxu1 }
 0x4c1   : > { %v5934_v10 = vpop.eup %5933  ;;  %v4329_v38 = vmul.f32 1.442695, %v4217_v2  ;;  %v4021_v32 = vadd.f32 %v3937_v33, %v3767_v4  ;;  %v3242_v14 = vadd.f32 %v3161_v19, %v8159_v41  ;;  %v8161_v2 = vld [vmem:[#allocation34_spill] sm:$0xff] }
 0x4c2   : > { %v5936_v31 = vpop.eup %5935  ;;  %v3412_v63 = vpop.f32.mrf.mxu2  ;;  %v4405_v61 = vadd.f32 1.0, %v5934_v10 }
 0x4c3   : > { %v4530_v16 = vmul.f32 %v5936_v31, %v4152_v40  ;;  %5937 = vpow2.f32 %v4329_v38  ;;  %v4088_v44 = vmul.f32 %v7817_v57, %v4021_v32  ;;  %v3495_v26 = vadd.f32 %v3412_v63, %v3241_v59 }
 0x4c4   : > { %v3939_v17 = vpop.f32.mrf.mxu0  ;;  %5939 = vrcp.f32 %v4405_v61 }
 0x4c5   : > { %v5399_v15 = vpack.c.bf16 %v4530_v16, %v4529_v53  ;;  %v7841_v54 = vadd.f32 %v7823_v47, %v4088_v44 }
 0x4c6   : > { %v3685_v35 = vpop.f32.mrf.mxu3 }
 0x4c7   : > { %5637 = vst [vmem:[%s7349_s8 + $0xb8] sm:$0xff] %v5399_v15   ;;  %v4218_v34 = vsub.f32 0.0, %v7841_v54  ;;  %v3768_v46 = vadd.f32 %v3685_v35, %v3495_v26 }
 0x4c8   : > { %v3163_v48 = vpop.f32.mrf.mxu1 }
 0x4c9   : > { %v5938_v36 = vpop.eup %5937  ;;  %v4331_v37 = vmul.f32 1.442695, %v4218_v34  ;;  %v4022_v40 = vadd.f32 %v3939_v17, %v3768_v46  ;;  %v3243_v27 = vadd.f32 %v3163_v48, %v8160_v51  ;;  %v8162_v17 = vld [vmem:[#allocation19_spill] sm:$0xff] }
 0x4ca   : > { %v4406_v20 = vadd.f32 1.0, %v5938_v36  ;;  %v3415_v18 = vpop.f32.mrf.mxu2  ;;  %v5940_v55 = vpop.eup %5939 }
 0x4cb   : > { %5941 = vpow2.f32 %v4331_v37  ;;  %v4089_v0 = vmul.f32 %v7817_v57, %v4022_v40  ;;  %v3496_v42 = vadd.f32 %v3415_v18, %v3242_v14  ;;  %v4531_v8 = vmul.f32 %v5940_v55, %v7830_v60 }
 0x4cc   : > { %5943 = vrcp.f32 %v4406_v20  ;;  %v3942_v43 = vpop.f32.mrf.mxu0 }
 0x4cd   : > { %v4156_v7 = vadd.f32 %v7823_v47, %v4089_v0 }
 0x4ce   : > { %v3688_v58 = vpop.f32.mrf.mxu3 }
 0x4cf   : > { %v4219_v3 = vsub.f32 0.0, %v4156_v7  ;;  %v3769_v13 = vadd.f32 %v3688_v58, %v3496_v42 }
 0x4d0   : > { %v3166_v52 = vpop.f32.mrf.mxu1 }
 0x4d1   : > { %v5942_v39 = vpop.eup %5941  ;;  %v4333_v30 = vmul.f32 1.442695, %v4219_v3  ;;  %v4023_v45 = vadd.f32 %v3942_v43, %v3769_v13  ;;  %v3244_v4 = vadd.f32 %v3166_v52, %v8161_v2  ;;  %v8163_v3 = vld [vmem:[#allocation43_spill] sm:$0xff] }
 0x4d2   : > { %v5944_v12 = vpop.eup %5943  ;;  %v3417_v21 = vpop.f32.mrf.mxu2  ;;  %v4407_v25 = vadd.f32 1.0, %v5942_v39 }
 0x4d3   : > { %v4532_v6 = vmul.f32 %v5944_v12, %v4154_v11  ;;  %5945 = vpow2.f32 %v4333_v30  ;;  %v4090_v22 = vmul.f32 %v7817_v57, %v4023_v45  ;;  %v3497_v62 = vadd.f32 %v3417_v21, %v3243_v27 }
 0x4d4   : > { %v3944_v28 = vpop.f32.mrf.mxu0  ;;  %5947 = vrcp.f32 %v4407_v25 }
 0x4d5   : > { %v5404_v5 = vpack.c.bf16 %v4532_v6, %v4531_v8  ;;  %v7852_v29 = vadd.f32 %v7823_v47, %v4090_v22 }
 0x4d6   : > { %v3690_v50 = vpop.f32.mrf.mxu3 }
 0x4d7   : > { %5638 = vst [vmem:[%s7349_s8 + $0xc0] sm:$0xff] %v5404_v5   ;;  %v4220_v1 = vsub.f32 0.0, %v7852_v29  ;;  %v3770_v33 = vadd.f32 %v3690_v50, %v3497_v62 }
 0x4d8   : > { %v3168_v56 = vpop.f32.mrf.mxu1 }
 0x4d9   : > { %v5946_v23 = vpop.eup %5945  ;;  %v4335_v60 = vmul.f32 1.442695, %v4220_v1  ;;  %v4024_v11 = vadd.f32 %v3944_v28, %v3770_v33  ;;  %v3245_v35 = vadd.f32 %v3168_v56, %v8162_v17  ;;  %v8164_v28 = vld [vmem:[#allocation35_spill] sm:$0xff] }
 0x4da   : > { %v4408_v19 = vadd.f32 1.0, %v5946_v23  ;;  %v3420_v10 = vpop.f32.mrf.mxu2  ;;  %v5948_v53 = vpop.eup %5947 }
 0x4db   : > { %5949 = vpow2.f32 %v4335_v60  ;;  %v4091_v38 = vmul.f32 %v7817_v57, %v4024_v11  ;;  %v3498_v32 = vadd.f32 %v3420_v10, %v3244_v4  ;;  %v4533_v46 = vmul.f32 %v5948_v53, %v7841_v54 }
 0x4dc   : > { %5951 = vrcp.f32 %v4408_v19  ;;  %v3947_v59 = vpop.f32.mrf.mxu0 }
 0x4dd   : > { %v4158_v24 = vadd.f32 %v7823_v47, %v4091_v38 }
 0x4de   : > { %v3693_v31 = vpop.f32.mrf.mxu3 }
 0x4df   : > { %v4221_v63 = vsub.f32 0.0, %v4158_v24  ;;  %v3771_v16 = vadd.f32 %v3693_v31, %v3498_v32 }
 0x4e0   : > { %v3171_v44 = vpop.f32.mrf.mxu1 }
 0x4e1   : > { %v5950_v26 = vpop.eup %5949  ;;  %v4337_v15 = vmul.f32 1.442695, %v4221_v63  ;;  %v4025_v61 = vadd.f32 %v3947_v59, %v3771_v16  ;;  %v3246_v13 = vadd.f32 %v3171_v44, %v8163_v3 }
 0x4e2   : > { %v5952_v34 = vpop.eup %5951  ;;  %v3422_v48 = vpop.f32.mrf.mxu2  ;;  %v4409_v14 = vadd.f32 1.0, %v5950_v26 }
 0x4e3   : > { %v4534_v36 = vmul.f32 %v5952_v34, %v4156_v7  ;;  %5953 = vpow2.f32 %v4337_v15  ;;  %v4092_v37 = vmul.f32 %v7817_v57, %v4025_v61  ;;  %v3499_v40 = vadd.f32 %v3422_v48, %v3245_v35 }
 0x4e4   : > { %v3949_v18 = vpop.f32.mrf.mxu0  ;;  %5955 = vrcp.f32 %v4409_v14 }
 0x4e5   : > { %v5409_v41 = vpack.c.bf16 %v4534_v36, %v4533_v46  ;;  %v7863_v20 = vadd.f32 %v7823_v47, %v4092_v37 }
 0x4e6   : > { %v3695_v0 = vpop.f32.mrf.mxu3 }
 0x4e7   : > { %5639 = vst [vmem:[%s7349_s8 + $0xc8] sm:$0xff] %v5409_v41   ;;  %v4222_v42 = vsub.f32 0.0, %v7863_v20  ;;  %v3772_v43 = vadd.f32 %v3695_v0, %v3499_v40 }
 0x4e8   : > { %v3173_v58 = vpop.f32.mrf.mxu1 }
 0x4e9   : > { %v5954_v55 = vpop.eup %5953  ;;  %v4339_v54 = vmul.f32 1.442695, %v4222_v42  ;;  %v4026_v7 = vadd.f32 %v3949_v18, %v3772_v43  ;;  %v3247_v50 = vadd.f32 %v3173_v58, %v8164_v28 }
 0x4ea   : > { %v4410_v52 = vadd.f32 1.0, %v5954_v55  ;;  %v3425_v39 = vpop.f32.mrf.mxu2  ;;  %v5956_v8 = vpop.eup %5955 }
 0x4eb   : > { %5957 = vpow2.f32 %v4339_v54  ;;  %v4093_v30 = vmul.f32 %v7817_v57, %v4026_v7  ;;  %v3500_v45 = vadd.f32 %v3425_v39, %v3246_v13  ;;  %v4535_v33 = vmul.f32 %v5956_v8, %v7852_v29 }
 0x4ec   : > { %5959 = vrcp.f32 %v4410_v52  ;;  %v3952_v27 = vpop.f32.mrf.mxu0 }
 0x4ed   : > { %v4160_v51 = vadd.f32 %v7823_v47, %v4093_v30 }
 0x4ee   : > { %v3698_v12 = vpop.f32.mrf.mxu3 }
 0x4ef   : > { %v4223_v21 = vsub.f32 0.0, %v4160_v51  ;;  %v3773_v6 = vadd.f32 %v3698_v12, %v3500_v45 }
 0x4f0   : > { %v3176_v22 = vpop.f32.mrf.mxu1 }
 0x4f1   : > { %v5958_v62 = vpop.eup %5957  ;;  %v4341_v5 = vmul.f32 1.442695, %v4223_v21  ;;  %v4027_v25 = vadd.f32 %v3952_v27, %v3773_v6  ;;  %v3248_v63 = vadd.f32 %v3176_v22, %v7261_v49  ;;  %v8165_v49 = vld [vmem:[#allocation36_spill] sm:$0xff] }
 0x4f2   : > { %v5960_v1 = vpop.eup %5959  ;;  %v3427_v56 = vpop.f32.mrf.mxu2  ;;  %v4411_v4 = vadd.f32 1.0, %v5958_v62 }
 0x4f3   : > { %v4536_v23 = vmul.f32 %v5960_v1, %v4158_v24  ;;  %5961 = vpow2.f32 %v4341_v5  ;;  %v4094_v60 = vmul.f32 %v7817_v57, %v4027_v25  ;;  %v3501_v11 = vadd.f32 %v3427_v56, %v3247_v50 }
 0x4f4   : > { %v3954_v10 = vpop.f32.mrf.mxu0  ;;  %5963 = vrcp.f32 %v4411_v4 }
 0x4f5   : > { %v5414_v2 = vpack.c.bf16 %v4536_v23, %v4535_v33  ;;  %v7874_v19 = vadd.f32 %v7823_v47, %v4094_v60  ;;  %v8166_v60 = vld [vmem:[#allocation23_spill] sm:$0xff] }
 0x4f6   : > { %v3700_v38 = vpop.f32.mrf.mxu3 }
 0x4f7   : > { %5640 = vst [vmem:[%s7349_s8 + $0xd0] sm:$0xff] %v5414_v2   ;;  %v4224_v32 = vsub.f32 0.0, %v7874_v19  ;;  %v3774_v59 = vadd.f32 %v3700_v38, %v3501_v11 }
 0x4f8   : > { %v3178_v31 = vpop.f32.mrf.mxu1 }
 0x4f9   : > { %v5962_v53 = vpop.eup %5961  ;;  %v4343_v29 = vmul.f32 1.442695, %v4224_v32  ;;  %v4028_v24 = vadd.f32 %v3954_v10, %v3774_v59  ;;  %v3249_v14 = vadd.f32 %v3178_v31, %v8165_v49 }
 0x4fa   : > { %v4412_v16 = vadd.f32 1.0, %v5962_v53  ;;  %v3430_v44 = vpop.f32.mrf.mxu2  ;;  %v5964_v34 = vpop.eup %5963 }
 0x4fb   : > { %5965 = vpow2.f32 %v4343_v29  ;;  %v4095_v26 = vmul.f32 %v7817_v57, %v4028_v24  ;;  %v3502_v15 = vadd.f32 %v3430_v44, %v3248_v63  ;;  %v4537_v0 = vmul.f32 %v5964_v34, %v7863_v20 }
 0x4fc   : > { %5967 = vrcp.f32 %v4412_v16  ;;  %v3957_v17 = vpop.f32.mrf.mxu0 }
 0x4fd   : > { %v4162_v61 = vadd.f32 %v7823_v47, %v4095_v26 }
 0x4fe   : > { %v3703_v35 = vpop.f32.mrf.mxu3 }
 0x4ff   : > { %v4225_v46 = vsub.f32 0.0, %v4162_v61  ;;  %v3775_v48 = vadd.f32 %v3703_v35, %v3502_v15  ;;  %v8167_v35 = vld [vmem:[#allocation48_spill] sm:$0xff] }
 0x500   : > { %v3181_v36 = vpop.f32.mrf.mxu1 }
 0x501   : > { %v5966_v37 = vpop.eup %5965  ;;  %v4345_v40 = vmul.f32 1.442695, %v4225_v46  ;;  %v4029_v41 = vadd.f32 %v3957_v17, %v3775_v48  ;;  %v3250_v12 = vadd.f32 %v3181_v36, %v7274_v9 }
 0x502   : > { %v5968_v18 = vpop.eup %5967  ;;  %v3432_v42 = vpop.f32.mrf.mxu2  ;;  %v4413_v7 = vadd.f32 1.0, %v5966_v37 }
 0x503   : > { %v4538_v43 = vmul.f32 %v5968_v18, %v4160_v51  ;;  %5969 = vpow2.f32 %v4345_v40  ;;  %v4096_v58 = vmul.f32 %v7817_v57, %v4029_v41  ;;  %v3503_v55 = vadd.f32 %v3432_v42, %v3249_v14 }
 0x504   : > { %v3959_v13 = vpop.f32.mrf.mxu0  ;;  %5971 = vrcp.f32 %v4413_v7 }
 0x505   : > { %v5419_v54 = vpack.c.bf16 %v4538_v43, %v4537_v0  ;;  %v7885_v3 = vadd.f32 %v7823_v47, %v4096_v58 }
 0x506   : > { %v3705_v52 = vpop.f32.mrf.mxu3 }
 0x507   : > { %5641 = vst [vmem:[%s7349_s8 + $0xd8] sm:$0xff] %v5419_v54   ;;  %v4226_v39 = vsub.f32 0.0, %v7885_v3  ;;  %v3776_v30 = vadd.f32 %v3705_v52, %v3503_v55 }
 0x508   : > { %v3183_v45 = vpop.f32.mrf.mxu1 }
 0x509   : > { %v5970_v27 = vpop.eup %5969  ;;  %v4347_v20 = vmul.f32 1.442695, %v4226_v39  ;;  %v4030_v51 = vadd.f32 %v3959_v13, %v3776_v30  ;;  %v3251_v9 = vadd.f32 %v3183_v45, %v8166_v60 }
 0x50a   : > { %v4414_v8 = vadd.f32 1.0, %v5970_v27  ;;  %v3435_v21 = vpop.f32.mrf.mxu2  ;;  %v5972_v28 = vpop.eup %5971 }
 0x50b   : > { %v4097_v6 = vmul.f32 %v7817_v57, %v4030_v51  ;;  %v3504_v22 = vadd.f32 %v3435_v21, %v3250_v12  ;;  %v4539_v2 = vmul.f32 %v5972_v28, %v7874_v19 }
 0x50c   : > { %5973 = vrcp.f32 %v4414_v8  ;;  %v3962_v5 = vpop.f32.mrf.mxu0 }
 0x50d   : > { %5975 = vpow2.f32 %v4347_v20  ;;  %v4164_v62 = vadd.f32 %v7823_v47, %v4097_v6 }
 0x50e   : > { %v3708_v25 = vpop.f32.mrf.mxu3 }
 0x50f   : > { %v4227_v50 = vsub.f32 0.0, %v4164_v62  ;;  %v3777_v1 = vadd.f32 %v3708_v25, %v3504_v22 }
 0x510   : > { %v3186_v33 = vpop.f32.mrf.mxu1 }
 0x511   : > { %v4349_v56 = vmul.f32 1.442695, %v4227_v50  ;;  %v4031_v23 = vadd.f32 %v3962_v5, %v3777_v1  ;;  %v3252_v34 = vadd.f32 %v3186_v33, %v8167_v35 }
 0x512   : > { %v5974_v11 = vpop.eup %5973  ;;  %v3437_v4 = vpop.f32.mrf.mxu2 }
 0x513   : > { %v5976_v10 = vpop.eup %5975  ;;  %v4540_v38 = vmul.f32 %v5974_v11, %v4162_v61  ;;  %5977 = vpow2.f32 %v4349_v56  ;;  %v4098_v32 = vmul.f32 %v7817_v57, %v4031_v23  ;;  %v3505_v59 = vadd.f32 %v3437_v4, %v3251_v9 }
 0x514   : > { %v3964_v29 = vpop.f32.mrf.mxu0  ;;  %v4415_v24 = vadd.f32 1.0, %v5976_v10 }
 0x515   : > { %v5424_v31 = vpack.c.bf16 %v4540_v38, %v4539_v2  ;;  %v4165_v53 = vadd.f32 %v7823_v47, %v4098_v32 }
 0x516   : > { %v3710_v63 = vpop.f32.mrf.mxu3  ;;  %5979 = vrcp.f32 %v4415_v24 }
 0x517   : > { %5642 = vst [vmem:[%s7349_s8 + $0xe0] sm:$0xff] %v5424_v31   ;;  %v4228_v16 = vsub.f32 0.0, %v4165_v53  ;;  %v3778_v44 = vadd.f32 %v3710_v63, %v3505_v59 }
 0x518   : > { %v3188_v26 = vpop.f32.mrf.mxu1 }
 0x519   : > { %v5978_v15 = vpop.eup %5977  ;;  %v4351_v17 = vmul.f32 1.442695, %v4228_v16  ;;  %v4032_v19 = vadd.f32 %v3964_v29, %v3778_v44 }
 0x51a   : > { %v4416_v61 = vadd.f32 1.0, %v5978_v15  ;;  %v3440_v46 = vpop.f32.mrf.mxu2 }
 0x51b   : > { %v4099_v48 = vmul.f32 %v7817_v57, %v4032_v19  ;;  %v3506_v36 = vadd.f32 %v3440_v46, %v3252_v34 }
 0x51c   : > { %5981 = vrcp.f32 %v4416_v61  ;;  %v3967_v40 = vpop.f32.mrf.mxu0  ;;  %v5980_v18 = vpop.eup %5979 }
 0x51d   : > { %5983 = vpow2.f32 %v4351_v17  ;;  %v4166_v37 = vadd.f32 %v7823_v47, %v4099_v48  ;;  %v4541_v54 = vmul.f32 %v5980_v18, %v7885_v3 }
 0x51e   : > { %v3713_v41 = vpop.f32.mrf.mxu3 }
 0x51f   : > { %v4229_v49 = vsub.f32 0.0, %v4166_v37  ;;  %v3779_v14 = vadd.f32 %v3713_v41, %v3506_v36 }
 0x521   : > { %v4353_v0 = vmul.f32 1.442695, %v4229_v49  ;;  %v4033_v42 = vadd.f32 %v3967_v40, %v3779_v14 }
 0x522   : > { %v5982_v43 = vpop.eup %5981  ;;  %v3442_v58 = vpop.f32.mrf.mxu2 }
 0x523   : > { %v5984_v55 = vpop.eup %5983  ;;  %v4542_v7 = vmul.f32 %v5982_v43, %v4164_v62  ;;  %5985 = vpow2.f32 %v4353_v0  ;;  %v4100_v13 = vmul.f32 %v7817_v57, %v4033_v42 }
 0x524   : > { %v3969_v30 = vpop.f32.mrf.mxu0  ;;  %v4417_v45 = vadd.f32 1.0, %v5984_v55 }
 0x525   : > { %v5429_v52 = vpack.c.bf16 %v4542_v7, %v4541_v54  ;;  %v4167_v39 = vadd.f32 %v7823_v47, %v4100_v13 }
 0x526   : > { %v3715_v27 = vpop.f32.mrf.mxu3  ;;  %5987 = vrcp.f32 %v4417_v45 }
 0x527   : > { %5643 = vst [vmem:[%s7349_s8 + $0xe8] sm:$0xff] %v5429_v52   ;;  %v4230_v20 = vsub.f32 0.0, %v4167_v39 }
 0x529   : > { %v5986_v51 = vpop.eup %5985  ;;  %v4355_v12 = vmul.f32 1.442695, %v4230_v20 }
 0x52a   : > { %v4418_v8 = vadd.f32 1.0, %v5986_v51 }
 0x52b   : > { %5989 = vpow2.f32 %v4355_v12 }
 0x52c   : > { %5991 = vrcp.f32 %v4418_v8  ;;  %v5988_v3 = vpop.eup %5987 }
 0x52d   : > { %v4543_v22 = vmul.f32 %v5988_v3, %v4165_v53 }
 0x531   : > { %v5990_v21 = vpop.eup %5989 }
 0x532   : > { %v5992_v6 = vpop.eup %5991  ;;  %v4419_v57 = vadd.f32 1.0, %v5990_v21 }
 0x533   : > { %v4544_v62 = vmul.f32 %v5992_v6, %v4166_v37 }
 0x534   : > { %5993 = vrcp.f32 %v4419_v57 }
 0x535   : > { %v5434_v47 = vpack.c.bf16 %v4544_v62, %v4543_v22 }
 0x537   : > { %5644 = vst [vmem:[%s7349_s8 + $0xf0] sm:$0xff] %v5434_v47  }
 0x53a   : > { %v5994_v5 = vpop.eup %5993 }
 0x53b   : > { %v4545_v25 = vmul.f32 %v5994_v5, %v4167_v39 }
 0x53d   : > { %v4608_v28 = vpack.c.bf16 %v4545_v25, %v4545_v25 }
 0x53f   : > { %4671 = vst [vmem:[%s7349_s8 + $0xf8] sm:$0xf] %v4608_v28 }
 0x540 PF: > { %s15_s20 = sadd.s32 1, %s6100_s20   ;;  %s8168_s18 = smov %s6096_s19 }
 0x541   : > { %p12_p5 = scmp.ge.s32.totalorder %s15_s20, 4   ;;  %s8169_s19 = smov %s8171_s21 }
 0x543   :  { %14 = sbr.rel (!%p12_p5) target bundleno = 2 (0x2), region = 90 }

</bundles_post_ra>
